<compile_context>
chip_gen: v7x
topology: tpu7x:2x2x1
jax: 0.10.0
libtpu: 0.0.40
codegen_flags: <defaults>
</compile_context>

<pallas_src>
import functools

import jax
import jax.numpy as jnp
import numpy as np
from jax import lax
from jax.experimental import pallas as pl
from jax.experimental.pallas import tpu as pltpu


def _decoder_rnn_kernel(x_ref, h0_ref, c0_ref,
                        wih_ref, b_ref, whh_ref,
                        wout_ref, bout_ref,
                        out_ref, xg_scr, feats_scr, *, T, Bp, H, Hg):
    """Bidirectional LSTM + output projection, whole sequence in one shot.

    x_ref:     (T*Bp, 2H)     time-major input, batch padded to Bp
    h0/c0_ref: (2*Bp, H)      initial states stacked: rows [:Bp]=fwd, [Bp:]=rev
    wih_ref:   (2H, 8*Hg)     [fwd | rev] input->gate weights, gates (i,f,o,g),
                              each gate zero-padded to Hg lanes (vreg aligned)
    b_ref:     (1, 8*Hg)      b_ih + b_hh, same layout
    whh_ref:   (H, 8*Hg)      [fwd | rev] hidden->gate weights, same layout
    wout_ref:  (2*Hg, Op)     output projection; rows [0:H]=fwd, [Hg:Hg+H]=rev
    bout_ref:  (1, Op)
    out_ref:   (T*Bp, Op)
    xg_scr:    (T*Bp, 8*Hg)   batched input-gate preactivations (VMEM scratch)
    feats_scr: (T*Bp, 2*Hg)   per-step hidden history, fwd in [:, :Hg], rev in
                              [:, Hg:] (VMEM scratch)
    """
    G = 4 * Hg

    # Batched input->gate matmul for BOTH directions and ALL timesteps at once,
    # parked in VMEM scratch so the unrolled recurrence only does aligned loads.
    xg_scr[...] = (jnp.dot(x_ref[...], wih_ref[...],
                           preferred_element_type=jnp.float32) + b_ref[...])

    # Zero-init the feature scratch so the padded lanes are well defined
    # (they hit zero rows of wout anyway, but never multiply garbage/NaN).
    feats_scr[...] = jnp.zeros_like(feats_scr)

    # Stacked state: rows [:Bp] = forward chain, rows [Bp:] = reverse chain.
    h = h0_ref[...]                                            # (2Bp, H)
    c = c0_ref[...]

    # TODO(synk): hold whh weight-stationary in the MXU across the unrolled
    # steps via pltpu.matmul_push_rhs/acc_lhs/pop (verify in the bundle dump
    # whether the compiler already hoists the RHS push).
    # TODO(synk): on v7x run the two directions on the two TensorCores
    # (pl.core_map / core-parallel grid axis); kept fused-serial here.
    for t in range(T):                                         # static -> unrolled
        tr = T - 1 - t
        # One MXU op serves both directions; cross quadrants are discarded.
        hw = jnp.dot(h, whh_ref[...],
                     preferred_element_type=jnp.float32)       # (2Bp, 8Hg)
        gf = xg_scr[t * Bp:(t + 1) * Bp, :G] + hw[:Bp, :G]     # fwd gates @ t
        gb = xg_scr[tr * Bp:(tr + 1) * Bp, G:] + hw[Bp:, G:]   # rev gates @ tr
        gates = jnp.concatenate([gf, gb], axis=0)              # (2Bp, 4Hg)

        # Each gate sits at lane offset k*Hg (vreg aligned) -> no lane rotation
        # is needed to combine with c/h which live at lane offset 0.
        i = jax.nn.sigmoid(gates[:, 0 * Hg:0 * Hg + H])
        f = jax.nn.sigmoid(gates[:, 1 * Hg:1 * Hg + H])
        o = jax.nn.sigmoid(gates[:, 2 * Hg:2 * Hg + H])
        g = jnp.tanh(gates[:, 3 * Hg:3 * Hg + H])
        c = f * c + i * g
        h = o * jnp.tanh(c)

        # Off-critical-path history writeback (lane-offset-0 masked stores).
        feats_scr[t * Bp:(t + 1) * Bp, 0:H] = h[:Bp, :]
        feats_scr[tr * Bp:(tr + 1) * Bp, Hg:Hg + H] = h[Bp:, :]

    # Single fused, lane-dense output projection for every timestep at once.
    # TODO(synk): for large T*B tile this (and the input matmul) over a
    # batch/time grid with per-generation VMEM budgets, and cast the batched
    # matmul operands to bf16 on v6e/v7x.
    out_ref[...] = (jnp.dot(feats_scr[...], wout_ref[...],
                            preferred_element_type=jnp.float32)
                    + bout_ref[...])


def _round_up(n, m):
    return int(np.ceil(n / m) * m)


def decoder_rnn_forward(x, h0, c0, params):
    """Pallas wrapper. x: (T, B, 2H); h0, c0: (2, B, H). Returns (T, B, O)."""
    T, B, I = x.shape
    H = params["weight_hh_l0"].shape[1]
    O = params["out_weight"].shape[0]
    assert I == 2 * H

    # Hardware-friendly padding: batch -> 8 sublanes, output -> 128 lanes,
    # each gate block -> full 128-lane vreg (Hg) so gates are vreg aligned.
    Bp = _round_up(B, 8)
    Op = _round_up(O, 128)
    Hg = _round_up(H, 128)

    def prep_gates(w):
        # Last axis: PyTorch gate order (i,f,g,o) -> (i,f,o,g), each gate block
        # zero-padded from H to Hg lanes.
        i, f, g, o = jnp.split(w, 4, axis=-1)
        pad = [(0, 0)] * (w.ndim - 1) + [(0, Hg - H)]
        return jnp.concatenate([jnp.pad(blk, pad) for blk in (i, f, o, g)],
                               axis=-1)

    # --- fused parameters (plain JAX glue) ---
    wih = jnp.concatenate([prep_gates(params["weight_ih_l0"].T),
                           prep_gates(params["weight_ih_l0_reverse"].T)],
                          axis=-1)                                   # (2H, 8Hg)
    whh = jnp.concatenate([prep_gates(params["weight_hh_l0"].T),
                           prep_gates(params["weight_hh_l0_reverse"].T)],
                          axis=-1)                                   # (H, 8Hg)
    b = jnp.concatenate([
        prep_gates((params["bias_ih_l0"]
                    + params["bias_hh_l0"]).reshape(1, 4 * H)),
        prep_gates((params["bias_ih_l0_reverse"]
                    + params["bias_hh_l0_reverse"]).reshape(1, 4 * H))],
        axis=-1)                                                     # (1, 8Hg)

    wout_t = params["out_weight"].T                                  # (2H, O)
    wout = jnp.zeros((2 * Hg, Op), jnp.float32)
    wout = wout.at[0:H, 0:O].set(wout_t[:H])                         # fwd half
    wout = wout.at[Hg:Hg + H, 0:O].set(wout_t[H:])                   # rev half
    bout = jnp.pad(params["out_bias"].reshape(1, O),
                   ((0, 0), (0, Op - O)))                            # (1, Op)

    # --- input prep: pad batch, flatten time, stack initial states by dir ---
    x_p = jnp.pad(x, ((0, 0), (0, Bp - B), (0, 0))).reshape(T * Bp, 2 * H)
    h0_p = jnp.pad(h0, ((0, 0), (0, Bp - B), (0, 0))).reshape(2 * Bp, H)
    c0_p = jnp.pad(c0, ((0, 0), (0, Bp - B), (0, 0))).reshape(2 * Bp, H)

    ins = (x_p, h0_p, c0_p, wih, b, whh, wout, bout)
    vmem_spec = pl.BlockSpec(memory_space=pltpu.MemorySpace.VMEM)

    out2d = pl.pallas_call(
        functools.partial(_decoder_rnn_kernel, T=T, Bp=Bp, H=H, Hg=Hg),
        out_shape=jax.ShapeDtypeStruct((T * Bp, Op), jnp.float32),
        in_specs=[vmem_spec] * len(ins),
        out_specs=vmem_spec,
        scratch_shapes=[pltpu.VMEM((T * Bp, 8 * Hg), jnp.float32),   # xg
                        pltpu.VMEM((T * Bp, 2 * Hg), jnp.float32)],  # feats
    )(*ins)

    # TODO(synk): for large T*B revisit the O->Op lane padding of the HBM
    # writeback (8x bytes here) by folding a factor of T/B into the lane axis.
    return out2d.reshape(T, Bp, Op)[:, :B, :O]


def decoder_rnn_reference(x, h0, c0, params):
    """Pure-JAX reference matching torch.nn.LSTM(bidirectional) + Linear."""
    def direction(x_seq, h, c, wih, whh, bih, bhh):
        def step(carry, x_t):
            h, c = carry
            gates = x_t @ wih.T + bih + h @ whh.T + bhh
            i, f, g, o = jnp.split(gates, 4, axis=-1)
            i, f, o = jax.nn.sigmoid(i), jax.nn.sigmoid(f), jax.nn.sigmoid(o)
            g = jnp.tanh(g)
            c = f * c + i * g
            h = o * jnp.tanh(c)
            return (h, c), h
        _, hs = lax.scan(step, (h, c), x_seq)
        return hs

    hf = direction(x, h0[0], c0[0],
                   params["weight_ih_l0"], params["weight_hh_l0"],
                   params["bias_ih_l0"], params["bias_hh_l0"])
    hb = direction(x[::-1], h0[1], c0[1],
                   params["weight_ih_l0_reverse"], params["weight_hh_l0_reverse"],
                   params["bias_ih_l0_reverse"], params["bias_hh_l0_reverse"])[::-1]
    feats = jnp.concatenate([hf, hb], axis=-1)                       # (T, B, 2H)
    return feats @ params["out_weight"].T + params["out_bias"]


def init_params(key, hidden_size, output_size):
    """Deterministic synthetic parameters with PyTorch-style shapes."""
    H, O = hidden_size, output_size
    I = 2 * H
    scale = 1.0 / np.sqrt(H)
    names_shapes = [
        ("weight_ih_l0", (4 * H, I)), ("weight_hh_l0", (4 * H, H)),
        ("bias_ih_l0", (4 * H,)), ("bias_hh_l0", (4 * H,)),
        ("weight_ih_l0_reverse", (4 * H, I)), ("weight_hh_l0_reverse", (4 * H, H)),
        ("bias_ih_l0_reverse", (4 * H,)), ("bias_hh_l0_reverse", (4 * H,)),
        ("out_weight", (O, 2 * H)), ("out_bias", (O,)),
    ]
    keys = jax.random.split(key, len(names_shapes))
    return {name: jax.random.uniform(k, shape, jnp.float32, -scale, scale)
            for (name, shape), k in zip(names_shapes, keys)}


if __name__ == "__main__":
    T, B, H, O = 8, 2, 32, 16   # seq_len, batch, hidden_size, output_size

    key = jax.random.PRNGKey(0)
    kx, kh, kc, kp = jax.random.split(key, 4)
    x = jax.random.normal(kx, (T, B, 2 * H), jnp.float32)
    h0 = jax.random.normal(kh, (2, B, H), jnp.float32)
    c0 = jax.random.normal(kc, (2, B, H), jnp.float32)
    params = init_params(kp, H, O)

    out = decoder_rnn_forward(x, h0, c0, params)
    out = jax.block_until_ready(out)

    ref = jax.block_until_ready(decoder_rnn_reference(x, h0, c0, params))
    np.testing.assert_allclose(np.asarray(out), np.asarray(ref),
                               rtol=1e-2, atol=1e-2)

    print("KERNEL_OK")
</pallas_src>

<mosaic_0001>
module attributes {stable_mosaic.version = 11 : i64} {
  func.func @_decoder_rnn_kernel(%arg0: memref<64x64xf32, #tpu.memory_space<vmem>>, %arg1: memref<16x32xf32, #tpu.memory_space<vmem>>, %arg2: memref<16x32xf32, #tpu.memory_space<vmem>>, %arg3: memref<64x1024xf32, #tpu.memory_space<vmem>>, %arg4: memref<1x1024xf32, #tpu.memory_space<vmem>>, %arg5: memref<32x1024xf32, #tpu.memory_space<vmem>>, %arg6: memref<256x128xf32, #tpu.memory_space<vmem>>, %arg7: memref<1x128xf32, #tpu.memory_space<vmem>>, %arg8: memref<64x128xf32, #tpu.memory_space<vmem>>, %arg9: memref<64x1024xf32, #tpu.memory_space<vmem>>, %arg10: memref<64x256xf32, #tpu.memory_space<vmem>>) attributes {dimension_semantics = [], scalar_prefetch = 0 : i64, scratch_operands = 2 : i64, tpu.core_type = #tpu.core_type<tc>} {
    %c0 = arith.constant 0 : index
    %c0_0 = arith.constant 0 : index
    %0 = vector.load %arg0[%c0, %c0_0] : memref<64x64xf32, #tpu.memory_space<vmem>>, vector<64x64xf32>
    %c0_1 = arith.constant 0 : index
    %c0_2 = arith.constant 0 : index
    %1 = vector.load %arg3[%c0_1, %c0_2] : memref<64x1024xf32, #tpu.memory_space<vmem>>, vector<64x1024xf32>
    %cst = arith.constant dense<0.000000e+00> : vector<64x1024xf32>
    %2 = tpu.matmul %0, %1, %cst {dimension_numbers = #tpu.dot_dimension_numbers<[1], [0], [0], [1], [0, 0, 1, 1], [], []>} : vector<64x64xf32>, vector<64x1024xf32>, vector<64x1024xf32> -> vector<64x1024xf32>
    %c0_3 = arith.constant 0 : index
    %c0_4 = arith.constant 0 : index
    %3 = vector.load %arg4[%c0_3, %c0_4] : memref<1x1024xf32, #tpu.memory_space<vmem>>, vector<1x1024xf32>
    %4 = vector.broadcast %3 : vector<1x1024xf32> to vector<64x1024xf32>
    %5 = arith.addf %2, %4 : vector<64x1024xf32>
    %c0_5 = arith.constant 0 : index
    %c0_6 = arith.constant 0 : index
    %6 = vector.load %arg9[%c0_5, %c0_6] : memref<64x1024xf32, #tpu.memory_space<vmem>>, vector<64x1024xf32>
    tpu.vector_store %arg9[%c0_5, %c0_6], %5 {strides = array<i32>} : memref<64x1024xf32, #tpu.memory_space<vmem>>, vector<64x1024xf32>,
    %cst_7 = arith.constant 0.000000e+00 : f32
    %7 = vector.broadcast %cst_7 : f32 to vector<64x256xf32>
    %c0_8 = arith.constant 0 : index
    %c0_9 = arith.constant 0 : index
    %8 = vector.load %arg10[%c0_8, %c0_9] : memref<64x256xf32, #tpu.memory_space<vmem>>, vector<64x256xf32>
    tpu.vector_store %arg10[%c0_8, %c0_9], %7 {strides = array<i32>} : memref<64x256xf32, #tpu.memory_space<vmem>>, vector<64x256xf32>,
    %c0_10 = arith.constant 0 : index
    %c0_11 = arith.constant 0 : index
    %9 = vector.load %arg1[%c0_10, %c0_11] : memref<16x32xf32, #tpu.memory_space<vmem>>, vector<16x32xf32>
    %c0_12 = arith.constant 0 : index
    %c0_13 = arith.constant 0 : index
    %10 = vector.load %arg2[%c0_12, %c0_13] : memref<16x32xf32, #tpu.memory_space<vmem>>, vector<16x32xf32>
    %c0_14 = arith.constant 0 : index
    %c0_15 = arith.constant 0 : index
    %11 = vector.load %arg5[%c0_14, %c0_15] : memref<32x1024xf32, #tpu.memory_space<vmem>>, vector<32x1024xf32>
    %cst_16 = arith.constant dense<0.000000e+00> : vector<16x1024xf32>
    %12 = tpu.matmul %9, %11, %cst_16 {dimension_numbers = #tpu.dot_dimension_numbers<[1], [0], [0], [1], [0, 0, 1, 1], [], []>} : vector<16x32xf32>, vector<32x1024xf32>, vector<16x1024xf32> -> vector<16x1024xf32>
    %c0_17 = arith.constant 0 : index
    %c0_18 = arith.constant 0 : index
    %13 = vector.load %arg9[%c0_17, %c0_18] : memref<64x1024xf32, #tpu.memory_space<vmem>>, vector<8x512xf32>
    %14 = vector.extract_strided_slice %12 {offsets = [0, 0], sizes = [8, 512], strides = [1, 1]} : vector<16x1024xf32> to vector<8x512xf32>
    %15 = arith.addf %13, %14 : vector<8x512xf32>
    %c56 = arith.constant 56 : index
    %c512 = arith.constant 512 : index
    %16 = vector.load %arg9[%c56, %c512] : memref<64x1024xf32, #tpu.memory_space<vmem>>, vector<8x512xf32>
    %17 = vector.extract_strided_slice %12 {offsets = [8, 512], sizes = [8, 512], strides = [1, 1]} : vector<16x1024xf32> to vector<8x512xf32>
    %18 = arith.addf %16, %17 : vector<8x512xf32>
    %19 = tpu.concatenate %15, %18 in 0 : vector<8x512xf32>, vector<8x512xf32> -> vector<16x512xf32>
    %20 = vector.extract_strided_slice %19 {offsets = [0, 0], sizes = [16, 32], strides = [1, 1]} : vector<16x512xf32> to vector<16x32xf32>
    %21 = arith.negf %20 : vector<16x32xf32>
    %22 = math.exp %21 : vector<16x32xf32>
    %cst_19 = arith.constant 1.000000e+00 : f32
    %23 = vector.broadcast %cst_19 : f32 to vector<16x32xf32>
    %24 = arith.addf %23, %22 : vector<16x32xf32>
    %25 = arith.divf %23, %24 : vector<16x32xf32>
    %26 = vector.extract_strided_slice %19 {offsets = [0, 128], sizes = [16, 32], strides = [1, 1]} : vector<16x512xf32> to vector<16x32xf32>
    %27 = arith.negf %26 : vector<16x32xf32>
    %28 = math.exp %27 : vector<16x32xf32>
    %cst_20 = arith.constant 1.000000e+00 : f32
    %29 = vector.broadcast %cst_20 : f32 to vector<16x32xf32>
    %30 = arith.addf %29, %28 : vector<16x32xf32>
    %31 = arith.divf %29, %30 : vector<16x32xf32>
    %32 = vector.extract_strided_slice %19 {offsets = [0, 256], sizes = [16, 32], strides = [1, 1]} : vector<16x512xf32> to vector<16x32xf32>
    %33 = arith.negf %32 : vector<16x32xf32>
    %34 = math.exp %33 : vector<16x32xf32>
    %cst_21 = arith.constant 1.000000e+00 : f32
    %35 = vector.broadcast %cst_21 : f32 to vector<16x32xf32>
    %36 = arith.addf %35, %34 : vector<16x32xf32>
    %37 = arith.divf %35, %36 : vector<16x32xf32>
    %38 = vector.extract_strided_slice %19 {offsets = [0, 384], sizes = [16, 32], strides = [1, 1]} : vector<16x512xf32> to vector<16x32xf32>
    %39 = math.tanh %38 : vector<16x32xf32>
    %40 = arith.mulf %31, %10 : vector<16x32xf32>
    %41 = arith.mulf %25, %39 : vector<16x32xf32>
    %42 = arith.addf %40, %41 : vector<16x32xf32>
    %43 = math.tanh %42 : vector<16x32xf32>
    %44 = arith.mulf %37, %43 : vector<16x32xf32>
    %45 = vector.extract_strided_slice %44 {offsets = [0, 0], sizes = [8, 32], strides = [1, 1]} : vector<16x32xf32> to vector<8x32xf32>
    %c0_22 = arith.constant 0 : index
    %c0_23 = arith.constant 0 : index
    %46 = vector.load %arg10[%c0_22, %c0_23] : memref<64x256xf32, #tpu.memory_space<vmem>>, vector<8x32xf32>
    tpu.vector_store %arg10[%c0_22, %c0_23], %45 {strides = array<i32>} : memref<64x256xf32, #tpu.memory_space<vmem>>, vector<8x32xf32>,
    %47 = vector.extract_strided_slice %44 {offsets = [8, 0], sizes = [8, 32], strides = [1, 1]} : vector<16x32xf32> to vector<8x32xf32>
    %c56_24 = arith.constant 56 : index
    %c128 = arith.constant 128 : index
    %48 = vector.load %arg10[%c56_24, %c128] : memref<64x256xf32, #tpu.memory_space<vmem>>, vector<8x32xf32>
    tpu.vector_store %arg10[%c56_24, %c128], %47 {strides = array<i32>} : memref<64x256xf32, #tpu.memory_space<vmem>>, vector<8x32xf32>,
    %c0_25 = arith.constant 0 : index
    %c0_26 = arith.constant 0 : index
    %49 = vector.load %arg5[%c0_25, %c0_26] : memref<32x1024xf32, #tpu.memory_space<vmem>>, vector<32x1024xf32>
    %cst_27 = arith.constant dense<0.000000e+00> : vector<16x1024xf32>
    %50 = tpu.matmul %44, %49, %cst_27 {dimension_numbers = #tpu.dot_dimension_numbers<[1], [0], [0], [1], [0, 0, 1, 1], [], []>} : vector<16x32xf32>, vector<32x1024xf32>, vector<16x1024xf32> -> vector<16x1024xf32>
    %c8 = arith.constant 8 : index
    %c0_28 = arith.constant 0 : index
    %51 = vector.load %arg9[%c8, %c0_28] : memref<64x1024xf32, #tpu.memory_space<vmem>>, vector<8x512xf32>
    %52 = vector.extract_strided_slice %50 {offsets = [0, 0], sizes = [8, 512], strides = [1, 1]} : vector<16x1024xf32> to vector<8x512xf32>
    %53 = arith.addf %51, %52 : vector<8x512xf32>
    %c48 = arith.constant 48 : index
    %c512_29 = arith.constant 512 : index
    %54 = vector.load %arg9[%c48, %c512_29] : memref<64x1024xf32, #tpu.memory_space<vmem>>, vector<8x512xf32>
    %55 = vector.extract_strided_slice %50 {offsets = [8, 512], sizes = [8, 512], strides = [1, 1]} : vector<16x1024xf32> to vector<8x512xf32>
    %56 = arith.addf %54, %55 : vector<8x512xf32>
    %57 = tpu.concatenate %53, %56 in 0 : vector<8x512xf32>, vector<8x512xf32> -> vector<16x512xf32>
    %58 = vector.extract_strided_slice %57 {offsets = [0, 0], sizes = [16, 32], strides = [1, 1]} : vector<16x512xf32> to vector<16x32xf32>
    %59 = arith.negf %58 : vector<16x32xf32>
    %60 = math.exp %59 : vector<16x32xf32>
    %cst_30 = arith.constant 1.000000e+00 : f32
    %61 = vector.broadcast %cst_30 : f32 to vector<16x32xf32>
    %62 = arith.addf %61, %60 : vector<16x32xf32>
    %63 = arith.divf %61, %62 : vector<16x32xf32>
    %64 = vector.extract_strided_slice %57 {offsets = [0, 128], sizes = [16, 32], strides = [1, 1]} : vector<16x512xf32> to vector<16x32xf32>
    %65 = arith.negf %64 : vector<16x32xf32>
    %66 = math.exp %65 : vector<16x32xf32>
    %cst_31 = arith.constant 1.000000e+00 : f32
    %67 = vector.broadcast %cst_31 : f32 to vector<16x32xf32>
    %68 = arith.addf %67, %66 : vector<16x32xf32>
    %69 = arith.divf %67, %68 : vector<16x32xf32>
    %70 = vector.extract_strided_slice %57 {offsets = [0, 256], sizes = [16, 32], strides = [1, 1]} : vector<16x512xf32> to vector<16x32xf32>
    %71 = arith.negf %70 : vector<16x32xf32>
    %72 = math.exp %71 : vector<16x32xf32>
    %cst_32 = arith.constant 1.000000e+00 : f32
    %73 = vector.broadcast %cst_32 : f32 to vector<16x32xf32>
    %74 = arith.addf %73, %72 : vector<16x32xf32>
    %75 = arith.divf %73, %74 : vector<16x32xf32>
    %76 = vector.extract_strided_slice %57 {offsets = [0, 384], sizes = [16, 32], strides = [1, 1]} : vector<16x512xf32> to vector<16x32xf32>
    %77 = math.tanh %76 : vector<16x32xf32>
    %78 = arith.mulf %69, %42 : vector<16x32xf32>
    %79 = arith.mulf %63, %77 : vector<16x32xf32>
    %80 = arith.addf %78, %79 : vector<16x32xf32>
    %81 = math.tanh %80 : vector<16x32xf32>
    %82 = arith.mulf %75, %81 : vector<16x32xf32>
    %83 = vector.extract_strided_slice %82 {offsets = [0, 0], sizes = [8, 32], strides = [1, 1]} : vector<16x32xf32> to vector<8x32xf32>
    %c8_33 = arith.constant 8 : index
    %c0_34 = arith.constant 0 : index
    %84 = vector.load %arg10[%c8_33, %c0_34] : memref<64x256xf32, #tpu.memory_space<vmem>>, vector<8x32xf32>
    tpu.vector_store %arg10[%c8_33, %c0_34], %83 {strides = array<i32>} : memref<64x256xf32, #tpu.memory_space<vmem>>, vector<8x32xf32>,
    %85 = vector.extract_strided_slice %82 {offsets = [8, 0], sizes = [8, 32], strides = [1, 1]} : vector<16x32xf32> to vector<8x32xf32>
    %c48_35 = arith.constant 48 : index
    %c128_36 = arith.constant 128 : index
    %86 = vector.load %arg10[%c48_35, %c128_36] : memref<64x256xf32, #tpu.memory_space<vmem>>, vector<8x32xf32>
    tpu.vector_store %arg10[%c48_35, %c128_36], %85 {strides = array<i32>} : memref<64x256xf32, #tpu.memory_space<vmem>>, vector<8x32xf32>,
    %c0_37 = arith.constant 0 : index
    %c0_38 = arith.constant 0 : index
    %87 = vector.load %arg5[%c0_37, %c0_38] : memref<32x1024xf32, #tpu.memory_space<vmem>>, vector<32x1024xf32>
    %cst_39 = arith.constant dense<0.000000e+00> : vector<16x1024xf32>
    %88 = tpu.matmul %82, %87, %cst_39 {dimension_numbers = #tpu.dot_dimension_numbers<[1], [0], [0], [1], [0, 0, 1, 1], [], []>} : vector<16x32xf32>, vector<32x1024xf32>, vector<16x1024xf32> -> vector<16x1024xf32>
    %c16 = arith.constant 16 : index
    %c0_40 = arith.constant 0 : index
    %89 = vector.load %arg9[%c16, %c0_40] : memref<64x1024xf32, #tpu.memory_space<vmem>>, vector<8x512xf32>
    %90 = vector.extract_strided_slice %88 {offsets = [0, 0], sizes = [8, 512], strides = [1, 1]} : vector<16x1024xf32> to vector<8x512xf32>
    %91 = arith.addf %89, %90 : vector<8x512xf32>
    %c40 = arith.constant 40 : index
    %c512_41 = arith.constant 512 : index
    %92 = vector.load %arg9[%c40, %c512_41] : memref<64x1024xf32, #tpu.memory_space<vmem>>, vector<8x512xf32>
    %93 = vector.extract_strided_slice %88 {offsets = [8, 512], sizes = [8, 512], strides = [1, 1]} : vector<16x1024xf32> to vector<8x512xf32>
    %94 = arith.addf %92, %93 : vector<8x512xf32>
    %95 = tpu.concatenate %91, %94 in 0 : vector<8x512xf32>, vector<8x512xf32> -> vector<16x512xf32>
    %96 = vector.extract_strided_slice %95 {offsets = [0, 0], sizes = [16, 32], strides = [1, 1]} : vector<16x512xf32> to vector<16x32xf32>
    %97 = arith.negf %96 : vector<16x32xf32>
    %98 = math.exp %97 : vector<16x32xf32>
    %cst_42 = arith.constant 1.000000e+00 : f32
    %99 = vector.broadcast %cst_42 : f32 to vector<16x32xf32>
    %100 = arith.addf %99, %98 : vector<16x32xf32>
    %101 = arith.divf %99, %100 : vector<16x32xf32>
    %102 = vector.extract_strided_slice %95 {offsets = [0, 128], sizes = [16, 32], strides = [1, 1]} : vector<16x512xf32> to vector<16x32xf32>
    %103 = arith.negf %102 : vector<16x32xf32>
    %104 = math.exp %103 : vector<16x32xf32>
    %cst_43 = arith.constant 1.000000e+00 : f32
    %105 = vector.broadcast %cst_43 : f32 to vector<16x32xf32>
    %106 = arith.addf %105, %104 : vector<16x32xf32>
    %107 = arith.divf %105, %106 : vector<16x32xf32>
    %108 = vector.extract_strided_slice %95 {offsets = [0, 256], sizes = [16, 32], strides = [1, 1]} : vector<16x512xf32> to vector<16x32xf32>
    %109 = arith.negf %108 : vector<16x32xf32>
    %110 = math.exp %109 : vector<16x32xf32>
    %cst_44 = arith.constant 1.000000e+00 : f32
    %111 = vector.broadcast %cst_44 : f32 to vector<16x32xf32>
    %112 = arith.addf %111, %110 : vector<16x32xf32>
    %113 = arith.divf %111, %112 : vector<16x32xf32>
    %114 = vector.extract_strided_slice %95 {offsets = [0, 384], sizes = [16, 32], strides = [1, 1]} : vector<16x512xf32> to vector<16x32xf32>
    %115 = math.tanh %114 : vector<16x32xf32>
    %116 = arith.mulf %107, %80 : vector<16x32xf32>
    %117 = arith.mulf %101, %115 : vector<16x32xf32>
    %118 = arith.addf %116, %117 : vector<16x32xf32>
    %119 = math.tanh %118 : vector<16x32xf32>
    %120 = arith.mulf %113, %119 : vector<16x32xf32>
    %121 = vector.extract_strided_slice %120 {offsets = [0, 0], sizes = [8, 32], strides = [1, 1]} : vector<16x32xf32> to vector<8x32xf32>
    %c16_45 = arith.constant 16 : index
    %c0_46 = arith.constant 0 : index
    %122 = vector.load %arg10[%c16_45, %c0_46] : memref<64x256xf32, #tpu.memory_space<vmem>>, vector<8x32xf32>
    tpu.vector_store %arg10[%c16_45, %c0_46], %121 {strides = array<i32>} : memref<64x256xf32, #tpu.memory_space<vmem>>, vector<8x32xf32>,
    %123 = vector.extract_strided_slice %120 {offsets = [8, 0], sizes = [8, 32], strides = [1, 1]} : vector<16x32xf32> to vector<8x32xf32>
    %c40_47 = arith.constant 40 : index
    %c128_48 = arith.constant 128 : index
    %124 = vector.load %arg10[%c40_47, %c128_48] : memref<64x256xf32, #tpu.memory_space<vmem>>, vector<8x32xf32>
    tpu.vector_store %arg10[%c40_47, %c128_48], %123 {strides = array<i32>} : memref<64x256xf32, #tpu.memory_space<vmem>>, vector<8x32xf32>,
    %c0_49 = arith.constant 0 : index
    %c0_50 = arith.constant 0 : index
    %125 = vector.load %arg5[%c0_49, %c0_50] : memref<32x1024xf32, #tpu.memory_space<vmem>>, vector<32x1024xf32>
    %cst_51 = arith.constant dense<0.000000e+00> : vector<16x1024xf32>
    %126 = tpu.matmul %120, %125, %cst_51 {dimension_numbers = #tpu.dot_dimension_numbers<[1], [0], [0], [1], [0, 0, 1, 1], [], []>} : vector<16x32xf32>, vector<32x1024xf32>, vector<16x1024xf32> -> vector<16x1024xf32>
    %c24 = arith.constant 24 : index
    %c0_52 = arith.constant 0 : index
    %127 = vector.load %arg9[%c24, %c0_52] : memref<64x1024xf32, #tpu.memory_space<vmem>>, vector<8x512xf32>
    %128 = vector.extract_strided_slice %126 {offsets = [0, 0], sizes = [8, 512], strides = [1, 1]} : vector<16x1024xf32> to vector<8x512xf32>
    %129 = arith.addf %127, %128 : vector<8x512xf32>
    %c32 = arith.constant 32 : index
    %c512_53 = arith.constant 512 : index
    %130 = vector.load %arg9[%c32, %c512_53] : memref<64x1024xf32, #tpu.memory_space<vmem>>, vector<8x512xf32>
    %131 = vector.extract_strided_slice %126 {offsets = [8, 512], sizes = [8, 512], strides = [1, 1]} : vector<16x1024xf32> to vector<8x512xf32>
    %132 = arith.addf %130, %131 : vector<8x512xf32>
    %133 = tpu.concatenate %129, %132 in 0 : vector<8x512xf32>, vector<8x512xf32> -> vector<16x512xf32>
    %134 = vector.extract_strided_slice %133 {offsets = [0, 0], sizes = [16, 32], strides = [1, 1]} : vector<16x512xf32> to vector<16x32xf32>
    %135 = arith.negf %134 : vector<16x32xf32>
    %136 = math.exp %135 : vector<16x32xf32>
    %cst_54 = arith.constant 1.000000e+00 : f32
    %137 = vector.broadcast %cst_54 : f32 to vector<16x32xf32>
    %138 = arith.addf %137, %136 : vector<16x32xf32>
    %139 = arith.divf %137, %138 : vector<16x32xf32>
    %140 = vector.extract_strided_slice %133 {offsets = [0, 128], sizes = [16, 32], strides = [1, 1]} : vector<16x512xf32> to vector<16x32xf32>
    %141 = arith.negf %140 : vector<16x32xf32>
    %142 = math.exp %141 : vector<16x32xf32>
    %cst_55 = arith.constant 1.000000e+00 : f32
    %143 = vector.broadcast %cst_55 : f32 to vector<16x32xf32>
    %144 = arith.addf %143, %142 : vector<16x32xf32>
    %145 = arith.divf %143, %144 : vector<16x32xf32>
    %146 = vector.extract_strided_slice %133 {offsets = [0, 256], sizes = [16, 32], strides = [1, 1]} : vector<16x512xf32> to vector<16x32xf32>
    %147 = arith.negf %146 : vector<16x32xf32>
    %148 = math.exp %147 : vector<16x32xf32>
    %cst_56 = arith.constant 1.000000e+00 : f32
    %149 = vector.broadcast %cst_56 : f32 to vector<16x32xf32>
    %150 = arith.addf %149, %148 : vector<16x32xf32>
    %151 = arith.divf %149, %150 : vector<16x32xf32>
    %152 = vector.extract_strided_slice %133 {offsets = [0, 384], sizes = [16, 32], strides = [1, 1]} : vector<16x512xf32> to vector<16x32xf32>
    %153 = math.tanh %152 : vector<16x32xf32>
    %154 = arith.mulf %145, %118 : vector<16x32xf32>
    %155 = arith.mulf %139, %153 : vector<16x32xf32>
    %156 = arith.addf %154, %155 : vector<16x32xf32>
    %157 = math.tanh %156 : vector<16x32xf32>
    %158 = arith.mulf %151, %157 : vector<16x32xf32>
    %159 = vector.extract_strided_slice %158 {offsets = [0, 0], sizes = [8, 32], strides = [1, 1]} : vector<16x32xf32> to vector<8x32xf32>
    %c24_57 = arith.constant 24 : index
    %c0_58 = arith.constant 0 : index
    %160 = vector.load %arg10[%c24_57, %c0_58] : memref<64x256xf32, #tpu.memory_space<vmem>>, vector<8x32xf32>
    tpu.vector_store %arg10[%c24_57, %c0_58], %159 {strides = array<i32>} : memref<64x256xf32, #tpu.memory_space<vmem>>, vector<8x32xf32>,
    %161 = vector.extract_strided_slice %158 {offsets = [8, 0], sizes = [8, 32], strides = [1, 1]} : vector<16x32xf32> to vector<8x32xf32>
    %c32_59 = arith.constant 32 : index
    %c128_60 = arith.constant 128 : index
    %162 = vector.load %arg10[%c32_59, %c128_60] : memref<64x256xf32, #tpu.memory_space<vmem>>, vector<8x32xf32>
    tpu.vector_store %arg10[%c32_59, %c128_60], %161 {strides = array<i32>} : memref<64x256xf32, #tpu.memory_space<vmem>>, vector<8x32xf32>,
    %c0_61 = arith.constant 0 : index
    %c0_62 = arith.constant 0 : index
    %163 = vector.load %arg5[%c0_61, %c0_62] : memref<32x1024xf32, #tpu.memory_space<vmem>>, vector<32x1024xf32>
    %cst_63 = arith.constant dense<0.000000e+00> : vector<16x1024xf32>
    %164 = tpu.matmul %158, %163, %cst_63 {dimension_numbers = #tpu.dot_dimension_numbers<[1], [0], [0], [1], [0, 0, 1, 1], [], []>} : vector<16x32xf32>, vector<32x1024xf32>, vector<16x1024xf32> -> vector<16x1024xf32>
    %c32_64 = arith.constant 32 : index
    %c0_65 = arith.constant 0 : index
    %165 = vector.load %arg9[%c32_64, %c0_65] : memref<64x1024xf32, #tpu.memory_space<vmem>>, vector<8x512xf32>
    %166 = vector.extract_strided_slice %164 {offsets = [0, 0], sizes = [8, 512], strides = [1, 1]} : vector<16x1024xf32> to vector<8x512xf32>
    %167 = arith.addf %165, %166 : vector<8x512xf32>
    %c24_66 = arith.constant 24 : index
    %c512_67 = arith.constant 512 : index
    %168 = vector.load %arg9[%c24_66, %c512_67] : memref<64x1024xf32, #tpu.memory_space<vmem>>, vector<8x512xf32>
    %169 = vector.extract_strided_slice %164 {offsets = [8, 512], sizes = [8, 512], strides = [1, 1]} : vector<16x1024xf32> to vector<8x512xf32>
    %170 = arith.addf %168, %169 : vector<8x512xf32>
    %171 = tpu.concatenate %167, %170 in 0 : vector<8x512xf32>, vector<8x512xf32> -> vector<16x512xf32>
    %172 = vector.extract_strided_slice %171 {offsets = [0, 0], sizes = [16, 32], strides = [1, 1]} : vector<16x512xf32> to vector<16x32xf32>
    %173 = arith.negf %172 : vector<16x32xf32>
    %174 = math.exp %173 : vector<16x32xf32>
    %cst_68 = arith.constant 1.000000e+00 : f32
    %175 = vector.broadcast %cst_68 : f32 to vector<16x32xf32>
    %176 = arith.addf %175, %174 : vector<16x32xf32>
    %177 = arith.divf %175, %176 : vector<16x32xf32>
    %178 = vector.extract_strided_slice %171 {offsets = [0, 128], sizes = [16, 32], strides = [1, 1]} : vector<16x512xf32> to vector<16x32xf32>
    %179 = arith.negf %178 : vector<16x32xf32>
    %180 = math.exp %179 : vector<16x32xf32>
    %cst_69 = arith.constant 1.000000e+00 : f32
    %181 = vector.broadcast %cst_69 : f32 to vector<16x32xf32>
    %182 = arith.addf %181, %180 : vector<16x32xf32>
    %183 = arith.divf %181, %182 : vector<16x32xf32>
    %184 = vector.extract_strided_slice %171 {offsets = [0, 256], sizes = [16, 32], strides = [1, 1]} : vector<16x512xf32> to vector<16x32xf32>
    %185 = arith.negf %184 : vector<16x32xf32>
    %186 = math.exp %185 : vector<16x32xf32>
    %cst_70 = arith.constant 1.000000e+00 : f32
    %187 = vector.broadcast %cst_70 : f32 to vector<16x32xf32>
    %188 = arith.addf %187, %186 : vector<16x32xf32>
    %189 = arith.divf %187, %188 : vector<16x32xf32>
    %190 = vector.extract_strided_slice %171 {offsets = [0, 384], sizes = [16, 32], strides = [1, 1]} : vector<16x512xf32> to vector<16x32xf32>
    %191 = math.tanh %190 : vector<16x32xf32>
    %192 = arith.mulf %183, %156 : vector<16x32xf32>
    %193 = arith.mulf %177, %191 : vector<16x32xf32>
    %194 = arith.addf %192, %193 : vector<16x32xf32>
    %195 = math.tanh %194 : vector<16x32xf32>
    %196 = arith.mulf %189, %195 : vector<16x32xf32>
    %197 = vector.extract_strided_slice %196 {offsets = [0, 0], sizes = [8, 32], strides = [1, 1]} : vector<16x32xf32> to vector<8x32xf32>
    %c32_71 = arith.constant 32 : index
    %c0_72 = arith.constant 0 : index
    %198 = vector.load %arg10[%c32_71, %c0_72] : memref<64x256xf32, #tpu.memory_space<vmem>>, vector<8x32xf32>
    tpu.vector_store %arg10[%c32_71, %c0_72], %197 {strides = array<i32>} : memref<64x256xf32, #tpu.memory_space<vmem>>, vector<8x32xf32>,
    %199 = vector.extract_strided_slice %196 {offsets = [8, 0], sizes = [8, 32], strides = [1, 1]} : vector<16x32xf32> to vector<8x32xf32>
    %c24_73 = arith.constant 24 : index
    %c128_74 = arith.constant 128 : index
    %200 = vector.load %arg10[%c24_73, %c128_74] : memref<64x256xf32, #tpu.memory_space<vmem>>, vector<8x32xf32>
    tpu.vector_store %arg10[%c24_73, %c128_74], %199 {strides = array<i32>} : memref<64x256xf32, #tpu.memory_space<vmem>>, vector<8x32xf32>,
    %c0_75 = arith.constant 0 : index
    %c0_76 = arith.constant 0 : index
    %201 = vector.load %arg5[%c0_75, %c0_76] : memref<32x1024xf32, #tpu.memory_space<vmem>>, vector<32x1024xf32>
    %cst_77 = arith.constant dense<0.000000e+00> : vector<16x1024xf32>
    %202 = tpu.matmul %196, %201, %cst_77 {dimension_numbers = #tpu.dot_dimension_numbers<[1], [0], [0], [1], [0, 0, 1, 1], [], []>} : vector<16x32xf32>, vector<32x1024xf32>, vector<16x1024xf32> -> vector<16x1024xf32>
    %c40_78 = arith.constant 40 : index
    %c0_79 = arith.constant 0 : index
    %203 = vector.load %arg9[%c40_78, %c0_79] : memref<64x1024xf32, #tpu.memory_space<vmem>>, vector<8x512xf32>
    %204 = vector.extract_strided_slice %202 {offsets = [0, 0], sizes = [8, 512], strides = [1, 1]} : vector<16x1024xf32> to vector<8x512xf32>
    %205 = arith.addf %203, %204 : vector<8x512xf32>
    %c16_80 = arith.constant 16 : index
    %c512_81 = arith.constant 512 : index
    %206 = vector.load %arg9[%c16_80, %c512_81] : memref<64x1024xf32, #tpu.memory_space<vmem>>, vector<8x512xf32>
    %207 = vector.extract_strided_slice %202 {offsets = [8, 512], sizes = [8, 512], strides = [1, 1]} : vector<16x1024xf32> to vector<8x512xf32>
    %208 = arith.addf %206, %207 : vector<8x512xf32>
    %209 = tpu.concatenate %205, %208 in 0 : vector<8x512xf32>, vector<8x512xf32> -> vector<16x512xf32>
    %210 = vector.extract_strided_slice %209 {offsets = [0, 0], sizes = [16, 32], strides = [1, 1]} : vector<16x512xf32> to vector<16x32xf32>
    %211 = arith.negf %210 : vector<16x32xf32>
    %212 = math.exp %211 : vector<16x32xf32>
    %cst_82 = arith.constant 1.000000e+00 : f32
    %213 = vector.broadcast %cst_82 : f32 to vector<16x32xf32>
    %214 = arith.addf %213, %212 : vector<16x32xf32>
    %215 = arith.divf %213, %214 : vector<16x32xf32>
    %216 = vector.extract_strided_slice %209 {offsets = [0, 128], sizes = [16, 32], strides = [1, 1]} : vector<16x512xf32> to vector<16x32xf32>
    %217 = arith.negf %216 : vector<16x32xf32>
    %218 = math.exp %217 : vector<16x32xf32>
    %cst_83 = arith.constant 1.000000e+00 : f32
    %219 = vector.broadcast %cst_83 : f32 to vector<16x32xf32>
    %220 = arith.addf %219, %218 : vector<16x32xf32>
    %221 = arith.divf %219, %220 : vector<16x32xf32>
    %222 = vector.extract_strided_slice %209 {offsets = [0, 256], sizes = [16, 32], strides = [1, 1]} : vector<16x512xf32> to vector<16x32xf32>
    %223 = arith.negf %222 : vector<16x32xf32>
    %224 = math.exp %223 : vector<16x32xf32>
    %cst_84 = arith.constant 1.000000e+00 : f32
    %225 = vector.broadcast %cst_84 : f32 to vector<16x32xf32>
    %226 = arith.addf %225, %224 : vector<16x32xf32>
    %227 = arith.divf %225, %226 : vector<16x32xf32>
    %228 = vector.extract_strided_slice %209 {offsets = [0, 384], sizes = [16, 32], strides = [1, 1]} : vector<16x512xf32> to vector<16x32xf32>
    %229 = math.tanh %228 : vector<16x32xf32>
    %230 = arith.mulf %221, %194 : vector<16x32xf32>
    %231 = arith.mulf %215, %229 : vector<16x32xf32>
    %232 = arith.addf %230, %231 : vector<16x32xf32>
    %233 = math.tanh %232 : vector<16x32xf32>
    %234 = arith.mulf %227, %233 : vector<16x32xf32>
    %235 = vector.extract_strided_slice %234 {offsets = [0, 0], sizes = [8, 32], strides = [1, 1]} : vector<16x32xf32> to vector<8x32xf32>
    %c40_85 = arith.constant 40 : index
    %c0_86 = arith.constant 0 : index
    %236 = vector.load %arg10[%c40_85, %c0_86] : memref<64x256xf32, #tpu.memory_space<vmem>>, vector<8x32xf32>
    tpu.vector_store %arg10[%c40_85, %c0_86], %235 {strides = array<i32>} : memref<64x256xf32, #tpu.memory_space<vmem>>, vector<8x32xf32>,
    %237 = vector.extract_strided_slice %234 {offsets = [8, 0], sizes = [8, 32], strides = [1, 1]} : vector<16x32xf32> to vector<8x32xf32>
    %c16_87 = arith.constant 16 : index
    %c128_88 = arith.constant 128 : index
    %238 = vector.load %arg10[%c16_87, %c128_88] : memref<64x256xf32, #tpu.memory_space<vmem>>, vector<8x32xf32>
    tpu.vector_store %arg10[%c16_87, %c128_88], %237 {strides = array<i32>} : memref<64x256xf32, #tpu.memory_space<vmem>>, vector<8x32xf32>,
    %c0_89 = arith.constant 0 : index
    %c0_90 = arith.constant 0 : index
    %239 = vector.load %arg5[%c0_89, %c0_90] : memref<32x1024xf32, #tpu.memory_space<vmem>>, vector<32x1024xf32>
    %cst_91 = arith.constant dense<0.000000e+00> : vector<16x1024xf32>
    %240 = tpu.matmul %234, %239, %cst_91 {dimension_numbers = #tpu.dot_dimension_numbers<[1], [0], [0], [1], [0, 0, 1, 1], [], []>} : vector<16x32xf32>, vector<32x1024xf32>, vector<16x1024xf32> -> vector<16x1024xf32>
    %c48_92 = arith.constant 48 : index
    %c0_93 = arith.constant 0 : index
    %241 = vector.load %arg9[%c48_92, %c0_93] : memref<64x1024xf32, #tpu.memory_space<vmem>>, vector<8x512xf32>
    %242 = vector.extract_strided_slice %240 {offsets = [0, 0], sizes = [8, 512], strides = [1, 1]} : vector<16x1024xf32> to vector<8x512xf32>
    %243 = arith.addf %241, %242 : vector<8x512xf32>
    %c8_94 = arith.constant 8 : index
    %c512_95 = arith.constant 512 : index
    %244 = vector.load %arg9[%c8_94, %c512_95] : memref<64x1024xf32, #tpu.memory_space<vmem>>, vector<8x512xf32>
    %245 = vector.extract_strided_slice %240 {offsets = [8, 512], sizes = [8, 512], strides = [1, 1]} : vector<16x1024xf32> to vector<8x512xf32>
    %246 = arith.addf %244, %245 : vector<8x512xf32>
    %247 = tpu.concatenate %243, %246 in 0 : vector<8x512xf32>, vector<8x512xf32> -> vector<16x512xf32>
    %248 = vector.extract_strided_slice %247 {offsets = [0, 0], sizes = [16, 32], strides = [1, 1]} : vector<16x512xf32> to vector<16x32xf32>
    %249 = arith.negf %248 : vector<16x32xf32>
    %250 = math.exp %249 : vector<16x32xf32>
    %cst_96 = arith.constant 1.000000e+00 : f32
    %251 = vector.broadcast %cst_96 : f32 to vector<16x32xf32>
    %252 = arith.addf %251, %250 : vector<16x32xf32>
    %253 = arith.divf %251, %252 : vector<16x32xf32>
    %254 = vector.extract_strided_slice %247 {offsets = [0, 128], sizes = [16, 32], strides = [1, 1]} : vector<16x512xf32> to vector<16x32xf32>
    %255 = arith.negf %254 : vector<16x32xf32>
    %256 = math.exp %255 : vector<16x32xf32>
    %cst_97 = arith.constant 1.000000e+00 : f32
    %257 = vector.broadcast %cst_97 : f32 to vector<16x32xf32>
    %258 = arith.addf %257, %256 : vector<16x32xf32>
    %259 = arith.divf %257, %258 : vector<16x32xf32>
    %260 = vector.extract_strided_slice %247 {offsets = [0, 256], sizes = [16, 32], strides = [1, 1]} : vector<16x512xf32> to vector<16x32xf32>
    %261 = arith.negf %260 : vector<16x32xf32>
    %262 = math.exp %261 : vector<16x32xf32>
    %cst_98 = arith.constant 1.000000e+00 : f32
    %263 = vector.broadcast %cst_98 : f32 to vector<16x32xf32>
    %264 = arith.addf %263, %262 : vector<16x32xf32>
    %265 = arith.divf %263, %264 : vector<16x32xf32>
    %266 = vector.extract_strided_slice %247 {offsets = [0, 384], sizes = [16, 32], strides = [1, 1]} : vector<16x512xf32> to vector<16x32xf32>
    %267 = math.tanh %266 : vector<16x32xf32>
    %268 = arith.mulf %259, %232 : vector<16x32xf32>
    %269 = arith.mulf %253, %267 : vector<16x32xf32>
    %270 = arith.addf %268, %269 : vector<16x32xf32>
    %271 = math.tanh %270 : vector<16x32xf32>
    %272 = arith.mulf %265, %271 : vector<16x32xf32>
    %273 = vector.extract_strided_slice %272 {offsets = [0, 0], sizes = [8, 32], strides = [1, 1]} : vector<16x32xf32> to vector<8x32xf32>
    %c48_99 = arith.constant 48 : index
    %c0_100 = arith.constant 0 : index
    %274 = vector.load %arg10[%c48_99, %c0_100] : memref<64x256xf32, #tpu.memory_space<vmem>>, vector<8x32xf32>
    tpu.vector_store %arg10[%c48_99, %c0_100], %273 {strides = array<i32>} : memref<64x256xf32, #tpu.memory_space<vmem>>, vector<8x32xf32>,
    %275 = vector.extract_strided_slice %272 {offsets = [8, 0], sizes = [8, 32], strides = [1, 1]} : vector<16x32xf32> to vector<8x32xf32>
    %c8_101 = arith.constant 8 : index
    %c128_102 = arith.constant 128 : index
    %276 = vector.load %arg10[%c8_101, %c128_102] : memref<64x256xf32, #tpu.memory_space<vmem>>, vector<8x32xf32>
    tpu.vector_store %arg10[%c8_101, %c128_102], %275 {strides = array<i32>} : memref<64x256xf32, #tpu.memory_space<vmem>>, vector<8x32xf32>,
    %c0_103 = arith.constant 0 : index
    %c0_104 = arith.constant 0 : index
    %277 = vector.load %arg5[%c0_103, %c0_104] : memref<32x1024xf32, #tpu.memory_space<vmem>>, vector<32x1024xf32>
    %cst_105 = arith.constant dense<0.000000e+00> : vector<16x1024xf32>
    %278 = tpu.matmul %272, %277, %cst_105 {dimension_numbers = #tpu.dot_dimension_numbers<[1], [0], [0], [1], [0, 0, 1, 1], [], []>} : vector<16x32xf32>, vector<32x1024xf32>, vector<16x1024xf32> -> vector<16x1024xf32>
    %c56_106 = arith.constant 56 : index
    %c0_107 = arith.constant 0 : index
    %279 = vector.load %arg9[%c56_106, %c0_107] : memref<64x1024xf32, #tpu.memory_space<vmem>>, vector<8x512xf32>
    %280 = vector.extract_strided_slice %278 {offsets = [0, 0], sizes = [8, 512], strides = [1, 1]} : vector<16x1024xf32> to vector<8x512xf32>
    %281 = arith.addf %279, %280 : vector<8x512xf32>
    %c0_108 = arith.constant 0 : index
    %c512_109 = arith.constant 512 : index
    %282 = vector.load %arg9[%c0_108, %c512_109] : memref<64x1024xf32, #tpu.memory_space<vmem>>, vector<8x512xf32>
    %283 = vector.extract_strided_slice %278 {offsets = [8, 512], sizes = [8, 512], strides = [1, 1]} : vector<16x1024xf32> to vector<8x512xf32>
    %284 = arith.addf %282, %283 : vector<8x512xf32>
    %285 = tpu.concatenate %281, %284 in 0 : vector<8x512xf32>, vector<8x512xf32> -> vector<16x512xf32>
    %286 = vector.extract_strided_slice %285 {offsets = [0, 0], sizes = [16, 32], strides = [1, 1]} : vector<16x512xf32> to vector<16x32xf32>
    %287 = arith.negf %286 : vector<16x32xf32>
    %288 = math.exp %287 : vector<16x32xf32>
    %cst_110 = arith.constant 1.000000e+00 : f32
    %289 = vector.broadcast %cst_110 : f32 to vector<16x32xf32>
    %290 = arith.addf %289, %288 : vector<16x32xf32>
    %291 = arith.divf %289, %290 : vector<16x32xf32>
    %292 = vector.extract_strided_slice %285 {offsets = [0, 128], sizes = [16, 32], strides = [1, 1]} : vector<16x512xf32> to vector<16x32xf32>
    %293 = arith.negf %292 : vector<16x32xf32>
    %294 = math.exp %293 : vector<16x32xf32>
    %cst_111 = arith.constant 1.000000e+00 : f32
    %295 = vector.broadcast %cst_111 : f32 to vector<16x32xf32>
    %296 = arith.addf %295, %294 : vector<16x32xf32>
    %297 = arith.divf %295, %296 : vector<16x32xf32>
    %298 = vector.extract_strided_slice %285 {offsets = [0, 256], sizes = [16, 32], strides = [1, 1]} : vector<16x512xf32> to vector<16x32xf32>
    %299 = arith.negf %298 : vector<16x32xf32>
    %300 = math.exp %299 : vector<16x32xf32>
    %cst_112 = arith.constant 1.000000e+00 : f32
    %301 = vector.broadcast %cst_112 : f32 to vector<16x32xf32>
    %302 = arith.addf %301, %300 : vector<16x32xf32>
    %303 = arith.divf %301, %302 : vector<16x32xf32>
    %304 = vector.extract_strided_slice %285 {offsets = [0, 384], sizes = [16, 32], strides = [1, 1]} : vector<16x512xf32> to vector<16x32xf32>
    %305 = math.tanh %304 : vector<16x32xf32>
    %306 = arith.mulf %297, %270 : vector<16x32xf32>
    %307 = arith.mulf %291, %305 : vector<16x32xf32>
    %308 = arith.addf %306, %307 : vector<16x32xf32>
    %309 = math.tanh %308 : vector<16x32xf32>
    %310 = arith.mulf %303, %309 : vector<16x32xf32>
    %311 = vector.extract_strided_slice %310 {offsets = [0, 0], sizes = [8, 32], strides = [1, 1]} : vector<16x32xf32> to vector<8x32xf32>
    %c56_113 = arith.constant 56 : index
    %c0_114 = arith.constant 0 : index
    %312 = vector.load %arg10[%c56_113, %c0_114] : memref<64x256xf32, #tpu.memory_space<vmem>>, vector<8x32xf32>
    tpu.vector_store %arg10[%c56_113, %c0_114], %311 {strides = array<i32>} : memref<64x256xf32, #tpu.memory_space<vmem>>, vector<8x32xf32>,
    %313 = vector.extract_strided_slice %310 {offsets = [8, 0], sizes = [8, 32], strides = [1, 1]} : vector<16x32xf32> to vector<8x32xf32>
    %c0_115 = arith.constant 0 : index
    %c128_116 = arith.constant 128 : index
    %314 = vector.load %arg10[%c0_115, %c128_116] : memref<64x256xf32, #tpu.memory_space<vmem>>, vector<8x32xf32>
    tpu.vector_store %arg10[%c0_115, %c128_116], %313 {strides = array<i32>} : memref<64x256xf32, #tpu.memory_space<vmem>>, vector<8x32xf32>,
    %c0_117 = arith.constant 0 : index
    %c0_118 = arith.constant 0 : index
    %315 = vector.load %arg10[%c0_117, %c0_118] : memref<64x256xf32, #tpu.memory_space<vmem>>, vector<64x256xf32>
    %c0_119 = arith.constant 0 : index
    %c0_120 = arith.constant 0 : index
    %316 = vector.load %arg6[%c0_119, %c0_120] : memref<256x128xf32, #tpu.memory_space<vmem>>, vector<256x128xf32>
    %cst_121 = arith.constant dense<0.000000e+00> : vector<64x128xf32>
    %317 = tpu.matmul %315, %316, %cst_121 {dimension_numbers = #tpu.dot_dimension_numbers<[1], [0], [0], [1], [0, 0, 1, 1], [], []>} : vector<64x256xf32>, vector<256x128xf32>, vector<64x128xf32> -> vector<64x128xf32>
    %c0_122 = arith.constant 0 : index
    %c0_123 = arith.constant 0 : index
    %318 = vector.load %arg7[%c0_122, %c0_123] : memref<1x128xf32, #tpu.memory_space<vmem>>, vector<1x128xf32>
    %319 = vector.broadcast %318 : vector<1x128xf32> to vector<64x128xf32>
    %320 = arith.addf %317, %319 : vector<64x128xf32>
    %c0_124 = arith.constant 0 : index
    %c0_125 = arith.constant 0 : index
    %321 = vector.load %arg8[%c0_124, %c0_125] : memref<64x128xf32, #tpu.memory_space<vmem>>, vector<64x128xf32>
    tpu.vector_store %arg8[%c0_124, %c0_125], %320 {strides = array<i32>} : memref<64x128xf32, #tpu.memory_space<vmem>>, vector<64x128xf32>,
    return
  }
}

</mosaic_0001>

<bundles_post_ra>
// kernel: tpu_custom_call.1
= control target key start
LH: loop header
LB: loop body
LE: loop exit
PB: predicated region body
PF: predicated region fallthrough
CT: control target
= control target key end

     0   :  { %13 = vsyncpa [#allocation5], 0  ;;  %s6172_s0 = inlined_call_operand.hbm [shape: f32[64,64], index: 0, kind: input, shape index: {}]   ;;  %s6173_s1 = inlined_call_operand.hbm [shape: f32[16,32], index: 1, kind: input, shape index: {}]   ;;  %s6174_s2 = inlined_call_operand.hbm [shape: f32[16,32], index: 2, kind: input, shape index: {}]   ;;  %s6175_s3 = inlined_call_operand.hbm [shape: f32[64,1024], index: 3, kind: input, shape index: {}]   ;;  %s6176_s4 = inlined_call_operand.vmem [shape: f32[1,1024], index: 4, kind: input, shape index: {}]   ;;  %s6177_s5 = inlined_call_operand.hbm [shape: f32[32,1024], index: 5, kind: input, shape index: {}]   ;;  %s6178_s6 = inlined_call_operand.hbm [shape: f32[256,128], index: 6, kind: input, shape index: {}]   ;;  %s6179_s7 = inlined_call_operand.vmem [shape: f32[1,128], index: 7, kind: input, shape index: {}]   ;;  %s6180_s8 = inlined_call_operand.hbm [shape: f32[64,128], index: 8, kind: output, shape index: {}]  }
   0x1   :  { %14 = vsyncpa [#allocation8], 0 }
   0x2   :  { %15 = vsyncpa [#allocation11], 0 }
   0x3   :  { %16 = vsyncpa [#allocation14], 0 }
   0x4   :  { %17 = vsyncpa [#allocation6], 0  ;;  %s5323_s27 = smov [#allocation7]   ;;  %s5324_s29 = smov [#allocation10]  }
   0x5   :  { %s35_s28 = sshll.u32 %s5323_s27, 4  ;;  %s59_s30 = sshll.u32 %s5324_s29, 4  ;;  %s36_s28 = int_to_ptr.vmem [resolvable:$true] %s35_s28  ;;  %s5380_s30 = int_to_ptr.vmem [resolvable:$true] %s59_s30 }
   0x6   :  { %s5159_s11 = scalar_lea.hbm %s6173_s1, 256 }
   0x7   :  { %p5160_p0 = scmp.ne.s32.totalorder %s6173_s1, %s5159_s11  ;;  %p5163_p1 = scmp.lt.u32.totalorder %s5159_s11, %s6173_s1 }
   0x9   :  { %p5165_p2 = pnand %p5163_p1, %p5160_p0 }
   0xb   :  { %5168 = shalt.err (!%p5165_p2)
}
   0xc   :  { %s5169_s16 = scalar_lea.vmem %s36_s28, 256  ;;  %p5174_p4 = scmp.lt.s32.totalorder %s36_s28, %s36_s28 }
   0xd   :  { %p5170_p3 = scmp.ne.s32.totalorder %s36_s28, %s5169_s16  ;;  %p5175_p5 = scmp.lt.s32.totalorder %s5169_s16, %s5169_s16 }
   0xf   :  { %p5176_p6 = por %p5175_p5, %p5174_p4 }
  0x11   :  { %p5177_p7 = pnand %p5176_p6, %p5170_p3 }
  0x13   :  { %5180 = shalt.err (!%p5177_p7)
}
  0x14   :  { %s5325_s17 = smov 128   ;;  %s5326_s18 = smov 8  }
  0x15   :  { %41 = dma.hbm_to_vmem [thread:$0]  %s6173_s1, 256, %s36_s28, [#allocation8], %s5325_s17, %s5325_s17, %s5326_s18  }
  0x16   :  { %s5181_s23 = scalar_lea.hbm %s6175_s3, 8192 }
  0x17   :  { %p5182_p8 = scmp.ne.s32.totalorder %s6175_s3, %s5181_s23  ;;  %p5185_p9 = scmp.lt.u32.totalorder %s5181_s23, %s6175_s3 }
  0x19   :  { %p5187_p10 = pnand %p5185_p9, %p5182_p8 }
  0x1b   :  { %5190 = shalt.err (!%p5187_p10)
}
  0x1c   :  { %s5191_s29 = scalar_lea.vmem %s5380_s30, 8192  ;;  %p5196_p12 = scmp.lt.s32.totalorder %s5380_s30, %s5380_s30 }
  0x1d   :  { %p5192_p11 = scmp.ne.s32.totalorder %s5380_s30, %s5191_s29  ;;  %p5197_p13 = scmp.lt.s32.totalorder %s5191_s29, %s5191_s29 }
  0x1f   :  { %p5198_p0 = por %p5197_p13, %p5196_p12 }
  0x21   :  { %p5199_p1 = pnand %p5198_p0, %p5192_p11 }
  0x23   :  { %5202 = shalt.err (!%p5199_p1)
}
  0x24   :  { %s5327_s1 = smov 1024   ;;  %s5328_s28 = smov 64  }
  0x25   :  { %65 = dma.hbm_to_vmem [thread:$0]  %s6175_s3, 8192, %s5380_s30, [#allocation11], %s5327_s1, %s5327_s1, %s5328_s28  }
  0x26   :  { %s5329_s11 = smov [#allocation4]   ;;  %s5330_s13 = smov [#allocation9]  }
  0x27   :  { %s23_s12 = sshll.u32 %s5329_s11, 4  ;;  %s47_s14 = sshll.u32 %s5330_s13, 4  ;;  %s24_s12 = int_to_ptr.vmem [resolvable:$true] %s23_s12  ;;  %s5417_s14 = int_to_ptr.vmem [resolvable:$true] %s47_s14 }
  0x28   :  { %s5203_s19 = scalar_lea.hbm %s6172_s0, 1024 }
  0x29   :  { %p5204_p2 = scmp.ne.s32.totalorder %s6172_s0, %s5203_s19  ;;  %p5207_p3 = scmp.lt.u32.totalorder %s5203_s19, %s6172_s0 }
  0x2b   :  { %p5209_p4 = pnand %p5207_p3, %p5204_p2 }
  0x2d   :  { %5212 = shalt.err (!%p5209_p4)
}
  0x2e   :  { %s5213_s3 = scalar_lea.vmem %s24_s12, 1024  ;;  %p5218_p6 = scmp.lt.s32.totalorder %s24_s12, %s24_s12 }
  0x2f   :  { %p5214_p5 = scmp.ne.s32.totalorder %s24_s12, %s5213_s3  ;;  %p5219_p7 = scmp.lt.s32.totalorder %s5213_s3, %s5213_s3 }
  0x31   :  { %p5220_p8 = por %p5219_p7, %p5218_p6 }
  0x33   :  { %p5221_p9 = pnand %p5220_p8, %p5214_p5 }
  0x35   :  { %5224 = shalt.err (!%p5221_p9)
}
  0x36   :  { %29 = dma.hbm_to_vmem [thread:$0]  %s6172_s0, 1024, %s24_s12, [#allocation5], %s5325_s17, %s5325_s17, %s5326_s18  }
  0x37   :  { %s5225_s27 = scalar_lea.hbm %s6174_s2, 256 }
  0x38   :  { %p5226_p10 = scmp.ne.s32.totalorder %s6174_s2, %s5225_s27  ;;  %p5229_p11 = scmp.lt.u32.totalorder %s5225_s27, %s6174_s2 }
  0x3a   :  { %p5231_p12 = pnand %p5229_p11, %p5226_p10 }
  0x3c   :  { %5234 = shalt.err (!%p5231_p12)
}
  0x3d   :  { %s5235_s13 = scalar_lea.vmem %s5417_s14, 256  ;;  %p5240_p0 = scmp.lt.s32.totalorder %s5417_s14, %s5417_s14 }
  0x3e   :  { %p5236_p13 = scmp.ne.s32.totalorder %s5417_s14, %s5235_s13  ;;  %p5241_p1 = scmp.lt.s32.totalorder %s5235_s13, %s5235_s13 }
  0x40   :  { %p5242_p2 = por %p5241_p1, %p5240_p0 }
  0x42   :  { %p5243_p3 = pnand %p5242_p2, %p5236_p13 }
  0x44   :  { %5246 = shalt.err (!%p5243_p3)
}
  0x45   :  { %53 = dma.hbm_to_vmem [thread:$0]  %s6174_s2, 256, %s5417_s14, [#allocation8], %s5325_s17, %s5325_s17, %s5326_s18  }
  0x46   :  { %s5331_s15 = smov [#allocation12]   ;;  %s5332_s19 = smov [#allocation13]  }
  0x47   :  { %s73_s16 = sshll.u32 %s5331_s15, 4  ;;  %s85_s20 = sshll.u32 %s5332_s19, 4  ;;  %s74_s16 = int_to_ptr.vmem [resolvable:$true] %s73_s16  ;;  %s5454_s20 = int_to_ptr.vmem [resolvable:$true] %s85_s20 }
  0x48   :  { %s5247_s23 = scalar_lea.hbm %s6177_s5, 4096 }
  0x49   :  { %p5248_p4 = scmp.ne.s32.totalorder %s6177_s5, %s5247_s23  ;;  %p5251_p5 = scmp.lt.u32.totalorder %s5247_s23, %s6177_s5 }
  0x4b   :  { %p5253_p6 = pnand %p5251_p5, %p5248_p4 }
  0x4d   :  { %5256 = shalt.err (!%p5253_p6)
}
  0x4e   :  { %s5257_s2 = scalar_lea.vmem %s74_s16, 4096  ;;  %p5262_p8 = scmp.lt.s32.totalorder %s74_s16, %s74_s16 }
  0x4f   :  { %p5258_p7 = scmp.ne.s32.totalorder %s74_s16, %s5257_s2  ;;  %p5263_p9 = scmp.lt.s32.totalorder %s5257_s2, %s5257_s2 }
  0x51   :  { %p5264_p10 = por %p5263_p9, %p5262_p8 }
  0x53   :  { %p5265_p11 = pnand %p5264_p10, %p5258_p7 }
  0x55   :  { %5268 = shalt.err (!%p5265_p11)
}
  0x56   :  { %79 = dma.hbm_to_vmem [thread:$0]  %s6177_s5, 4096, %s74_s16, [#allocation11], %s5327_s1, %s5327_s1, %s5328_s28  }
  0x57   :  { %s5269_s9 = scalar_lea.hbm %s6178_s6, 4096 }
  0x58   :  { %p5270_p12 = scmp.ne.s32.totalorder %s6178_s6, %s5269_s9  ;;  %p5273_p13 = scmp.lt.u32.totalorder %s5269_s9, %s6178_s6 }
  0x5a   :  { %p5275_p0 = pnand %p5273_p13, %p5270_p12 }
  0x5c   :  { %5278 = shalt.err (!%p5275_p0)
}
  0x5d   :  { %s5279_s12 = scalar_lea.vmem %s5454_s20, 4096  ;;  %p5284_p2 = scmp.lt.s32.totalorder %s5454_s20, %s5454_s20 }
  0x5e   :  { %p5280_p1 = scmp.ne.s32.totalorder %s5454_s20, %s5279_s12  ;;  %p5285_p3 = scmp.lt.s32.totalorder %s5279_s12, %s5279_s12 }
  0x60   :  { %p5286_p4 = por %p5285_p3, %p5284_p2 }
  0x62   :  { %p5287_p5 = pnand %p5286_p4, %p5280_p1 }
  0x64   :  { %5290 = shalt.err (!%p5287_p5)
}
  0x65   :  { %91 = dma.hbm_to_vmem [thread:$0]  %s6178_s6, 4096, %s5454_s20, [#allocation14], %s5325_s17, %s5325_s17, %s5326_s18  }
  0x66   :  { %5313 = dma.done.wait [#allocation5], 1024  }
  0x67   :  { %5314 = vsyncadd [#allocation5], 4294966272 }
  0x68   :  { %5315 = dma.done.wait [#allocation8], 512  }
  0x69   :  { %5316 = vsyncadd [#allocation8], 4294966784 }
  0x6a   :  { %5317 = dma.done.wait [#allocation11], 12288  }
  0x6b   :  { %5318 = vsyncadd [#allocation11], 4294955008 }
  0x6c   :  { %5319 = dma.done.wait [#allocation14], 4096  }
  0x6d   :  { %5320 = vsyncadd [#allocation14], 4294963200  ;;  %v5333_v0 = vmov 0.0   ;;  %v121_v1 = vld [vmem:[#allocation10 + $0x8] sm:$0xff]  ;;  %v120_v6 = vld [vmem:[#allocation10] sm:$0xff]  ;;  %vm226_vm0 = vcmask 523264  }
  0x6e   :  { %315 = vmatprep.mubr.f32.mxu1 %v5333_v0  ;;  %767 = vst [vmem:[#allocation3] sm:$0xff] %v5333_v0  ;;  %768 = vst [vmem:[#allocation3 + $0x8] sm:$0xff] %v5333_v0  ;;  %541 = vmatprep.mubr.f32.mxu0 %v5333_v0  ;;  %v129_v2 = vld [vmem:[#allocation10 + $0x48] sm:$0xff]  ;;  %v128_v7 = vld [vmem:[#allocation10 + $0x40] sm:$0xff]  ;;  %vm819_vm1 = vcmask 261120  }
  0x6f   :  { %769 = vst [vmem:[#allocation3 + $0x10] sm:$0xff] %v5333_v0  ;;  %770 = vst [vmem:[#allocation3 + $0x18] sm:$0xff] %v5333_v0  ;;  %v125_v3 = vld [vmem:[#allocation10 + $0x28] sm:$0xff]  ;;  %v4409_v4 = vpack.c.bf16 %v129_v2, %v121_v1  ;;  %v4411_v9 = vpack.c.bf16 %v128_v7, %v120_v6  ;;  %v124_v10 = vld [vmem:[#allocation10 + $0x20] sm:$0xff] }
  0x70   :  { %771 = vst [vmem:[#allocation3 + $0x20] sm:$0xff] %v5333_v0  ;;  %772 = vst [vmem:[#allocation3 + $0x28] sm:$0xff] %v5333_v0  ;;  %v133_v5 = vld [vmem:[#allocation10 + $0x68] sm:$0xff]  ;;  %v132_v11 = vld [vmem:[#allocation10 + $0x60] sm:$0xff] }
  0x71   :  { %773 = vst [vmem:[#allocation3 + $0x30] sm:$0xff] %v5333_v0  ;;  %774 = vst [vmem:[#allocation3 + $0x38] sm:$0xff] %v5333_v0  ;;  %v4441_v8 = vpack.c.bf16 %v133_v5, %v125_v3  ;;  %v137_v12 = vld [vmem:[#allocation10 + $0x88] sm:$0xff]  ;;  %4410 = vmatprep.subr.bf16.mxu1 %v4409_v4  ;;  %v4443_v13 = vpack.c.bf16 %v132_v11, %v124_v10  ;;  %v136_v19 = vld [vmem:[#allocation10 + $0x80] sm:$0xff] }
  0x72   :  { %775 = vst [vmem:[#allocation3 + $0x40] sm:$0xff] %v5333_v0  ;;  %776 = vst [vmem:[#allocation3 + $0x48] sm:$0xff] %v5333_v0  ;;  %v145_v14 = vld [vmem:[#allocation10 + $0xc8] sm:$0xff]  ;;  %4412 = vmatpush1.bf16.msra.mxu1 %v4411_v9  ;;  %v144_v20 = vld [vmem:[#allocation10 + $0xc0] sm:$0xff] }
  0x73   :  { %777 = vst [vmem:[#allocation3 + $0x50] sm:$0xff] %v5333_v0  ;;  %778 = vst [vmem:[#allocation3 + $0x58] sm:$0xff] %v5333_v0  ;;  %v141_v15 = vld [vmem:[#allocation10 + $0xa8] sm:$0xff]  ;;  %4442 = vmatprep.subr.bf16.mxu0 %v4441_v8  ;;  %v4413_v17 = vpack.c.bf16 %v145_v14, %v137_v12  ;;  %v140_v21 = vld [vmem:[#allocation10 + $0xa0] sm:$0xff]  ;;  %v4415_v22 = vpack.c.bf16 %v144_v20, %v136_v19 }
  0x74   :  { %779 = vst [vmem:[#allocation3 + $0x60] sm:$0xff] %v5333_v0  ;;  %780 = vst [vmem:[#allocation3 + $0x68] sm:$0xff] %v5333_v0  ;;  %v149_v16 = vld [vmem:[#allocation10 + $0xe8] sm:$0xff]  ;;  %4444 = vmatpush1.bf16.msra.mxu0 %v4443_v13  ;;  %v148_v23 = vld [vmem:[#allocation10 + $0xe0] sm:$0xff] }
  0x75   :  { %781 = vst [vmem:[#allocation3 + $0x70] sm:$0xff] %v5333_v0  ;;  %782 = vst [vmem:[#allocation3 + $0x78] sm:$0xff] %v5333_v0  ;;  %v4445_v18 = vpack.c.bf16 %v149_v16, %v141_v15  ;;  %v153_v24 = vld [vmem:[#allocation10 + $0x108] sm:$0xff]  ;;  %4414 = vmatprep.subr.bf16.mxu1 %v4413_v17  ;;  %v4447_v26 = vpack.c.bf16 %v148_v23, %v140_v21  ;;  %v152_v30 = vld [vmem:[#allocation10 + $0x100] sm:$0xff] }
  0x76   :  { %v161_v25 = vld [vmem:[#allocation10 + $0x148] sm:$0xff]  ;;  %v160_v32 = vld [vmem:[#allocation10 + $0x140] sm:$0xff]  ;;  %4416 = vmatpush1.bf16.msra.mxu1 %v4415_v22  ;;  %v123_v47 = vld [vmem:[#allocation10 + $0x18] sm:$0xff] }
  0x77   :  { %4446 = vmatprep.subr.bf16.mxu0 %v4445_v18  ;;  %v4417_v27 = vpack.c.bf16 %v161_v25, %v153_v24  ;;  %v157_v28 = vld [vmem:[#allocation10 + $0x128] sm:$0xff]  ;;  %v156_v33 = vld [vmem:[#allocation10 + $0x120] sm:$0xff]  ;;  %v4419_v35 = vpack.c.bf16 %v160_v32, %v152_v30  ;;  %v131_v48 = vld [vmem:[#allocation10 + $0x58] sm:$0xff] }
  0x78   :  { %v165_v29 = vld [vmem:[#allocation10 + $0x168] sm:$0xff]  ;;  %v164_v34 = vld [vmem:[#allocation10 + $0x160] sm:$0xff]  ;;  %4448 = vmatpush1.bf16.msra.mxu0 %v4447_v26  ;;  %v4425_v51 = vpack.c.bf16 %v131_v48, %v123_v47  ;;  %v122_v52 = vld [vmem:[#allocation10 + $0x10] sm:$0xff] }
  0x79   :  { %v4449_v31 = vpack.c.bf16 %v165_v29, %v157_v28  ;;  %v169_v36 = vld [vmem:[#allocation10 + $0x188] sm:$0xff]  ;;  %4418 = vmatprep.subr.bf16.mxu1 %v4417_v27  ;;  %v4451_v39 = vpack.c.bf16 %v164_v34, %v156_v33  ;;  %v168_v42 = vld [vmem:[#allocation10 + $0x180] sm:$0xff]  ;;  %v130_v53 = vld [vmem:[#allocation10 + $0x50] sm:$0xff] }
  0x7a   :  { %v177_v37 = vld [vmem:[#allocation10 + $0x1c8] sm:$0xff]  ;;  %v176_v43 = vld [vmem:[#allocation10 + $0x1c0] sm:$0xff]  ;;  %4420 = vmatpush1.bf16.msra.mxu1 %v4419_v35  ;;  %v139_v54 = vld [vmem:[#allocation10 + $0x98] sm:$0xff]  ;;  %v4427_v57 = vpack.c.bf16 %v130_v53, %v122_v52 }
  0x7b   :  { %v173_v38 = vld [vmem:[#allocation10 + $0x1a8] sm:$0xff]  ;;  %v4421_v40 = vpack.c.bf16 %v177_v37, %v169_v36  ;;  %4450 = vmatprep.subr.bf16.mxu0 %v4449_v31  ;;  %v172_v45 = vld [vmem:[#allocation10 + $0x1a0] sm:$0xff]  ;;  %v4423_v49 = vpack.c.bf16 %v176_v43, %v168_v42  ;;  %v147_v55 = vld [vmem:[#allocation10 + $0xd8] sm:$0xff] }
  0x7c   :  { %v181_v41 = vld [vmem:[#allocation10 + $0x1e8] sm:$0xff]  ;;  %v180_v46 = vld [vmem:[#allocation10 + $0x1e0] sm:$0xff]  ;;  %4452 = vmatpush1.bf16.msra.mxu0 %v4451_v39  ;;  %v138_v58 = vld [vmem:[#allocation10 + $0x90] sm:$0xff]  ;;  %v4429_v61 = vpack.c.bf16 %v147_v55, %v139_v54 }
  0x7d   :  { %v4453_v44 = vpack.c.bf16 %v181_v41, %v173_v38  ;;  %4422 = vmatprep.subr.bf16.mxu1 %v4421_v40  ;;  %v4455_v50 = vpack.c.bf16 %v180_v46, %v172_v45  ;;  %v5509_v56 = vld [vmem:[#allocation4] sm:$0xff]  ;;  %v788_v59 = vld [vmem:[#allocation12 + $0x8] sm:$0xff]  ;;  %v146_v62 = vld [vmem:[#allocation10 + $0xd0] sm:$0xff] }
  0x7e   :  { %4424 = vmatpush1.bf16.msra.mxu1 %v4423_v49  ;;  %v5511_v60 = vld [vmem:[#allocation4 + $0x8] sm:$0xff]  ;;  %v155_v63 = vld [vmem:[#allocation10 + $0x118] sm:$0xff]  ;;  %v787_v4 = vld [vmem:[#allocation12] sm:$0xff]  ;;  %v4431_v10 = vpack.c.bf16 %v146_v62, %v138_v58 }
  0x7f   :  { %4454 = vmatprep.subr.bf16.mxu0 %v4453_v44  ;;  %4426 = vmatprep.subr.bf16.mxu1 %v4425_v51  ;;  %v796_v1 = vld [vmem:[#allocation12 + $0x48] sm:$0xff]  ;;  %v163_v2 = vld [vmem:[#allocation10 + $0x158] sm:$0xff]  ;;  %v795_v5 = vld [vmem:[#allocation12 + $0x40] sm:$0xff] }
  0x80   :  { %4456 = vmatpush1.bf16.msra.mxu0 %v4455_v50  ;;  %v5515_v3 = vpack.c.bf16 %v796_v1, %v788_v59  ;;  %v5519_v6 = vpack.c.bf16 %v795_v5, %v787_v4  ;;  %v804_v7 = vld [vmem:[#allocation12 + $0x88] sm:$0xff]  ;;  %v803_v9 = vld [vmem:[#allocation12 + $0x80] sm:$0xff]  ;;  %v4433_v12 = vpack.c.bf16 %v163_v2, %v155_v63  ;;  %v154_v13 = vld [vmem:[#allocation10 + $0x110] sm:$0xff] }
  0x81   :  { %4208 = vmatmul.mubr.msk.f32.vlgmr.msra.gmra.mrb[0].mxu1 %vm226_vm0, %v5509_v56  ;;  %v812_v8 = vld [vmem:[#allocation12 + $0xc8] sm:$0xff]  ;;  %v811_v11 = vld [vmem:[#allocation12 + $0xc0] sm:$0xff]  ;;  %v162_v14 = vld [vmem:[#allocation10 + $0x150] sm:$0xff] }
  0x82   :  { %4428 = vmatpush1.bf16.msra.mxu1 %v4427_v57  ;;  %321 = vmatprep.mubr.f32.mxu1 %v5333_v0  ;;  %v5524_v15 = vpack.c.bf16 %v812_v8, %v804_v7  ;;  %v171_v16 = vld [vmem:[#allocation10 + $0x198] sm:$0xff]  ;;  %v5529_v18 = vpack.c.bf16 %v811_v11, %v803_v9  ;;  %v5534_v19 = vld [vmem:[#allocation4 + $0x10] sm:$0xff]  ;;  %v4435_v20 = vpack.c.bf16 %v162_v14, %v154_v13  ;;  %v792_v27 = vld [vmem:[#allocation12 + $0x28] sm:$0xff] }
  0x83   :  { %4224 = vmatmul.mubr.msk.f32.vlgmr.msra.gmra.mrb[0].mxu0 %vm226_vm0, %v5509_v56  ;;  %4430 = vmatprep.subr.bf16.mxu1 %v4429_v61  ;;  %v179_v17 = vld [vmem:[#allocation10 + $0x1d8] sm:$0xff]  ;;  %v170_v22 = vld [vmem:[#allocation10 + $0x190] sm:$0xff]  ;;  %v800_v28 = vld [vmem:[#allocation12 + $0x68] sm:$0xff] }
  0x84   :  { %547 = vmatprep.mubr.f32.mxu0 %v5333_v0  ;;  %4474 = vmatprep.subr.bf16.mxu0 %v5515_v3  ;;  %v4437_v21 = vpack.c.bf16 %v179_v17, %v171_v16  ;;  %v178_v23 = vld [vmem:[#allocation10 + $0x1d0] sm:$0xff]  ;;  %v127_v24 = vld [vmem:[#allocation10 + $0x38] sm:$0xff]  ;;  %v5547_v30 = vpack.c.bf16 %v800_v28, %v792_v27  ;;  %v5555_v32 = vld [vmem:[#allocation4 + $0x20] sm:$0xff] }
  0x85   :  { %4209 = vmatmul.mubr.msk.f32.gmra.mrb[2].mxu1 %vm226_vm0, %v5511_v60  ;;  %4476 = vmatpush1.bf16.msra.mxu0 %v5519_v6  ;;  %v135_v25 = vld [vmem:[#allocation10 + $0x78] sm:$0xff]  ;;  %v4439_v29 = vpack.c.bf16 %v178_v23, %v170_v22  ;;  %v5563_v33 = vld [vmem:[#allocation4 + $0x28] sm:$0xff]  ;;  %v5571_v34 = vld [vmem:[#allocation4 + $0x30] sm:$0xff] }
  0x86   :  { %327 = vmatprep.mubr.f32.mxu1 %v5333_v0  ;;  %4432 = vmatpush1.bf16.msra.mxu1 %v4431_v10  ;;  %v5544_v26 = vld [vmem:[#allocation4 + $0x18] sm:$0xff]  ;;  %v4457_v31 = vpack.c.bf16 %v135_v25, %v127_v24  ;;  %v126_v36 = vld [vmem:[#allocation10 + $0x30] sm:$0xff]  ;;  %v791_v40 = vld [vmem:[#allocation12 + $0x20] sm:$0xff] }
  0x87   :  { %4225 = vmatmul.mubr.msk.f32.gmra.mrb[2].mxu0 %vm226_vm0, %v5511_v60  ;;  %4434 = vmatprep.subr.bf16.mxu1 %v4433_v12  ;;  %v5579_v35 = vld [vmem:[#allocation4 + $0x38] sm:$0xff]  ;;  %v134_v37 = vld [vmem:[#allocation10 + $0x70] sm:$0xff]  ;;  %v799_v41 = vld [vmem:[#allocation12 + $0x60] sm:$0xff] }
  0x88   :  { %553 = vmatprep.mubr.f32.mxu0 %v5333_v0  ;;  %4478 = vmatprep.subr.bf16.mxu0 %v5524_v15  ;;  %v143_v38 = vld [vmem:[#allocation10 + $0xb8] sm:$0xff]  ;;  %v4459_v42 = vpack.c.bf16 %v134_v37, %v126_v36  ;;  %v808_v43 = vld [vmem:[#allocation12 + $0xa8] sm:$0xff]  ;;  %v5588_v45 = vld [vmem:[#allocation7] sm:$0xff]  ;;  %v5590_v51 = vpack.c.bf16 %v799_v41, %v791_v40 }
  0x89   :  { %4210 = vmatmul.mubr.msk.f32.gmra.mrb[4].mxu1 %vm226_vm0, %v5534_v19  ;;  %4480 = vmatpush1.bf16.msra.mxu0 %v5529_v18  ;;  %v151_v39 = vld [vmem:[#allocation10 + $0xf8] sm:$0xff]  ;;  %v816_v44 = vld [vmem:[#allocation12 + $0xe8] sm:$0xff]  ;;  %v142_v47 = vld [vmem:[#allocation10 + $0xb0] sm:$0xff] }
  0x8a   :  { %333 = vmatprep.mubr.f32.mxu1 %v5333_v0  ;;  %4436 = vmatpush1.bf16.msra.mxu1 %v4435_v20  ;;  %v4461_v46 = vpack.c.bf16 %v151_v39, %v143_v38  ;;  %v150_v48 = vld [vmem:[#allocation10 + $0xf0] sm:$0xff]  ;;  %v159_v49 = vld [vmem:[#allocation10 + $0x138] sm:$0xff]  ;;  %v5594_v52 = vpack.c.bf16 %v816_v44, %v808_v43  ;;  %v807_v53 = vld [vmem:[#allocation12 + $0xa0] sm:$0xff] }
  0x8b   :  { %4226 = vmatmul.mubr.msk.f32.gmra.mrb[4].mxu0 %vm226_vm0, %v5534_v19  ;;  %4438 = vmatprep.subr.bf16.mxu1 %v4437_v21  ;;  %v167_v50 = vld [vmem:[#allocation10 + $0x178] sm:$0xff]  ;;  %v815_v54 = vld [vmem:[#allocation12 + $0xe0] sm:$0xff]  ;;  %v4463_v55 = vpack.c.bf16 %v150_v48, %v142_v47  ;;  %v158_v58 = vld [vmem:[#allocation10 + $0x130] sm:$0xff] }
  0x8c   :  { %559 = vmatprep.mubr.f32.mxu0 %v5333_v0  ;;  %4490 = vmatprep.subr.bf16.mxu0 %v5547_v30  ;;  %v4465_v57 = vpack.c.bf16 %v167_v50, %v159_v49  ;;  %v166_v59 = vld [vmem:[#allocation10 + $0x170] sm:$0xff]  ;;  %v175_v61 = vld [vmem:[#allocation10 + $0x1b8] sm:$0xff]  ;;  %v5601_v63 = vld [vmem:[#allocation7 + $0x8] sm:$0xff]  ;;  %v5603_v1 = vpack.c.bf16 %v815_v54, %v807_v53 }
  0x8d   :  { %4211 = vmatmul.mubr.msk.f32.gmra.mrb[6].mxu1 %vm226_vm0, %v5544_v26  ;;  %v183_v62 = vld [vmem:[#allocation10 + $0x1f8] sm:$0xff]  ;;  %v4467_v2 = vpack.c.bf16 %v166_v59, %v158_v58  ;;  %v174_v5 = vld [vmem:[#allocation10 + $0x1b0] sm:$0xff]  ;;  %v5713_v37 = vld [vmem:[%s6176_s4] sm:$0xff] }
  0x8e   :  { %339 = vmatprep.mubr.f32.mxu1 %v5333_v0  ;;  %4440 = vmatpush1.bf16.msra.mxu1 %v4439_v29  ;;  %v4469_v4 = vpack.c.bf16 %v183_v62, %v175_v61  ;;  %v182_v7 = vld [vmem:[#allocation10 + $0x1f0] sm:$0xff]  ;;  %v790_v8 = vld [vmem:[#allocation12 + $0x18] sm:$0xff] }
  0x8f   :  { %4227 = vmatmul.mubr.msk.f32.gmra.mrb[6].mxu0 %vm226_vm0, %v5544_v26  ;;  %4458 = vmatprep.subr.bf16.mxu1 %v4457_v31  ;;  %v798_v9 = vld [vmem:[#allocation12 + $0x58] sm:$0xff]  ;;  %v4471_v10 = vpack.c.bf16 %v182_v7, %v174_v5  ;;  %v789_v12 = vld [vmem:[#allocation12 + $0x10] sm:$0xff] }
  0x90   :  { %565 = vmatprep.mubr.f32.mxu0 %v5333_v0  ;;  %v5617_v11 = vpack.c.bf16 %v798_v9, %v790_v8  ;;  %v797_v13 = vld [vmem:[#allocation12 + $0x50] sm:$0xff]  ;;  %v806_v14 = vld [vmem:[#allocation12 + $0x98] sm:$0xff] }
  0x91   :  { %4212 = vmatmul.mubr.msk.f32.gmra.mrb[8].mxu1 %vm226_vm0, %v5555_v32  ;;  %v814_v16 = vld [vmem:[#allocation12 + $0xd8] sm:$0xff]  ;;  %v5645_v17 = vpack.c.bf16 %v797_v13, %v789_v12  ;;  %v805_v21 = vld [vmem:[#allocation12 + $0x90] sm:$0xff] }
  0x92   :  { %345 = vmatprep.mubr.f32.mxu1 %v5333_v0  ;;  %v5647_v20 = vpack.c.bf16 %v814_v16, %v806_v14  ;;  %v813_v22 = vld [vmem:[#allocation12 + $0xd0] sm:$0xff]  ;;  %v794_v23 = vld [vmem:[#allocation12 + $0x38] sm:$0xff] }
  0x93   :  { %4228 = vmatmul.mubr.msk.f32.gmra.mrb[8].mxu0 %vm226_vm0, %v5555_v32  ;;  %v802_v24 = vld [vmem:[#allocation12 + $0x78] sm:$0xff]  ;;  %v5653_v25 = vpack.c.bf16 %v813_v22, %v805_v21  ;;  %v809_v31 = vld [vmem:[#allocation12 + $0xb0] sm:$0xff] }
  0x94   :  { %571 = vmatprep.mubr.f32.mxu0 %v5333_v0  ;;  %v5656_v27 = vpack.c.bf16 %v802_v24, %v794_v23 }
  0x95   :  { %4213 = vmatmul.mubr.msk.f32.gmra.mrb[10].mxu1 %vm226_vm0, %v5563_v33 }
  0x96   :  { %351 = vmatprep.mubr.f32.mxu1 %v5333_v0 }
  0x97   :  { %4229 = vmatmul.mubr.msk.f32.gmra.mrb[10].mxu0 %vm226_vm0, %v5563_v33 }
  0x98   :  { %577 = vmatprep.mubr.f32.mxu0 %v5333_v0 }
  0x99   :  { %4214 = vmatmul.mubr.msk.f32.gmra.mrb[12].mxu1 %vm226_vm0, %v5571_v34 }
  0x9a   :  { %357 = vmatprep.mubr.f32.mxu1 %v5333_v0 }
  0x9b   :  { %4230 = vmatmul.mubr.msk.f32.gmra.mrb[12].mxu0 %vm226_vm0, %v5571_v34 }
  0x9c   :  { %583 = vmatprep.mubr.f32.mxu0 %v5333_v0 }
  0x9d   :  { %4215 = vmatmul.mubr.msk.f32.gmra.mrb[14].mxu1 %vm226_vm0, %v5579_v35 }
  0x9e   :  { %428 = vmatprep.mubr.f32.mxu1 %v5333_v0 }
  0x9f   :  { %4231 = vmatmul.mubr.msk.f32.gmra.mrb[14].mxu0 %vm226_vm0, %v5579_v35 }
  0xa0   :  { %890 = vmatprep.mubr.f32.mxu0 %v5333_v0 }
  0xa1   :  { %4216 = vmatmul.mubr.msk.f32.vlgmr.msra.gmra.mrb[16].mxu1 %vm226_vm0, %v5509_v56 }
  0xa2   :  { %4460 = vmatpush1.bf16.msra.mxu1 %v4459_v42  ;;  %434 = vmatprep.mubr.f32.mxu1 %v5333_v0 }
  0xa3   :  { %4240 = vmatmul.mubr.msk.f32.vlgmr.msra.gmra.mrb[16].mxu0 %vm819_vm1, %v5588_v45  ;;  %4462 = vmatprep.subr.bf16.mxu1 %v4461_v46 }
  0xa4   :  { %4492 = vmatpush1.bf16.msra.mxu0 %v5590_v51  ;;  %896 = vmatprep.mubr.f32.mxu0 %v5333_v0 }
  0xa5   :  { %4217 = vmatmul.mubr.msk.f32.gmra.mrb[18].mxu1 %vm226_vm0, %v5511_v60  ;;  %4494 = vmatprep.subr.bf16.mxu0 %v5594_v52 }
  0xa6   :  { %440 = vmatprep.mubr.f32.mxu1 %v5333_v0  ;;  %4464 = vmatpush1.bf16.msra.mxu1 %v4463_v55 }
  0xa7   :  { %4466 = vmatprep.subr.bf16.mxu1 %v4465_v57  ;;  %4241 = vmatmul.mubr.msk.f32.gmra.mrb[18].mxu0 %vm819_vm1, %v5601_v63 }
  0xa8   :  { %4496 = vmatpush1.bf16.msra.mxu0 %v5603_v1  ;;  %1040 = vmatprep.mubr.f32.mxu0 %v5333_v0 }
  0xa9   :  { %4218 = vmatmul.mubr.msk.f32.gmra.mrb[20].mxu1 %vm226_vm0, %v5534_v19  ;;  %4506 = vmatprep.subr.bf16.mxu0 %v5515_v3 }
  0xaa   :  { %446 = vmatprep.mubr.f32.mxu1 %v5333_v0  ;;  %4468 = vmatpush1.bf16.msra.mxu1 %v4467_v2 }
  0xab   :  { %4470 = vmatprep.subr.bf16.mxu1 %v4469_v4  ;;  %4244 = vmatmul.mubr.msk.f32.vlgmr.msra.gmra.mrb[20].mxu0 %vm819_vm1, %v5588_v45 }
  0xac   :  { %1044 = vmatprep.mubr.f32.mxu0 %v5333_v0  ;;  %4508 = vmatpush1.bf16.msra.mxu0 %v5519_v6 }
  0xad   :  { %4219 = vmatmul.mubr.msk.f32.gmra.mrb[22].mxu1 %vm226_vm0, %v5544_v26  ;;  %4510 = vmatprep.subr.bf16.mxu0 %v5524_v15 }
  0xae   :  { %452 = vmatprep.mubr.f32.mxu1 %v5333_v0  ;;  %4472 = vmatpush1.bf16.msra.mxu1 %v4471_v10 }
  0xaf   :  { %4482 = vmatprep.subr.bf16.mxu1 %v5617_v11  ;;  %4245 = vmatmul.mubr.msk.f32.gmra.mrb[14].mxu0 %vm819_vm1, %v5601_v63 }
  0xb0   :  { %4512 = vmatpush1.bf16.msra.mxu0 %v5529_v18  ;;  %1294 = vmatprep.mubr.f32.mxu0 %v5333_v0 }
  0xb1   :  { %4220 = vmatmul.mubr.msk.f32.gmra.mrb[24].mxu1 %vm226_vm0, %v5555_v32  ;;  %4522 = vmatprep.subr.bf16.mxu0 %v5547_v30 }
  0xb2   :  { %458 = vmatprep.mubr.f32.mxu1 %v5333_v0 }
  0xb5   :  { %4221 = vmatmul.mubr.msk.f32.gmra.mrb[26].mxu1 %vm226_vm0, %v5563_v33 }
  0xb6   :  { %464 = vmatprep.mubr.f32.mxu1 %v5333_v0 }
  0xb9   :  { %4222 = vmatmul.mubr.msk.f32.gmra.mrb[28].mxu1 %vm226_vm0, %v5571_v34 }
  0xba   :  { %470 = vmatprep.mubr.f32.mxu1 %v5333_v0 }
  0xbd   :  { %4223 = vmatmul.mubr.msk.f32.gmra.mrb[30].mxu1 %vm226_vm0, %v5579_v35 }
  0xbe   :  { %654 = vmatprep.mubr.f32.mxu1 %v5333_v0 }
  0xc1   :  { %4232 = vmatmul.mubr.msk.f32.vlgmr.msra.gmra.mrb[32].mxu1 %vm226_vm0, %v5509_v56  ;;  %v793_v56 = vld [vmem:[#allocation12 + $0x30] sm:$0xff] }
  0xc2   :  { %4484 = vmatpush1.bf16.msra.mxu1 %v5645_v17  ;;  %660 = vmatprep.mubr.f32.mxu1 %v5333_v0 }
  0xc3   :  { %4486 = vmatprep.subr.bf16.mxu1 %v5647_v20 }
  0xc5   :  { %4233 = vmatmul.mubr.msk.f32.gmra.mrb[34].mxu1 %vm226_vm0, %v5511_v60  ;;  %v801_v60 = vld [vmem:[#allocation12 + $0x70] sm:$0xff] }
  0xc6   :  { %666 = vmatprep.mubr.f32.mxu1 %v5333_v0  ;;  %4488 = vmatpush1.bf16.msra.mxu1 %v5653_v25  ;;  %v5681_v28 = vpack.c.bf16 %v801_v60, %v793_v56 }
  0xc7   :  { %4498 = vmatprep.subr.bf16.mxu1 %v5656_v27 }
  0xc9   :  { %4234 = vmatmul.mubr.msk.f32.gmra.mrb[36].mxu1 %vm226_vm0, %v5534_v19  ;;  %v810_v19 = vld [vmem:[#allocation12 + $0xb8] sm:$0xff] }
  0xca   :  { %672 = vmatprep.mubr.f32.mxu1 %v5333_v0 }
  0xcd   :  { %4235 = vmatmul.mubr.msk.f32.gmra.mrb[38].mxu1 %vm226_vm0, %v5544_v26  ;;  %v818_v26 = vld [vmem:[#allocation12 + $0xf8] sm:$0xff] }
  0xce   :  { %678 = vmatprep.mubr.f32.mxu1 %v5333_v0  ;;  %v5683_v29 = vpack.c.bf16 %v818_v26, %v810_v19 }
  0xd1   :  { %4236 = vmatmul.mubr.msk.f32.gmra.mrb[40].mxu1 %vm226_vm0, %v5555_v32  ;;  %v817_v32 = vld [vmem:[#allocation12 + $0xf0] sm:$0xff] }
  0xd2   :  { %684 = vmatprep.mubr.f32.mxu1 %v5333_v0 }
  0xd5   :  { %4237 = vmatmul.mubr.msk.f32.gmra.mrb[42].mxu1 %vm226_vm0, %v5563_v33  ;;  %v5689_v33 = vpack.c.bf16 %v817_v32, %v809_v31 }
  0xd6   :  { %690 = vmatprep.mubr.f32.mxu1 %v5333_v0 }
  0xd9   :  { %4238 = vmatmul.mubr.msk.f32.gmra.mrb[44].mxu1 %vm226_vm0, %v5571_v34  ;;  %v186_v34 = vlaneseq }
  0xda   :  { %696 = vmatprep.mubr.f32.mxu1 %v5333_v0 }
  0xdd   :  { %4239 = vmatmul.mubr.msk.f32.gmra.mrb[46].mxu1 %vm226_vm0, %v5579_v35  ;;  %v5707_v35 = vshrl.u32 %v186_v34, 7 }
  0xde   :  { %965 = vmatprep.mubr.f32.mxu1 %v5333_v0 }
  0xdf   :  { %v188_v36 = vsub.s32 0, %v5707_v35  ;;  %v192_v39 = vsub.s32 1, %v5707_v35 }
  0xe1   :  { %4242 = vmatmul.mubr.msk.f32.vlgmr.msra.gmra.mrb[16].mxu1 %vm819_vm1, %v5588_v45  ;;  %v189_v41 = vrot.slane %v5713_v37, %v188_v36  ;;  %v193_v42 = vrot.slane %v5713_v37, %v192_v39 }
  0xe2   :  { %4500 = vmatpush1.bf16.msra.mxu1 %v5681_v28  ;;  %971 = vmatprep.mubr.f32.mxu1 %v5333_v0 }
  0xe3   :  { %4502 = vmatprep.subr.bf16.mxu1 %v5683_v29 }
  0xe5   :  { %4243 = vmatmul.mubr.msk.f32.gmra.mrb[48].mxu1 %vm819_vm1, %v5601_v63 }
  0xe6   :  { %4504 = vmatpush1.bf16.msra.mxu1 %v5689_v33  ;;  %1115 = vmatprep.mubr.f32.mxu1 %v5333_v0 }
  0xe7   :  { %4514 = vmatprep.subr.bf16.mxu1 %v5617_v11 }
  0xe9   :  { %4246 = vmatmul.mubr.msk.f32.vlgmr.msra.gmra.mrb[50].mxu1 %vm819_vm1, %v5588_v45 }
  0xea   :  { %1119 = vmatprep.mubr.f32.mxu1 %v5333_v0  ;;  %4516 = vmatpush1.bf16.msra.mxu1 %v5645_v17 }
  0xeb   :  { %4518 = vmatprep.subr.bf16.mxu1 %v5647_v20 }
  0xed   :  { %4247 = vmatmul.mubr.msk.f32.gmra.mrb[46].mxu1 %vm819_vm1, %v5601_v63 }
  0xee   :  { %4520 = vmatpush1.bf16.msra.mxu1 %v5653_v25  ;;  %1369 = vmatprep.mubr.f32.mxu1 %v5333_v0 }
  0xef   :  { %4530 = vmatprep.subr.bf16.mxu1 %v5656_v27 }
 0x154   :  { %v317_v38 = vpop.f32.mrb[0].mxu1 }
 0x155   :  { %v319_v40 = vpop.f32.mrb[1].mxu1  ;;  %v318_v21 = vadd.f32 %v317_v38, %v189_v41 }
 0x156   :  { %v320_v22 = vadd.f32 %v319_v40, %v193_v42 }
 0x158   :  { %v323_v43 = vpop.f32.mrb[2].mxu1 }
 0x159   :  { %v5718_v44 = vadd.f32 %v323_v43, %v189_v41  ;;  %v325_v45 = vpop.f32.mrb[3].mxu1  ;;  %v208_v43 = vsub.s32 5, %v5707_v35 }
 0x15a   :  { %v5720_v46 = vadd.f32 %v325_v45, %v193_v42 }
 0x15b   :  { %v5749_v38 = vrot.slane %v5713_v37, %v208_v43 }
 0x15c   :  { %v329_v47 = vpop.f32.mrb[4].mxu1 }
 0x15d   :  { %v5722_v48 = vadd.f32 %v329_v47, %v189_v41  ;;  %v331_v49 = vpop.f32.mrb[5].mxu1  ;;  %v204_v47 = vsub.s32 4, %v5707_v35 }
 0x15e   :  { %v5724_v50 = vadd.f32 %v331_v49, %v193_v42 }
 0x15f   :  { %v5752_v40 = vrot.slane %v5713_v37, %v204_v47 }
 0x160   :  { %v335_v53 = vpop.f32.mrb[6].mxu1 }
 0x161   :  { %v5726_v54 = vadd.f32 %v335_v53, %v189_v41  ;;  %v337_v55 = vpop.f32.mrb[7].mxu1  ;;  %v196_v53 = vsub.s32 2, %v5707_v35 }
 0x162   :  { %v5728_v57 = vadd.f32 %v337_v55, %v193_v42 }
 0x164   :  { %v341_v58 = vpop.f32.mrb[8].mxu1 }
 0x165   :  { %v5730_v59 = vadd.f32 %v341_v58, %v189_v41  ;;  %v343_v61 = vpop.f32.mrb[9].mxu1  ;;  %v200_v58 = vsub.s32 3, %v5707_v35 }
 0x166   :  { %v5732_v62 = vadd.f32 %v343_v61, %v193_v42 }
 0x168   :  { %v347_v63 = vpop.f32.mrb[10].mxu1 }
 0x169   :  { %v5734_v2 = vadd.f32 %v347_v63, %v189_v41  ;;  %v349_v4 = vpop.f32.mrb[11].mxu1 }
 0x16a   :  { %v5736_v5 = vadd.f32 %v349_v4, %v193_v42  ;;  %v5759_v4 = vrot.slane %v5713_v37, %v196_v53 }
 0x16c   :  { %v353_v7 = vpop.f32.mrb[12].mxu1 }
 0x16d   :  { %v5738_v8 = vadd.f32 %v353_v7, %v189_v41  ;;  %v355_v9 = vpop.f32.mrb[13].mxu1 }
 0x16e   :  { %v5740_v10 = vadd.f32 %v355_v9, %v193_v42  ;;  %v5762_v9 = vrot.slane %v5713_v37, %v200_v58 }
 0x170   :  { %v359_v12 = vpop.f32.mrb[14].mxu1 }
 0x171   :  { %v5742_v13 = vadd.f32 %v359_v12, %v189_v41  ;;  %v361_v14 = vpop.f32.mrb[15].mxu1 }
 0x172   :  { %v5744_v16 = vadd.f32 %v361_v14, %v193_v42 }
 0x176   :  { %v892_v23 = vpop.f32.mrb[16].mxu0 }
 0x177   :  { %v1130_v24 = vadd.f32 %v892_v23, %v318_v21  ;;  %v894_v56 = vpop.f32.mrb[17].mxu0 }
 0x178   :  { %v1131_v60 = vadd.f32 %v894_v56, %v320_v22 }
 0x179   :  { %v4248_v45 = vmul.f32 -1.442695, %v1130_v24 }
 0x17a   :  { %v898_v19 = vpop.f32.mrb[18].mxu0  ;;  %v4250_v39 = vmul.f32 -1.442695, %v1131_v60 }
 0x17b   :  { %v899_v26 = vpop.f32.mrb[19].mxu0  ;;  %v212_v19 = vsub.s32 6, %v5707_v35 }
 0x17c   :  { %4901 = vpow2.f32 %v4250_v39  ;;  %v216_v26 = vsub.s32 7, %v5707_v35 }
 0x17d   :  { %4903 = vpow2.f32 %v4248_v45  ;;  %v5769_v39 = vrot.slane %v5713_v37, %v212_v19 }
 0x17e   :  { %v1042_v31 = vpop.f32.mrb[20].mxu0  ;;  %v5772_v45 = vrot.slane %v5713_v37, %v216_v26 }
 0x17f   :  { %v1043_v32 = vpop.f32.mrb[21].mxu0 }
 0x182   :  { %v1046_v34 = vpop.f32.mrb[14].mxu0 }
 0x183   :  { %v1048_v36 = vpop.f32.mrb[15].mxu0  ;;  %v4823_v42 = vadd.f32 %v1046_v34, %v5752_v40 }
 0x184   :  { %v4824_v41 = vadd.f32 %v1048_v36, %v5749_v38 }
 0x185   :  { %v4249_v55 = vmul.f32 -1.442695, %v4823_v42  ;;  %v785_v42 = vld [vmem:[#allocation9] sm:$0xff] }
 0x186   :  { %v4251_v49 = vmul.f32 -1.442695, %v4824_v41  ;;  %v4902_v61 = vpop.eup %4901 }
 0x187   :  { %v4904_v63 = vpop.eup %4903  ;;  %v1160_v7 = vadd.f32 1.0, %v4902_v61 }
 0x188   :  { %4905 = vpow2.f32 %v4251_v49  ;;  %v1148_v12 = vadd.f32 1.0, %v4904_v63 }
 0x189   :  { %4907 = vpow2.f32 %v4249_v55 }
 0x18a   :  { %4909 = vrcp.f32 %v1160_v7 }
 0x18b   :  { %4911 = vrcp.f32 %v1148_v12 }
 0x192   :  { %v4906_v31 = vpop.eup %4905 }
 0x193   :  { %v4908_v32 = vpop.eup %4907  ;;  %v1161_v43 = vadd.f32 1.0, %v4906_v31 }
 0x194   :  { %v1149_v47 = vadd.f32 1.0, %v4908_v32  ;;  %v4910_v41 = vpop.eup %4909 }
 0x195   :  { %v4912_v53 = vpop.eup %4911  ;;  %v1180_v7 = vmul.f32 %v4910_v41, %v785_v42 }
 0x1b4   :  { %v967_v14 = vpop.f32.mrb[16].mxu1 }
 0x1b5   :  { %v4793_v21 = vadd.f32 %v967_v14, %v5759_v4  ;;  %v969_v22 = vpop.f32.mrb[17].mxu1 }
 0x1b6   :  { %v4794_v23 = vadd.f32 %v969_v22, %v5762_v9 }
 0x1b7   :  { %v4252_v24 = vmul.f32 -1.442695, %v4793_v21 }
 0x1b8   :  { %4913 = vtanh.f32 %v4794_v23  ;;  %v973_v56 = vpop.f32.mrb[48].mxu1  ;;  %v786_v23 = vld [vmem:[#allocation9 + $0x8] sm:$0xff] }
 0x1b9   :  { %4915 = vpow2.f32 %v4252_v24  ;;  %v974_v60 = vpop.f32.mrb[49].mxu1 }
 0x1ba   :  { %4917 = vrcp.f32 %v1161_v43 }
 0x1bb   :  { %4919 = vrcp.f32 %v1149_v47 }
 0x1bc   :  { %v1117_v34 = vpop.f32.mrb[50].mxu1 }
 0x1bd   :  { %v1118_v36 = vpop.f32.mrb[51].mxu1 }
 0x1c0   :  { %v1121_v49 = vpop.f32.mrb[46].mxu1 }
 0x1c1   :  { %v4839_v55 = vadd.f32 %v1121_v49, %v5769_v39  ;;  %v1123_v58 = vpop.f32.mrb[47].mxu1 }
 0x1c2   :  { %v4914_v35 = vpop.eup %4913  ;;  %v4840_v61 = vadd.f32 %v1123_v58, %v5772_v45 }
 0x1c3   :  { %v4916_v63 = vpop.eup %4915  ;;  %v1182_v12 = vmul.f32 %v4914_v35, %v4912_v53  ;;  %v4253_v14 = vmul.f32 -1.442695, %v4839_v55 }
 0x1c4   :  { %v1172_v21 = vadd.f32 1.0, %v4916_v63  ;;  %4921 = vtanh.f32 %v4840_v61  ;;  %v4918_v22 = vpop.eup %4917 }
 0x1c5   :  { %v5776_v37 = vadd.f32 %v1182_v12, %v1180_v7  ;;  %4923 = vpow2.f32 %v4253_v14  ;;  %v4920_v24 = vpop.eup %4919  ;;  %v1181_v19 = vmul.f32 %v4918_v22, %v786_v23 }
 0x1c6   :  { %4925 = vrcp.f32 %v1172_v21 }
 0x1c7   :  { %4927 = vtanh.f32 %v5776_v37 }
 0x1ce   :  { %v4922_v56 = vpop.eup %4921 }
 0x1cf   :  { %v4924_v60 = vpop.eup %4923  ;;  %v1183_v26 = vmul.f32 %v4922_v56, %v4920_v24 }
 0x1d0   :  { %v4926_v31 = vpop.eup %4925  ;;  %v1173_v32 = vadd.f32 1.0, %v4924_v60 }
 0x1d1   :  { %v4928_v34 = vpop.eup %4927  ;;  %v5779_v36 = vadd.f32 %v1183_v26, %v1181_v19 }
 0x1d2   :  { %4929 = vrcp.f32 %v1173_v32  ;;  %v1188_v43 = vmul.f32 %v4928_v34, %v4926_v31 }
 0x1d3   :  { %4931 = vtanh.f32 %v5779_v36 }
 0x1d4   :  { %1190 = vst.msk [vmem:[#allocation3] sm:$0xff] %vm819_vm1, %v1188_v43  ;;  %4254 = vmatmul.mubr.msk.f32.vlgmr.msra.gmra.mrb[22].mxu0 %vm819_vm1, %v1188_v43  ;;  %4256 = vmatmul.mubr.msk.f32.vlgmr.msra.gmra.mrb[18].mxu1 %vm819_vm1, %v1188_v43 }
 0x1d5   :  { %4524 = vmatpush1.bf16.msra.mxu0 %v5590_v51  ;;  %4532 = vmatpush1.bf16.msra.mxu1 %v5681_v28 }
 0x1d6   :  { %1300 = vmatprep.mubr.f32.mxu0 %v5333_v0  ;;  %1375 = vmatprep.mubr.f32.mxu1 %v5333_v0 }
 0x1d7   :  { %4526 = vmatprep.subr.bf16.mxu0 %v5594_v52  ;;  %4534 = vmatprep.subr.bf16.mxu1 %v5683_v29 }
 0x1d9   :  { %4528 = vmatpush1.bf16.msra.mxu0 %v5603_v1  ;;  %4536 = vmatpush1.bf16.msra.mxu1 %v5689_v33 }
 0x1da   :  { %4538 = vmatprep.subr.bf16.mxu0 %v5515_v3  ;;  %4546 = vmatprep.subr.bf16.mxu1 %v5617_v11 }
 0x1dc   :  { %v4930_v47 = vpop.eup %4929 }
 0x1dd   :  { %v4932_v41 = vpop.eup %4931 }
 0x1de   :  { %v1189_v42 = vmul.f32 %v4932_v41, %v4930_v47 }
 0x1e0   :  { %1191 = vst.msk [vmem:[#allocation3 + $0x78] sm:$0xff] %vm819_vm1, %v1189_v42  ;;  %4255 = vmatmul.mubr.msk.f32.gmra.mrb[24].mxu0 %vm819_vm1, %v1189_v42  ;;  %4257 = vmatmul.mubr.msk.f32.gmra.mrb[52].mxu1 %vm819_vm1, %v1189_v42 }
 0x1e1   :  { %1444 = vmatprep.mubr.f32.mxu0 %v5333_v0  ;;  %1519 = vmatprep.mubr.f32.mxu1 %v5333_v0 }
 0x1e4   :  { %4258 = vmatmul.mubr.msk.f32.vlgmr.msra.gmra.mrb[26].mxu0 %vm819_vm1, %v1188_v43  ;;  %4260 = vmatmul.mubr.msk.f32.vlgmr.msra.gmra.mrb[54].mxu1 %vm819_vm1, %v1188_v43 }
 0x1e5   :  { %1448 = vmatprep.mubr.f32.mxu0 %v5333_v0  ;;  %1523 = vmatprep.mubr.f32.mxu1 %v5333_v0 }
 0x1e6   :  { %4540 = vmatpush1.bf16.msra.mxu0 %v5519_v6  ;;  %4548 = vmatpush1.bf16.msra.mxu1 %v5645_v17 }
 0x1e7   :  { %4542 = vmatprep.subr.bf16.mxu0 %v5524_v15  ;;  %4550 = vmatprep.subr.bf16.mxu1 %v5647_v20 }
 0x1e8   :  { %4259 = vmatmul.mubr.msk.f32.gmra.mrb[12].mxu0 %vm819_vm1, %v1189_v42  ;;  %4261 = vmatmul.mubr.msk.f32.gmra.mrb[44].mxu1 %vm819_vm1, %v1189_v42 }
 0x1e9   :  { %1698 = vmatprep.mubr.f32.mxu0 %v5333_v0  ;;  %1773 = vmatprep.mubr.f32.mxu1 %v5333_v0 }
 0x1ea   :  { %4544 = vmatpush1.bf16.msra.mxu0 %v5529_v18  ;;  %4552 = vmatpush1.bf16.msra.mxu1 %v5653_v25 }
 0x1eb   :  { %4554 = vmatprep.subr.bf16.mxu0 %v5547_v30  ;;  %4562 = vmatprep.subr.bf16.mxu1 %v5656_v27 }
 0x2a7   :  { %v1296_v3 = vpop.f32.mrb[22].mxu0  ;;  %v1371_v6 = vpop.f32.mrb[18].mxu1 }
 0x2a8   :  { %v1534_v15 = vadd.f32 %v1296_v3, %v5718_v44  ;;  %v1298_v49 = vpop.f32.mrb[23].mxu0  ;;  %v1373_v53 = vpop.f32.mrb[19].mxu1  ;;  %v4795_v0 = vadd.f32 %v1371_v6, %v5759_v4 }
 0x2a9   :  { %v1535_v55 = vadd.f32 %v1298_v49, %v5720_v46  ;;  %v4796_v18 = vadd.f32 %v1373_v53, %v5762_v9 }
 0x2aa   :  { %v4262_v58 = vmul.f32 -1.442695, %v1534_v15  ;;  %v4266_v7 = vmul.f32 -1.442695, %v4795_v0 }
 0x2ab   :  { %v4264_v35 = vmul.f32 -1.442695, %v1535_v55 }
 0x2ac   :  { %4933 = vpow2.f32 %v4262_v58 }
 0x2ad   :  { %4935 = vpow2.f32 %v4264_v35 }
 0x2ae   :  { %4937 = vtanh.f32 %v4796_v18 }
 0x2af   :  { %4939 = vpow2.f32 %v4266_v7 }
 0x2b3   :  { %v1302_v61 = vpop.f32.mrb[24].mxu0  ;;  %v1377_v63 = vpop.f32.mrb[52].mxu1 }
 0x2b4   :  { %v1303_v12 = vpop.f32.mrb[25].mxu0  ;;  %v1378_v14 = vpop.f32.mrb[53].mxu1 }
 0x2b6   :  { %v4934_v21 = vpop.eup %4933 }
 0x2b7   :  { %v1552_v22 = vadd.f32 1.0, %v4934_v21  ;;  %v1446_v44 = vpop.f32.mrb[26].mxu0  ;;  %v1521_v23 = vpop.f32.mrb[54].mxu1 }
 0x2b8   :  { %v4936_v24 = vpop.eup %4935  ;;  %v1447_v46 = vpop.f32.mrb[27].mxu0 }
 0x2b9   :  { %v1522_v56 = vpop.f32.mrb[55].mxu1  ;;  %4941 = vrcp.f32 %v1552_v22  ;;  %v1564_v60 = vadd.f32 1.0, %v4936_v24  ;;  %v4938_v42 = vpop.eup %4937 }
 0x2ba   :  { %v4940_v3 = vpop.eup %4939 }
 0x2bb   :  { %4943 = vrcp.f32 %v1564_v60  ;;  %v1450_v19 = vpop.f32.mrb[12].mxu0  ;;  %v1525_v26 = vpop.f32.mrb[44].mxu1  ;;  %v1576_v55 = vadd.f32 1.0, %v4940_v3  ;;  %v5833_v60 = vld [vmem:[#allocation3 + $0x8] sm:$0xff]  ;;  %v2016_v3 = vld [vmem:[#allocation12 + $0x80] sm:$0xff] }
 0x2bc   :  { %v4821_v31 = vadd.f32 %v1450_v19, %v5752_v40  ;;  %v1452_v32 = vpop.f32.mrb[13].mxu0  ;;  %v1527_v34 = vpop.f32.mrb[45].mxu1  ;;  %v4837_v49 = vadd.f32 %v1525_v26, %v5769_v39 }
 0x2bd   :  { %v4822_v43 = vadd.f32 %v1452_v32, %v5749_v38  ;;  %v4838_v35 = vadd.f32 %v1527_v34, %v5772_v45 }
 0x2be   :  { %v4263_v47 = vmul.f32 -1.442695, %v4821_v31  ;;  %v4267_v18 = vmul.f32 -1.442695, %v4837_v49 }
 0x2bf   :  { %v4265_v41 = vmul.f32 -1.442695, %v4822_v43  ;;  %v2000_v43 = vld [vmem:[#allocation12] sm:$0xff] }
 0x2c0   :  { %4945 = vpow2.f32 %v4263_v47 }
 0x2c1   :  { %4947 = vpow2.f32 %v4265_v41  ;;  %v2025_v41 = vld [vmem:[#allocation12 + $0xc8] sm:$0xff] }
 0x2c2   :  { %4949 = vrcp.f32 %v1576_v55 }
 0x2c3   :  { %v4942_v6 = vpop.eup %4941 }
 0x2c4   :  { %v1586_v15 = vmul.f32 %v4942_v6, %v4938_v42 }
 0x2c5   :  { %v4944_v53 = vpop.eup %4943 }
 0x2c6   :  { %v1584_v58 = vmul.f32 %v4944_v53, %v5776_v37 }
 0x2c8   :  { %v5825_v0 = vadd.f32 %v1586_v15, %v1584_v58 }
 0x2ca   :  { %v4946_v61 = vpop.eup %4945  ;;  %4951 = vtanh.f32 %v5825_v0 }
 0x2cb   :  { %v1553_v63 = vadd.f32 1.0, %v4946_v61  ;;  %4953 = vtanh.f32 %v4838_v35  ;;  %v4948_v7 = vpop.eup %4947 }
 0x2cc   :  { %4955 = vpow2.f32 %v4267_v18  ;;  %v1565_v12 = vadd.f32 1.0, %v4948_v7  ;;  %v4950_v14 = vpop.eup %4949 }
 0x2cd   :  { %4957 = vrcp.f32 %v1553_v63 }
 0x2ce   :  { %4959 = vrcp.f32 %v1565_v12 }
 0x2d4   :  { %v4952_v21 = vpop.eup %4951 }
 0x2d5   :  { %v4954_v22 = vpop.eup %4953  ;;  %v1592_v37 = vmul.f32 %v4952_v21, %v4950_v14 }
 0x2d6   :  { %v4956_v44 = vpop.eup %4955 }
 0x2d7   :  { %v4958_v23 = vpop.eup %4957  ;;  %1594 = vst.msk [vmem:[#allocation3 + $0x10] sm:$0xff] %vm819_vm1, %v1592_v37  ;;  %4268 = vmatmul.mubr.msk.f32.vlgmr.msra.gmra.mrb[28].mxu0 %vm819_vm1, %v1592_v37  ;;  %4270 = vmatmul.mubr.msk.f32.vlgmr.msra.gmra.mrb[20].mxu1 %vm819_vm1, %v1592_v37  ;;  %v1577_v56 = vadd.f32 1.0, %v4956_v44 }
 0x2d8   :  { %v1587_v24 = vmul.f32 %v4958_v23, %v4954_v22  ;;  %4556 = vmatpush1.bf16.msra.mxu0 %v5590_v51  ;;  %4564 = vmatpush1.bf16.msra.mxu1 %v5681_v28  ;;  %v4960_v46 = vpop.eup %4959 }
 0x2d9   :  { %1704 = vmatprep.mubr.f32.mxu0 %v5833_v60  ;;  %1779 = vmatprep.mubr.f32.mxu1 %v5833_v60  ;;  %v1585_v19 = vmul.f32 %v4960_v46, %v5779_v36  ;;  %4961 = vrcp.f32 %v1577_v56 }
 0x2da   :  { %4558 = vmatprep.subr.bf16.mxu0 %v5594_v52  ;;  %4566 = vmatprep.subr.bf16.mxu1 %v5683_v29 }
 0x2db   :  { %v5840_v26 = vadd.f32 %v1587_v24, %v1585_v19 }
 0x2dc   :  { %4560 = vmatpush1.bf16.msra.mxu0 %v5603_v1  ;;  %4568 = vmatpush1.bf16.msra.mxu1 %v5689_v33  ;;  %v2001_v1 = vld [vmem:[#allocation12 + $0x8] sm:$0xff] }
 0x2dd   :  { %4578 = vmatprep.subr.bf16.mxu1 %v5617_v11  ;;  %4963 = vtanh.f32 %v5840_v26  ;;  %v2009_v11 = vld [vmem:[#allocation12 + $0x48] sm:$0xff] }
 0x2de   :  { %v5863_v36 = vpack.c.bf16 %v2009_v11, %v2001_v1 }
 0x2e0   :  { %4570 = vmatprep.subr.bf16.mxu0 %v5863_v36 }
 0x2e3   :  { %v4962_v31 = vpop.eup %4961 }
 0x2e7   :  { %v4964_v32 = vpop.eup %4963 }
 0x2e8   :  { %v1593_v34 = vmul.f32 %v4964_v32, %v4962_v31 }
 0x2ea   :  { %1595 = vst.msk [vmem:[#allocation3 + $0x68] sm:$0xff] %vm819_vm1, %v1593_v34  ;;  %4269 = vmatmul.mubr.msk.f32.gmra.mrb[30].mxu0 %vm819_vm1, %v1593_v34  ;;  %4271 = vmatmul.mubr.msk.f32.gmra.mrb[56].mxu1 %vm819_vm1, %v1593_v34 }
 0x2eb   :  { %1848 = vmatprep.mubr.f32.mxu0 %v5833_v60  ;;  %1923 = vmatprep.mubr.f32.mxu1 %v5833_v60 }
 0x2ee   :  { %4272 = vmatmul.mubr.msk.f32.vlgmr.msra.gmra.mrb[32].mxu0 %vm819_vm1, %v1592_v37  ;;  %4274 = vmatmul.mubr.msk.f32.vlgmr.msra.gmra.mrb[58].mxu1 %vm819_vm1, %v1592_v37 }
 0x2ef   :  { %1852 = vmatprep.mubr.f32.mxu0 %v5833_v60  ;;  %1927 = vmatprep.mubr.f32.mxu1 %v5833_v60 }
 0x2f0   :  { %4580 = vmatpush1.bf16.msra.mxu1 %v5645_v17  ;;  %v2008_v17 = vld [vmem:[#allocation12 + $0x40] sm:$0xff] }
 0x2f1   :  { %4582 = vmatprep.subr.bf16.mxu1 %v5647_v20  ;;  %v5865_v47 = vpack.c.bf16 %v2008_v17, %v2000_v43  ;;  %v2017_v20 = vld [vmem:[#allocation12 + $0x88] sm:$0xff] }
 0x2f2   :  { %4273 = vmatmul.mubr.msk.f32.gmra.mrb[10].mxu0 %vm819_vm1, %v1593_v34  ;;  %4275 = vmatmul.mubr.msk.f32.gmra.mrb[42].mxu1 %vm819_vm1, %v1593_v34  ;;  %v5869_v42 = vpack.c.bf16 %v2025_v41, %v2017_v20 }
 0x2f3   :  { %2102 = vmatprep.mubr.f32.mxu0 %v5833_v60  ;;  %2177 = vmatprep.mubr.f32.mxu1 %v5833_v60 }
 0x2f4   :  { %4584 = vmatpush1.bf16.msra.mxu1 %v5653_v25  ;;  %4572 = vmatpush1.bf16.msra.mxu0 %v5865_v47  ;;  %v2024_v25 = vld [vmem:[#allocation12 + $0xc0] sm:$0xff] }
 0x2f5   :  { %4594 = vmatprep.subr.bf16.mxu1 %v5656_v27  ;;  %v5871_v6 = vpack.c.bf16 %v2024_v25, %v2016_v3  ;;  %4574 = vmatprep.subr.bf16.mxu0 %v5869_v42 }
 0x2f8   :  { %4576 = vmatpush1.bf16.msra.mxu0 %v5871_v6 }
 0x2f9   :  { %4586 = vmatprep.subr.bf16.mxu0 %v5547_v30 }
 0x3aa   :  { %v1700_v27 = vpop.f32.mrb[28].mxu0  ;;  %v1775_v15 = vpop.f32.mrb[20].mxu1 }
 0x3ab   :  { %v1938_v49 = vadd.f32 %v1700_v27, %v5722_v48  ;;  %v1702_v53 = vpop.f32.mrb[29].mxu0  ;;  %v1777_v55 = vpop.f32.mrb[21].mxu1  ;;  %v4797_v61 = vadd.f32 %v1775_v15, %v5759_v4 }
 0x3ac   :  { %v1939_v58 = vadd.f32 %v1702_v53, %v5724_v50  ;;  %v4798_v63 = vadd.f32 %v1777_v55, %v5762_v9 }
 0x3ad   :  { %v4276_v35 = vmul.f32 -1.442695, %v1938_v49  ;;  %v4280_v7 = vmul.f32 -1.442695, %v4797_v61 }
 0x3ae   :  { %v4278_v18 = vmul.f32 -1.442695, %v1939_v58 }
 0x3af   :  { %4965 = vpow2.f32 %v4276_v35 }
 0x3b0   :  { %4967 = vpow2.f32 %v4278_v18 }
 0x3b1   :  { %4969 = vtanh.f32 %v4798_v63 }
 0x3b2   :  { %4971 = vpow2.f32 %v4280_v7 }
 0x3b9   :  { %v4966_v12 = vpop.eup %4965 }
 0x3ba   :  { %v1956_v14 = vadd.f32 1.0, %v4966_v12  ;;  %v4968_v30 = vpop.eup %4967  ;;  %v2020_v12 = vld [vmem:[#allocation12 + $0xa0] sm:$0xff] }
 0x3bb   :  { %v1968_v48 = vadd.f32 1.0, %v4968_v30  ;;  %v4970_v56 = vpop.eup %4969 }
 0x3bc   :  { %4973 = vrcp.f32 %v1956_v14  ;;  %v4972_v19 = vpop.eup %4971  ;;  %v2028_v14 = vld [vmem:[#allocation12 + $0xe0] sm:$0xff] }
 0x3bd   :  { %4975 = vrcp.f32 %v1968_v48  ;;  %v1706_v21 = vpop.f32.mrb[30].mxu0  ;;  %v1781_v22 = vpop.f32.mrb[56].mxu1  ;;  %v1980_v41 = vadd.f32 1.0, %v4972_v19  ;;  %v5893_v48 = vpack.c.bf16 %v2028_v14, %v2020_v12  ;;  %v2414_v19 = vld [vmem:[#allocation12 + $0x50] sm:$0xff] }
 0x3be   :  { %v1707_v50 = vpop.f32.mrb[31].mxu0  ;;  %v1782_v37 = vpop.f32.mrb[57].mxu1 }
 0x3c1   :  { %v1850_v44 = vpop.f32.mrb[32].mxu0  ;;  %v1925_v23 = vpop.f32.mrb[58].mxu1 }
 0x3c2   :  { %v1851_v24 = vpop.f32.mrb[33].mxu0  ;;  %v1926_v46 = vpop.f32.mrb[59].mxu1 }
 0x3c5   :  { %v1854_v32 = vpop.f32.mrb[10].mxu0  ;;  %v1929_v34 = vpop.f32.mrb[42].mxu1 }
 0x3c6   :  { %v4974_v31 = vpop.eup %4973  ;;  %v4819_v11 = vadd.f32 %v1854_v32, %v5752_v40  ;;  %v1856_v43 = vpop.f32.mrb[11].mxu0  ;;  %v4835_v53 = vadd.f32 %v1929_v34, %v5769_v39  ;;  %v2423_v32 = vld [vmem:[#allocation12 + $0x98] sm:$0xff] }
 0x3c7   :  { %v1990_v1 = vmul.f32 %v4974_v31, %v4970_v56  ;;  %v1931_v17 = vpop.f32.mrb[43].mxu1  ;;  %v4976_v20 = vpop.eup %4975  ;;  %v4820_v3 = vadd.f32 %v1856_v43, %v5749_v38  ;;  %v2406_v56 = vld [vmem:[#allocation12 + $0x10] sm:$0xff]  ;;  %v2431_v34 = vld [vmem:[#allocation12 + $0xd8] sm:$0xff] }
 0x3c8   :  { %v1988_v25 = vmul.f32 %v4976_v20, %v5825_v0  ;;  %v4277_v27 = vmul.f32 -1.442695, %v4819_v11  ;;  %v4836_v55 = vadd.f32 %v1931_v17, %v5772_v45  ;;  %v4281_v58 = vmul.f32 -1.442695, %v4835_v53  ;;  %v2422_v11 = vld [vmem:[#allocation12 + $0x90] sm:$0xff]  ;;  %v2409_v20 = vld [vmem:[#allocation12 + $0x28] sm:$0xff] }
 0x3c9   :  { %v4279_v15 = vmul.f32 -1.442695, %v4820_v3  ;;  %v5924_v31 = vpack.c.bf16 %v2414_v19, %v2406_v56  ;;  %v2430_v43 = vld [vmem:[#allocation12 + $0xd0] sm:$0xff]  ;;  %v2411_v3 = vld [vmem:[#allocation12 + $0x38] sm:$0xff] }
 0x3ca   :  { %v5883_v49 = vadd.f32 %v1990_v1, %v1988_v25  ;;  %4977 = vpow2.f32 %v4277_v27  ;;  %v5928_v1 = vpack.c.bf16 %v2431_v34, %v2423_v32  ;;  %v5930_v17 = vpack.c.bf16 %v2430_v43, %v2422_v11  ;;  %v2419_v27 = vld [vmem:[#allocation12 + $0x78] sm:$0xff] }
 0x3cb   :  { %4979 = vrcp.f32 %v1980_v41  ;;  %v2417_v41 = vld [vmem:[#allocation12 + $0x68] sm:$0xff] }
 0x3cc   :  { %4981 = vtanh.f32 %v5883_v49  ;;  %v5934_v25 = vpack.c.bf16 %v2417_v41, %v2409_v20 }
 0x3cd   :  { %4983 = vpow2.f32 %v4279_v15  ;;  %v5936_v15 = vpack.c.bf16 %v2419_v27, %v2411_v3 }
 0x3ce   :  { %4985 = vtanh.f32 %v4836_v55 }
 0x3cf   :  { %4987 = vpow2.f32 %v4281_v58 }
 0x3d4   :  { %v4978_v35 = vpop.eup %4977 }
 0x3d5   :  { %v4980_v18 = vpop.eup %4979  ;;  %v1957_v61 = vadd.f32 1.0, %v4978_v35 }
 0x3d6   :  { %v4982_v63 = vpop.eup %4981 }
 0x3d7   :  { %v4984_v0 = vpop.eup %4983  ;;  %4989 = vrcp.f32 %v1957_v61  ;;  %v1996_v7 = vmul.f32 %v4982_v63, %v4980_v18 }
 0x3d8   :  { %v1969_v30 = vadd.f32 1.0, %v4984_v0  ;;  %v4986_v21 = vpop.eup %4985 }
 0x3d9   :  { %1998 = vst.msk [vmem:[#allocation3 + $0x20] sm:$0xff] %vm819_vm1, %v1996_v7  ;;  %4282 = vmatmul.mubr.msk.f32.vlgmr.msra.gmra.mrb[34].mxu0 %vm819_vm1, %v1996_v7  ;;  %4284 = vmatmul.mubr.msk.f32.vlgmr.msra.gmra.mrb[22].mxu1 %vm819_vm1, %v1996_v7 }
 0x3da   :  { %4991 = vrcp.f32 %v1969_v30  ;;  %4588 = vmatpush1.bf16.msra.mxu0 %v5590_v51  ;;  %4596 = vmatpush1.bf16.msra.mxu1 %v5681_v28  ;;  %v4988_v51 = vpop.eup %4987 }
 0x3db   :  { %2108 = vmatprep.mubr.f32.mxu0 %v5833_v60  ;;  %2183 = vmatprep.mubr.f32.mxu1 %v5833_v60  ;;  %v1981_v37 = vadd.f32 1.0, %v4988_v51 }
 0x3dc   :  { %4590 = vmatprep.subr.bf16.mxu0 %v5594_v52  ;;  %4598 = vmatprep.subr.bf16.mxu1 %v5683_v29 }
 0x3dd   :  { %4993 = vrcp.f32 %v1981_v37 }
 0x3de   :  { %4592 = vmatpush1.bf16.msra.mxu0 %v5893_v48  ;;  %4600 = vmatpush1.bf16.msra.mxu1 %v5689_v33  ;;  %v2407_v33 = vld [vmem:[#allocation12 + $0x18] sm:$0xff] }
 0x3df   :  { %4602 = vmatprep.subr.bf16.mxu0 %v5863_v36 }
 0x3e1   :  { %v4990_v22 = vpop.eup %4989 }
 0x3e2   :  { %v1991_v28 = vmul.f32 %v4990_v22, %v4986_v21 }
 0x3e4   :  { %v4992_v50 = vpop.eup %4991 }
 0x3e5   :  { %v1989_v44 = vmul.f32 %v4992_v50, %v5840_v26  ;;  %v2415_v26 = vld [vmem:[#allocation12 + $0x58] sm:$0xff] }
 0x3e6   :  { %v5922_v46 = vpack.c.bf16 %v2415_v26, %v2407_v33 }
 0x3e7   :  { %v5903_v23 = vadd.f32 %v1991_v28, %v1989_v44  ;;  %v4994_v52 = vpop.eup %4993 }
 0x3e8   :  { %4610 = vmatprep.subr.bf16.mxu1 %v5922_v46 }
 0x3e9   :  { %4995 = vtanh.f32 %v5903_v23 }
 0x3f3   :  { %v4996_v29 = vpop.eup %4995 }
 0x3f4   :  { %v1997_v24 = vmul.f32 %v4996_v29, %v4994_v52 }
 0x3f6   :  { %1999 = vst.msk [vmem:[#allocation3 + $0x58] sm:$0xff] %vm819_vm1, %v1997_v24  ;;  %4283 = vmatmul.mubr.msk.f32.gmra.mrb[36].mxu0 %vm819_vm1, %v1997_v24  ;;  %4285 = vmatmul.mubr.msk.f32.gmra.mrb[60].mxu1 %vm819_vm1, %v1997_v24 }
 0x3f7   :  { %2252 = vmatprep.mubr.f32.mxu0 %v5833_v60  ;;  %2327 = vmatprep.mubr.f32.mxu1 %v5833_v60 }
 0x3fa   :  { %4286 = vmatmul.mubr.msk.f32.vlgmr.msra.gmra.mrb[38].mxu0 %vm819_vm1, %v1996_v7  ;;  %4288 = vmatmul.mubr.msk.f32.vlgmr.msra.gmra.mrb[62].mxu1 %vm819_vm1, %v1996_v7 }
 0x3fb   :  { %2256 = vmatprep.mubr.f32.mxu0 %v5833_v60  ;;  %2331 = vmatprep.mubr.f32.mxu1 %v5833_v60 }
 0x3fc   :  { %4604 = vmatpush1.bf16.msra.mxu0 %v5865_v47  ;;  %4612 = vmatpush1.bf16.msra.mxu1 %v5924_v31 }
 0x3fd   :  { %4606 = vmatprep.subr.bf16.mxu0 %v5869_v42  ;;  %4614 = vmatprep.subr.bf16.mxu1 %v5928_v1 }
 0x3fe   :  { %4287 = vmatmul.mubr.msk.f32.gmra.mrb[8].mxu0 %vm819_vm1, %v1997_v24  ;;  %4289 = vmatmul.mubr.msk.f32.gmra.mrb[40].mxu1 %vm819_vm1, %v1997_v24 }
 0x3ff   :  { %2506 = vmatprep.mubr.f32.mxu0 %v5833_v60  ;;  %2581 = vmatprep.mubr.f32.mxu1 %v5833_v60 }
 0x400   :  { %4608 = vmatpush1.bf16.msra.mxu0 %v5871_v6  ;;  %4616 = vmatpush1.bf16.msra.mxu1 %v5930_v17 }
 0x401   :  { %4618 = vmatprep.subr.bf16.mxu0 %v5934_v25  ;;  %4626 = vmatprep.subr.bf16.mxu1 %v5936_v15 }
 0x4ac   :  { %v2104_v53 = vpop.f32.mrb[34].mxu0  ;;  %v2179_v55 = vpop.f32.mrb[22].mxu1 }
 0x4ad   :  { %v2342_v58 = vadd.f32 %v2104_v53, %v5726_v54  ;;  %v2106_v35 = vpop.f32.mrb[35].mxu0  ;;  %v2181_v18 = vpop.f32.mrb[23].mxu1  ;;  %v4799_v7 = vadd.f32 %v2179_v55, %v5759_v4 }
 0x4ae   :  { %v2343_v61 = vadd.f32 %v2106_v35, %v5728_v57  ;;  %v4800_v12 = vadd.f32 %v2181_v18, %v5762_v9  ;;  %v2416_v35 = vld [vmem:[#allocation12 + $0x60] sm:$0xff]  ;;  %v2410_v18 = vld [vmem:[#allocation12 + $0x30] sm:$0xff] }
 0x4af   :  { %v4290_v63 = vmul.f32 -1.442695, %v2342_v58  ;;  %v4294_v14 = vmul.f32 -1.442695, %v4799_v7  ;;  %v2433_v7 = vld [vmem:[#allocation12 + $0xe8] sm:$0xff] }
 0x4b0   :  { %v4292_v0 = vmul.f32 -1.442695, %v2343_v61  ;;  %v2418_v61 = vld [vmem:[#allocation12 + $0x70] sm:$0xff] }
 0x4b1   :  { %4997 = vpow2.f32 %v4290_v63  ;;  %v2425_v63 = vld [vmem:[#allocation12 + $0xa8] sm:$0xff] }
 0x4b2   :  { %4999 = vpow2.f32 %v4292_v0 }
 0x4b3   :  { %5001 = vtanh.f32 %v4800_v12  ;;  %v2427_v12 = vld [vmem:[#allocation12 + $0xb8] sm:$0xff] }
 0x4b4   :  { %5003 = vpow2.f32 %v4294_v14  ;;  %v2435_v14 = vld [vmem:[#allocation12 + $0xf8] sm:$0xff] }
 0x4bb   :  { %v4998_v30 = vpop.eup %4997 }
 0x4bc   :  { %v2360_v21 = vadd.f32 1.0, %v4998_v30  ;;  %v5000_v51 = vpop.eup %4999 }
 0x4bd   :  { %v2372_v54 = vadd.f32 1.0, %v5000_v51  ;;  %v5002_v22 = vpop.eup %5001  ;;  %v5952_v51 = vpack.c.bf16 %v2418_v61, %v2410_v18 }
 0x4be   :  { %5005 = vrcp.f32 %v2360_v21  ;;  %v5004_v28 = vpop.eup %5003 }
 0x4bf   :  { %5007 = vrcp.f32 %v2372_v54  ;;  %v2384_v29 = vadd.f32 1.0, %v5004_v28  ;;  %v2426_v28 = vld [vmem:[#allocation12 + $0xb0] sm:$0xff] }
 0x4c1   :  { %5009 = vrcp.f32 %v2384_v29 }
 0x4c8   :  { %v5006_v57 = vpop.eup %5005 }
 0x4c9   :  { %v2394_v50 = vmul.f32 %v5006_v57, %v5002_v22  ;;  %v2110_v37 = vpop.f32.mrb[36].mxu0  ;;  %v2185_v44 = vpop.f32.mrb[60].mxu1  ;;  %v2434_v57 = vld [vmem:[#allocation12 + $0xf0] sm:$0xff] }
 0x4ca   :  { %v5008_v52 = vpop.eup %5007  ;;  %v2111_v24 = vpop.f32.mrb[37].mxu0  ;;  %v5957_v37 = vpack.c.bf16 %v2435_v14, %v2427_v12 }
 0x4cb   :  { %v2186_v33 = vpop.f32.mrb[61].mxu1  ;;  %v2392_v26 = vmul.f32 %v5008_v52, %v5883_v49  ;;  %v2408_v49 = vld [vmem:[#allocation12 + $0x20] sm:$0xff]  ;;  %v5010_v0 = vpop.eup %5009  ;;  %v5965_v52 = vpack.c.bf16 %v2434_v57, %v2426_v28 }
 0x4cc   :  { %v5950_v21 = vpack.c.bf16 %v2416_v35, %v2408_v49 }
 0x4cd   :  { %v5945_v56 = vadd.f32 %v2394_v50, %v2392_v26  ;;  %v2254_v19 = vpop.f32.mrb[38].mxu0  ;;  %v2329_v32 = vpop.f32.mrb[62].mxu1  ;;  %v5955_v50 = vpack.c.bf16 %v2433_v7, %v2425_v63 }
 0x4ce   :  { %v2255_v34 = vpop.f32.mrb[39].mxu0  ;;  %v2330_v11 = vpop.f32.mrb[63].mxu1 }
 0x4cf   :  { %5011 = vtanh.f32 %v5945_v56 }
 0x4d1   :  { %v2258_v43 = vpop.f32.mrb[8].mxu0  ;;  %v2333_v20 = vpop.f32.mrb[40].mxu1 }
 0x4d2   :  { %v4817_v41 = vadd.f32 %v2258_v43, %v5752_v40  ;;  %v2260_v3 = vpop.f32.mrb[9].mxu0  ;;  %v2335_v27 = vpop.f32.mrb[41].mxu1  ;;  %v4833_v54 = vadd.f32 %v2333_v20, %v5769_v39 }
 0x4d3   :  { %v4818_v53 = vadd.f32 %v2260_v3, %v5749_v38  ;;  %v4834_v44 = vadd.f32 %v2335_v27, %v5772_v45 }
 0x4d4   :  { %v4291_v55 = vmul.f32 -1.442695, %v4817_v41  ;;  %v4295_v29 = vmul.f32 -1.442695, %v4833_v54 }
 0x4d5   :  { %v4293_v58 = vmul.f32 -1.442695, %v4818_v53 }
 0x4d6   :  { %5013 = vpow2.f32 %v4291_v55 }
 0x4d7   :  { %5015 = vpow2.f32 %v4293_v58 }
 0x4d8   :  { %5017 = vtanh.f32 %v4834_v44 }
 0x4d9   :  { %v5012_v30 = vpop.eup %5011  ;;  %5019 = vpow2.f32 %v4295_v29 }
 0x4da   :  { %v2400_v22 = vmul.f32 %v5012_v30, %v5010_v0 }
 0x4dc   :  { %2402 = vst.msk [vmem:[#allocation3 + $0x30] sm:$0xff] %vm819_vm1, %v2400_v22  ;;  %4296 = vmatmul.mubr.msk.f32.vlgmr.msra.gmra.mrb[40].mxu0 %vm819_vm1, %v2400_v22  ;;  %4298 = vmatmul.mubr.msk.f32.vlgmr.msra.gmra.mrb[24].mxu1 %vm819_vm1, %v2400_v22 }
 0x4dd   :  { %4620 = vmatpush1.bf16.msra.mxu0 %v5950_v21  ;;  %4628 = vmatpush1.bf16.msra.mxu1 %v5952_v51 }
 0x4de   :  { %2512 = vmatprep.mubr.f32.mxu0 %v5833_v60  ;;  %2587 = vmatprep.mubr.f32.mxu1 %v5833_v60 }
 0x4df   :  { %4622 = vmatprep.subr.bf16.mxu0 %v5955_v50  ;;  %4630 = vmatprep.subr.bf16.mxu1 %v5957_v37 }
 0x4e0   :  { %v5014_v24 = vpop.eup %5013 }
 0x4e1   :  { %v2361_v33 = vadd.f32 1.0, %v5014_v24  ;;  %4624 = vmatpush1.bf16.msra.mxu0 %v5893_v48  ;;  %4632 = vmatpush1.bf16.msra.mxu1 %v5965_v52  ;;  %v5016_v26 = vpop.eup %5015 }
 0x4e2   :  { %4634 = vmatprep.subr.bf16.mxu0 %v5863_v36  ;;  %4642 = vmatprep.subr.bf16.mxu1 %v5922_v46  ;;  %v2373_v19 = vadd.f32 1.0, %v5016_v26  ;;  %v5018_v32 = vpop.eup %5017 }
 0x4e3   :  { %5021 = vrcp.f32 %v2361_v33  ;;  %v5020_v34 = vpop.eup %5019 }
 0x4e4   :  { %5023 = vrcp.f32 %v2373_v19  ;;  %v2385_v41 = vadd.f32 1.0, %v5020_v34 }
 0x4e6   :  { %5025 = vrcp.f32 %v2385_v41 }
 0x4ed   :  { %v5022_v11 = vpop.eup %5021 }
 0x4ee   :  { %v2395_v43 = vmul.f32 %v5022_v11, %v5018_v32  ;;  %v5024_v20 = vpop.eup %5023 }
 0x4ef   :  { %v2393_v3 = vmul.f32 %v5024_v20, %v5903_v23 }
 0x4f0   :  { %v5026_v53 = vpop.eup %5025 }
 0x4f1   :  { %v5976_v27 = vadd.f32 %v2395_v43, %v2393_v3 }
 0x4f3   :  { %5027 = vtanh.f32 %v5976_v27 }
 0x4fd   :  { %v5028_v55 = vpop.eup %5027 }
 0x4fe   :  { %v2401_v58 = vmul.f32 %v5028_v55, %v5026_v53 }
 0x500   :  { %2403 = vst.msk [vmem:[#allocation3 + $0x48] sm:$0xff] %vm819_vm1, %v2401_v58  ;;  %4297 = vmatmul.mubr.msk.f32.gmra.mrb[42].mxu0 %vm819_vm1, %v2401_v58  ;;  %4299 = vmatmul.mubr.msk.f32.gmra.mrb[64].mxu1 %vm819_vm1, %v2401_v58 }
 0x501   :  { %2656 = vmatprep.mubr.f32.mxu0 %v5833_v60  ;;  %2731 = vmatprep.mubr.f32.mxu1 %v5833_v60 }
 0x504   :  { %4300 = vmatmul.mubr.msk.f32.vlgmr.msra.gmra.mrb[44].mxu0 %vm819_vm1, %v2400_v22  ;;  %4302 = vmatmul.mubr.msk.f32.vlgmr.msra.gmra.mrb[66].mxu1 %vm819_vm1, %v2400_v22 }
 0x505   :  { %2660 = vmatprep.mubr.f32.mxu0 %v5833_v60  ;;  %2735 = vmatprep.mubr.f32.mxu1 %v5833_v60 }
 0x506   :  { %4636 = vmatpush1.bf16.msra.mxu0 %v5865_v47  ;;  %4644 = vmatpush1.bf16.msra.mxu1 %v5924_v31 }
 0x507   :  { %4638 = vmatprep.subr.bf16.mxu0 %v5869_v42  ;;  %4646 = vmatprep.subr.bf16.mxu1 %v5928_v1 }
 0x508   :  { %4301 = vmatmul.mubr.msk.f32.gmra.mrb[6].mxu0 %vm819_vm1, %v2401_v58  ;;  %4303 = vmatmul.mubr.msk.f32.gmra.mrb[38].mxu1 %vm819_vm1, %v2401_v58 }
 0x509   :  { %2910 = vmatprep.mubr.f32.mxu0 %v5833_v60  ;;  %2985 = vmatprep.mubr.f32.mxu1 %v5833_v60 }
 0x50a   :  { %4640 = vmatpush1.bf16.msra.mxu0 %v5871_v6  ;;  %4648 = vmatpush1.bf16.msra.mxu1 %v5930_v17 }
 0x50b   :  { %4650 = vmatprep.subr.bf16.mxu0 %v5934_v25  ;;  %4658 = vmatprep.subr.bf16.mxu1 %v5936_v15 }
 0x5af   :  { %v2508_v23 = vpop.f32.mrb[40].mxu0  ;;  %v2583_v49 = vpop.f32.mrb[24].mxu1 }
 0x5b0   :  { %v2746_v35 = vadd.f32 %v2508_v23, %v5730_v59  ;;  %v2510_v18 = vpop.f32.mrb[41].mxu0  ;;  %v2585_v61 = vpop.f32.mrb[25].mxu1  ;;  %v4801_v12 = vadd.f32 %v2583_v49, %v5759_v4 }
 0x5b1   :  { %v2747_v63 = vadd.f32 %v2510_v18, %v5732_v62  ;;  %v4802_v14 = vadd.f32 %v2585_v61, %v5762_v9 }
 0x5b2   :  { %v4304_v0 = vmul.f32 -1.442695, %v2746_v35  ;;  %v4308_v30 = vmul.f32 -1.442695, %v4801_v12 }
 0x5b3   :  { %v4306_v7 = vmul.f32 -1.442695, %v2747_v63 }
 0x5b4   :  { %5029 = vpow2.f32 %v4304_v0 }
 0x5b5   :  { %5031 = vpow2.f32 %v4306_v7 }
 0x5b6   :  { %5033 = vtanh.f32 %v4802_v14 }
 0x5b7   :  { %5035 = vpow2.f32 %v4308_v30 }
 0x5be   :  { %v5030_v54 = vpop.eup %5029 }
 0x5bf   :  { %v2764_v22 = vadd.f32 1.0, %v5030_v54  ;;  %v5032_v28 = vpop.eup %5031 }
 0x5c0   :  { %v2776_v59 = vadd.f32 1.0, %v5032_v28  ;;  %v5034_v57 = vpop.eup %5033 }
 0x5c1   :  { %5037 = vrcp.f32 %v2764_v22  ;;  %v5036_v44 = vpop.eup %5035 }
 0x5c2   :  { %5039 = vrcp.f32 %v2776_v59  ;;  %v2788_v33 = vadd.f32 1.0, %v5036_v44 }
 0x5c4   :  { %5041 = vrcp.f32 %v2788_v33 }
 0x5cb   :  { %v5038_v62 = vpop.eup %5037 }
 0x5cc   :  { %v2798_v29 = vmul.f32 %v5038_v62, %v5034_v57  ;;  %v5040_v24 = vpop.eup %5039 }
 0x5cd   :  { %v2796_v26 = vmul.f32 %v5040_v24, %v5945_v56 }
 0x5ce   :  { %v5042_v55 = vpop.eup %5041 }
 0x5cf   :  { %v6005_v19 = vadd.f32 %v2798_v29, %v2796_v26 }
 0x5d1   :  { %5043 = vtanh.f32 %v6005_v19 }
 0x5d3   :  { %v2514_v32 = vpop.f32.mrb[42].mxu0  ;;  %v2589_v34 = vpop.f32.mrb[64].mxu1 }
 0x5d4   :  { %v2515_v11 = vpop.f32.mrb[43].mxu0  ;;  %v2590_v43 = vpop.f32.mrb[65].mxu1 }
 0x5d7   :  { %v2658_v20 = vpop.f32.mrb[44].mxu0  ;;  %v2733_v41 = vpop.f32.mrb[66].mxu1 }
 0x5d8   :  { %v2659_v3 = vpop.f32.mrb[45].mxu0  ;;  %v2734_v53 = vpop.f32.mrb[67].mxu1 }
 0x5db   :  { %v5044_v58 = vpop.eup %5043  ;;  %v2662_v23 = vpop.f32.mrb[6].mxu0 }
 0x5dc   :  { %v2737_v49 = vpop.f32.mrb[38].mxu1  ;;  %v4815_v35 = vadd.f32 %v2662_v23, %v5752_v40  ;;  %v2664_v56 = vpop.f32.mrb[7].mxu0  ;;  %v2804_v61 = vmul.f32 %v5044_v58, %v5042_v55 }
 0x5dd   :  { %v2739_v18 = vpop.f32.mrb[39].mxu1  ;;  %v4816_v63 = vadd.f32 %v2664_v56, %v5749_v38  ;;  %v4831_v12 = vadd.f32 %v2737_v49, %v5769_v39 }
 0x5de   :  { %v4305_v0 = vmul.f32 -1.442695, %v4815_v35  ;;  %2806 = vst.msk [vmem:[#allocation3 + $0x40] sm:$0xff] %vm819_vm1, %v2804_v61  ;;  %4310 = vmatmul.mubr.msk.f32.vlgmr.msra.gmra.mrb[46].mxu0 %vm819_vm1, %v2804_v61  ;;  %4312 = vmatmul.mubr.msk.f32.vlgmr.msra.gmra.mrb[26].mxu1 %vm819_vm1, %v2804_v61  ;;  %v4832_v14 = vadd.f32 %v2739_v18, %v5772_v45 }
 0x5df   :  { %v4307_v7 = vmul.f32 -1.442695, %v4816_v63  ;;  %4652 = vmatpush1.bf16.msra.mxu0 %v5950_v21  ;;  %4660 = vmatpush1.bf16.msra.mxu1 %v5952_v51  ;;  %v4309_v30 = vmul.f32 -1.442695, %v4831_v12 }
 0x5e0   :  { %5045 = vpow2.f32 %v4305_v0  ;;  %2916 = vmatprep.mubr.f32.mxu0 %v5833_v60  ;;  %2991 = vmatprep.mubr.f32.mxu1 %v5833_v60 }
 0x5e1   :  { %4654 = vmatprep.subr.bf16.mxu0 %v5955_v50  ;;  %4662 = vmatprep.subr.bf16.mxu1 %v5957_v37  ;;  %5047 = vpow2.f32 %v4307_v7 }
 0x5e2   :  { %5049 = vtanh.f32 %v4832_v14 }
 0x5e3   :  { %4656 = vmatpush1.bf16.msra.mxu0 %v5893_v48  ;;  %4664 = vmatpush1.bf16.msra.mxu1 %v5965_v52  ;;  %5051 = vpow2.f32 %v4309_v30 }
 0x5e4   :  { %4666 = vmatprep.subr.bf16.mxu0 %v5863_v36  ;;  %4674 = vmatprep.subr.bf16.mxu1 %v5922_v46 }
 0x5ea   :  { %v5046_v54 = vpop.eup %5045 }
 0x5eb   :  { %v2765_v22 = vadd.f32 1.0, %v5046_v54  ;;  %v5048_v28 = vpop.eup %5047 }
 0x5ec   :  { %v2777_v59 = vadd.f32 1.0, %v5048_v28  ;;  %v5050_v57 = vpop.eup %5049 }
 0x5ed   :  { %5053 = vrcp.f32 %v2765_v22  ;;  %v5052_v44 = vpop.eup %5051 }
 0x5ee   :  { %5055 = vrcp.f32 %v2777_v59  ;;  %v2789_v33 = vadd.f32 1.0, %v5052_v44 }
 0x5f0   :  { %5057 = vrcp.f32 %v2789_v33 }
 0x5f7   :  { %v5054_v62 = vpop.eup %5053 }
 0x5f8   :  { %v2799_v29 = vmul.f32 %v5054_v62, %v5050_v57  ;;  %v5056_v24 = vpop.eup %5055 }
 0x5f9   :  { %v2797_v36 = vmul.f32 %v5056_v24, %v5976_v27 }
 0x5fa   :  { %v5058_v32 = vpop.eup %5057 }
 0x5fb   :  { %v6026_v26 = vadd.f32 %v2799_v29, %v2797_v36 }
 0x5fd   :  { %5059 = vtanh.f32 %v6026_v26 }
 0x607   :  { %v5060_v34 = vpop.eup %5059 }
 0x608   :  { %v2805_v11 = vmul.f32 %v5060_v34, %v5058_v32 }
 0x60a   :  { %2807 = vst.msk [vmem:[#allocation3 + $0x38] sm:$0xff] %vm819_vm1, %v2805_v11  ;;  %4311 = vmatmul.mubr.msk.f32.gmra.mrb[48].mxu0 %vm819_vm1, %v2805_v11  ;;  %4313 = vmatmul.mubr.msk.f32.gmra.mrb[68].mxu1 %vm819_vm1, %v2805_v11 }
 0x60b   :  { %3060 = vmatprep.mubr.f32.mxu0 %v5833_v60  ;;  %3135 = vmatprep.mubr.f32.mxu1 %v5833_v60 }
 0x60e   :  { %4314 = vmatmul.mubr.msk.f32.vlgmr.msra.gmra.mrb[50].mxu0 %vm819_vm1, %v2804_v61  ;;  %4316 = vmatmul.mubr.msk.f32.vlgmr.msra.gmra.mrb[70].mxu1 %vm819_vm1, %v2804_v61 }
 0x60f   :  { %3064 = vmatprep.mubr.f32.mxu0 %v5833_v60  ;;  %3139 = vmatprep.mubr.f32.mxu1 %v5833_v60 }
 0x610   :  { %4668 = vmatpush1.bf16.msra.mxu0 %v5865_v47  ;;  %4676 = vmatpush1.bf16.msra.mxu1 %v5924_v31 }
 0x611   :  { %4670 = vmatprep.subr.bf16.mxu0 %v5869_v42  ;;  %4678 = vmatprep.subr.bf16.mxu1 %v5928_v1 }
 0x612   :  { %4315 = vmatmul.mubr.msk.f32.gmra.mrb[4].mxu0 %vm819_vm1, %v2805_v11  ;;  %4317 = vmatmul.mubr.msk.f32.gmra.mrb[36].mxu1 %vm819_vm1, %v2805_v11 }
 0x613   :  { %3314 = vmatprep.mubr.f32.mxu0 %v5833_v60  ;;  %3389 = vmatprep.mubr.f32.mxu1 %v5833_v60 }
 0x614   :  { %4672 = vmatpush1.bf16.msra.mxu0 %v5871_v6  ;;  %4680 = vmatpush1.bf16.msra.mxu1 %v5930_v17 }
 0x615   :  { %4682 = vmatprep.subr.bf16.mxu0 %v5934_v25  ;;  %4690 = vmatprep.subr.bf16.mxu1 %v5936_v15 }
 0x6b1   :  { %v2912_v47 = vpop.f32.mrb[46].mxu0  ;;  %v2987_v42 = vpop.f32.mrb[26].mxu1 }
 0x6b2   :  { %v3150_v27 = vadd.f32 %v2912_v47, %v5734_v2  ;;  %v2914_v43 = vpop.f32.mrb[47].mxu0  ;;  %v2989_v20 = vpop.f32.mrb[27].mxu1  ;;  %v4803_v6 = vadd.f32 %v2987_v42, %v5759_v4 }
 0x6b3   :  { %v3151_v41 = vadd.f32 %v2914_v43, %v5736_v5  ;;  %v4804_v55 = vadd.f32 %v2989_v20, %v5762_v9 }
 0x6b4   :  { %v4318_v3 = vmul.f32 -1.442695, %v3150_v27  ;;  %v4322_v58 = vmul.f32 -1.442695, %v4803_v6 }
 0x6b5   :  { %v4320_v53 = vmul.f32 -1.442695, %v3151_v41 }
 0x6b6   :  { %5061 = vpow2.f32 %v4318_v3 }
 0x6b7   :  { %5063 = vpow2.f32 %v4320_v53 }
 0x6b8   :  { %5065 = vtanh.f32 %v4804_v55 }
 0x6b9   :  { %5067 = vpow2.f32 %v4322_v58 }
 0x6c0   :  { %v5062_v23 = vpop.eup %5061 }
 0x6c1   :  { %v3168_v49 = vadd.f32 1.0, %v5062_v23  ;;  %v5064_v35 = vpop.eup %5063 }
 0x6c2   :  { %v3180_v2 = vadd.f32 1.0, %v5064_v35  ;;  %v5066_v56 = vpop.eup %5065 }
 0x6c3   :  { %5069 = vrcp.f32 %v3168_v49  ;;  %v5068_v18 = vpop.eup %5067 }
 0x6c4   :  { %5071 = vrcp.f32 %v3180_v2  ;;  %v3192_v0 = vadd.f32 1.0, %v5068_v18 }
 0x6c6   :  { %5073 = vrcp.f32 %v3192_v0  ;;  %v3624_v0 = vld [vmem:[#allocation12 + $0x40] sm:$0xff] }
 0x6cd   :  { %v5070_v5 = vpop.eup %5069 }
 0x6ce   :  { %v3202_v61 = vmul.f32 %v5070_v5, %v5066_v56  ;;  %v5072_v63 = vpop.eup %5071 }
 0x6cf   :  { %v3200_v7 = vmul.f32 %v5072_v63, %v6005_v19  ;;  %v3616_v63 = vld [vmem:[#allocation12] sm:$0xff] }
 0x6d0   :  { %v5074_v14 = vpop.eup %5073 }
 0x6d1   :  { %v6055_v12 = vadd.f32 %v3202_v61, %v3200_v7  ;;  %v3617_v61 = vld [vmem:[#allocation12 + $0x8] sm:$0xff] }
 0x6d2   :  { %v3641_v7 = vld [vmem:[#allocation12 + $0xc8] sm:$0xff] }
 0x6d3   :  { %5075 = vtanh.f32 %v6055_v12 }
 0x6dd   :  { %v5076_v30 = vpop.eup %5075  ;;  %v2918_v54 = vpop.f32.mrb[48].mxu0 }
 0x6de   :  { %v2993_v22 = vpop.f32.mrb[68].mxu1  ;;  %v2919_v28 = vpop.f32.mrb[49].mxu0  ;;  %v3208_v57 = vmul.f32 %v5076_v30, %v5074_v14  ;;  %v4699_v14 = vpack.c.bf16 %v3624_v0, %v3616_v63  ;;  %v3632_v54 = vld [vmem:[#allocation12 + $0x80] sm:$0xff] }
 0x6df   :  { %v2994_v59 = vpop.f32.mrb[69].mxu1  ;;  %v3640_v22 = vld [vmem:[#allocation12 + $0xc0] sm:$0xff] }
 0x6e0   :  { %3210 = vst.msk [vmem:[#allocation3 + $0x50] sm:$0xff] %vm819_vm1, %v3208_v57  ;;  %4324 = vmatmul.mubr.msk.f32.vlgmr.msra.gmra.mrb[52].mxu0 %vm819_vm1, %v3208_v57  ;;  %4326 = vmatmul.mubr.msk.f32.vlgmr.msra.gmra.mrb[28].mxu1 %vm819_vm1, %v3208_v57  ;;  %v4703_v28 = vpack.c.bf16 %v3640_v22, %v3632_v54 }
 0x6e1   :  { %v3062_v44 = vpop.f32.mrb[50].mxu0  ;;  %v3137_v19 = vpop.f32.mrb[70].mxu1  ;;  %4684 = vmatpush1.bf16.msra.mxu0 %v5950_v21  ;;  %4692 = vmatpush1.bf16.msra.mxu1 %v5952_v51 }
 0x6e2   :  { %v3063_v62 = vpop.f32.mrb[51].mxu0  ;;  %v3138_v29 = vpop.f32.mrb[71].mxu1  ;;  %3320 = vmatprep.mubr.f32.mxu0 %v5833_v60  ;;  %3395 = vmatprep.mubr.f32.mxu1 %v5833_v60 }
 0x6e3   :  { %4686 = vmatprep.subr.bf16.mxu0 %v5955_v50  ;;  %4694 = vmatprep.subr.bf16.mxu1 %v5957_v37 }
 0x6e5   :  { %v3066_v24 = vpop.f32.mrb[4].mxu0  ;;  %v3141_v33 = vpop.f32.mrb[36].mxu1  ;;  %4688 = vmatpush1.bf16.msra.mxu0 %v5893_v48  ;;  %4696 = vmatpush1.bf16.msra.mxu1 %v5965_v52 }
 0x6e6   :  { %v4813_v36 = vadd.f32 %v3066_v24, %v5752_v40  ;;  %v3068_v32 = vpop.f32.mrb[5].mxu0  ;;  %v3143_v34 = vpop.f32.mrb[37].mxu1  ;;  %4706 = vmatprep.subr.bf16.mxu1 %v5922_v46  ;;  %v4829_v27 = vadd.f32 %v3141_v33, %v5769_v39 }
 0x6e7   :  { %v4814_v11 = vadd.f32 %v3068_v32, %v5749_v38  ;;  %v4830_v43 = vadd.f32 %v3143_v34, %v5772_v45 }
 0x6e8   :  { %v4319_v47 = vmul.f32 -1.442695, %v4813_v36  ;;  %v4323_v20 = vmul.f32 -1.442695, %v4829_v27 }
 0x6e9   :  { %v4321_v42 = vmul.f32 -1.442695, %v4814_v11 }
 0x6ea   :  { %5077 = vpow2.f32 %v4319_v47 }
 0x6eb   :  { %5079 = vpow2.f32 %v4321_v42 }
 0x6ec   :  { %5081 = vtanh.f32 %v4830_v43 }
 0x6ed   :  { %5083 = vpow2.f32 %v4323_v20 }
 0x6f4   :  { %v5078_v48 = vpop.eup %5077 }
 0x6f5   :  { %v3169_v41 = vadd.f32 1.0, %v5078_v48  ;;  %v5080_v3 = vpop.eup %5079 }
 0x6f6   :  { %v3181_v53 = vadd.f32 1.0, %v5080_v3  ;;  %v5082_v46 = vpop.eup %5081 }
 0x6f7   :  { %5085 = vrcp.f32 %v3169_v41  ;;  %v5084_v6 = vpop.eup %5083 }
 0x6f8   :  { %5087 = vrcp.f32 %v3181_v53  ;;  %v3193_v49 = vadd.f32 1.0, %v5084_v6  ;;  %v3644_v6 = vld [vmem:[#allocation12 + $0xe0] sm:$0xff] }
 0x6fa   :  { %5089 = vrcp.f32 %v3193_v49 }
 0x701   :  { %v5086_v55 = vpop.eup %5085 }
 0x702   :  { %v3203_v58 = vmul.f32 %v5086_v55, %v5082_v46  ;;  %v5088_v23 = vpop.eup %5087  ;;  %v3636_v46 = vld [vmem:[#allocation12 + $0xa0] sm:$0xff] }
 0x703   :  { %v3201_v35 = vmul.f32 %v5088_v23, %v6026_v26  ;;  %v6091_v26 = vld [vmem:[#allocation3 + $0x8] sm:$0xff] }
 0x704   :  { %v5090_v56 = vpop.eup %5089 }
 0x705   :  { %v6075_v2 = vadd.f32 %v3203_v58, %v3201_v35 }
 0x707   :  { %5091 = vtanh.f32 %v6075_v2 }
 0x711   :  { %v5092_v18 = vpop.eup %5091 }
 0x712   :  { %v3209_v5 = vmul.f32 %v5092_v18, %v5090_v56 }
 0x714   :  { %3211 = vst.msk [vmem:[#allocation3 + $0x28] sm:$0xff] %vm819_vm1, %v3209_v5  ;;  %4325 = vmatmul.mubr.msk.f32.gmra.mrb[54].mxu0 %vm819_vm1, %v3209_v5  ;;  %4327 = vmatmul.mubr.msk.f32.gmra.mrb[72].mxu1 %vm819_vm1, %v3209_v5 }
 0x715   :  { %3464 = vmatprep.mubr.f32.mxu0 %v5833_v60  ;;  %3539 = vmatprep.mubr.f32.mxu1 %v5833_v60 }
 0x718   :  { %4328 = vmatmul.mubr.msk.f32.vlgmr.msra.gmra.mrb[56].mxu0 %vm819_vm1, %v3208_v57  ;;  %4330 = vmatmul.mubr.msk.f32.vlgmr.msra.gmra.mrb[74].mxu1 %vm819_vm1, %v3208_v57 }
 0x719   :  { %3468 = vmatprep.mubr.f32.mxu0 %v5833_v60  ;;  %3543 = vmatprep.mubr.f32.mxu1 %v5833_v60  ;;  %v3625_v60 = vld [vmem:[#allocation12 + $0x48] sm:$0xff] }
 0x71a   :  { %4708 = vmatpush1.bf16.msra.mxu1 %v5924_v31  ;;  %v4697_v31 = vpack.c.bf16 %v3625_v60, %v3617_v61 }
 0x71b   :  { %4710 = vmatprep.subr.bf16.mxu1 %v5928_v1  ;;  %v3633_v1 = vld [vmem:[#allocation12 + $0x88] sm:$0xff] }
 0x71c   :  { %4329 = vmatmul.mubr.msk.f32.gmra.mrb[2].mxu0 %vm819_vm1, %v3209_v5  ;;  %4331 = vmatmul.mubr.msk.f32.gmra.mrb[34].mxu1 %vm819_vm1, %v3209_v5  ;;  %v4701_v30 = vpack.c.bf16 %v3641_v7, %v3633_v1 }
 0x71d   :  { %3718 = vmatprep.mubr.f32.mxu0 %v6091_v26  ;;  %3793 = vmatprep.mubr.f32.mxu1 %v6091_v26 }
 0x71e   :  { %4712 = vmatpush1.bf16.msra.mxu1 %v5930_v17  ;;  %4698 = vmatprep.subr.bf16.mxu0 %v4697_v31 }
 0x71f   :  { %4722 = vmatprep.subr.bf16.mxu1 %v5936_v15  ;;  %4700 = vmatpush1.bf16.msra.mxu0 %v4699_v14 }
 0x720   :  { %4702 = vmatprep.subr.bf16.mxu0 %v4701_v30 }
 0x723   :  { %4704 = vmatpush1.bf16.msra.mxu0 %v4703_v28 }
 0x724   :  { %4714 = vmatprep.subr.bf16.mxu0 %v5934_v25 }
 0x7b3   :  { %v3316_v17 = vpop.f32.mrb[52].mxu0  ;;  %v3391_v15 = vpop.f32.mrb[28].mxu1 }
 0x7b4   :  { %v3554_v59 = vadd.f32 %v3316_v17, %v5738_v8  ;;  %v3318_v57 = vpop.f32.mrb[53].mxu0  ;;  %v3393_v44 = vpop.f32.mrb[29].mxu1  ;;  %v4805_v24 = vadd.f32 %v3391_v15, %v5759_v4 }
 0x7b5   :  { %v3555_v19 = vadd.f32 %v3318_v57, %v5740_v10  ;;  %v4806_v33 = vadd.f32 %v3393_v44, %v5762_v9 }
 0x7b6   :  { %v4332_v62 = vmul.f32 -1.442695, %v3554_v59  ;;  %v4336_v36 = vmul.f32 -1.442695, %v4805_v24 }
 0x7b7   :  { %v4334_v29 = vmul.f32 -1.442695, %v3555_v19 }
 0x7b8   :  { %5093 = vpow2.f32 %v4332_v62 }
 0x7b9   :  { %5095 = vpow2.f32 %v4334_v29 }
 0x7ba   :  { %5097 = vtanh.f32 %v4806_v33  ;;  %v4053_v33 = vld [vmem:[#allocation13 + $0x88] sm:$0xff] }
 0x7bb   :  { %5099 = vpow2.f32 %v4336_v36 }
 0x7c2   :  { %v5094_v32 = vpop.eup %5093 }
 0x7c3   :  { %v3572_v34 = vadd.f32 1.0, %v5094_v32  ;;  %v5096_v25 = vpop.eup %5095  ;;  %v4036_v32 = vld [vmem:[#allocation13] sm:$0xff] }
 0x7c4   :  { %v3584_v8 = vadd.f32 1.0, %v5096_v25  ;;  %v5098_v11 = vpop.eup %5097 }
 0x7c5   :  { %5101 = vrcp.f32 %v3572_v34  ;;  %v5100_v47 = vpop.eup %5099  ;;  %v4037_v34 = vld [vmem:[#allocation13 + $0x8] sm:$0xff] }
 0x7c6   :  { %5103 = vrcp.f32 %v3584_v8  ;;  %v3596_v43 = vadd.f32 1.0, %v5100_v47  ;;  %v4731_v25 = vpack.c.bf16 %v4037_v34, %v4036_v32  ;;  %v4054_v8 = vld [vmem:[#allocation13 + $0x90] sm:$0xff] }
 0x7c8   :  { %5105 = vrcp.f32 %v3596_v43  ;;  %v4057_v43 = vld [vmem:[#allocation13 + $0xa8] sm:$0xff] }
 0x7cf   :  { %v5102_v10 = vpop.eup %5101 }
 0x7d0   :  { %v3606_v42 = vmul.f32 %v5102_v10, %v5098_v11  ;;  %v5104_v27 = vpop.eup %5103  ;;  %v4055_v11 = vld [vmem:[#allocation13 + $0x98] sm:$0xff]  ;;  %v4038_v10 = vld [vmem:[#allocation13 + $0x10] sm:$0xff] }
 0x7d1   :  { %v3604_v20 = vmul.f32 %v5104_v27, %v6055_v12  ;;  %v4719_v12 = vpack.c.bf16 %v3644_v6, %v3636_v46  ;;  %v4733_v47 = vpack.c.bf16 %v4055_v11, %v4054_v8  ;;  %v4058_v46 = vld [vmem:[#allocation13 + $0xb0] sm:$0xff]  ;;  %v4059_v6 = vld [vmem:[#allocation13 + $0xb8] sm:$0xff] }
 0x7d2   :  { %v5106_v41 = vpop.eup %5105 }
 0x7d3   :  { %v6103_v48 = vadd.f32 %v3606_v42, %v3604_v20  ;;  %v4039_v42 = vld [vmem:[#allocation13 + $0x18] sm:$0xff] }
 0x7d4   :  { %v4735_v27 = vpack.c.bf16 %v4039_v42, %v4038_v10 }
 0x7d5   :  { %5107 = vtanh.f32 %v6103_v48 }
 0x7df   :  { %v5108_v3 = vpop.eup %5107 }
 0x7e0   :  { %v6106_v53 = vmul.f32 %v5108_v3, %v5106_v41  ;;  %v4040_v41 = vld [vmem:[#allocation13 + $0x20] sm:$0xff]  ;;  %v4041_v3 = vld [vmem:[#allocation13 + $0x28] sm:$0xff] }
 0x7e2   :  { %3614 = vst.msk [vmem:[#allocation3 + $0x60] sm:$0xff] %vm819_vm1, %v6106_v53  ;;  %4338 = vmatmul.mubr.msk.f32.vlgmr.msra.gmra.mrb[58].mxu0 %vm819_vm1, %v6106_v53  ;;  %4340 = vmatmul.mubr.msk.f32.vlgmr.msra.gmra.mrb[30].mxu1 %vm819_vm1, %v6106_v53 }
 0x7e3   :  { %4716 = vmatpush1.bf16.msra.mxu0 %v5950_v21  ;;  %4724 = vmatpush1.bf16.msra.mxu1 %v5952_v51 }
 0x7e4   :  { %3724 = vmatprep.mubr.f32.mxu0 %v6091_v26  ;;  %3799 = vmatprep.mubr.f32.mxu1 %v6091_v26 }
 0x7e5   :  { %4718 = vmatprep.subr.bf16.mxu0 %v5955_v50  ;;  %4726 = vmatprep.subr.bf16.mxu1 %v5957_v37 }
 0x7e7   :  { %v3322_v55 = vpop.f32.mrb[54].mxu0  ;;  %v3397_v58 = vpop.f32.mrb[72].mxu1  ;;  %4720 = vmatpush1.bf16.msra.mxu0 %v4719_v12  ;;  %4728 = vmatpush1.bf16.msra.mxu1 %v5965_v52  ;;  %v4741_v12 = vpack.c.bf16 %v4059_v6, %v4058_v46 }
 0x7e8   :  { %v3323_v23 = vpop.f32.mrb[55].mxu0  ;;  %v3398_v49 = vpop.f32.mrb[73].mxu1  ;;  %v4042_v55 = vld [vmem:[#allocation13 + $0x30] sm:$0xff]  ;;  %v4043_v58 = vld [vmem:[#allocation13 + $0x38] sm:$0xff] }
 0x7e9   :  { %v4743_v23 = vpack.c.bf16 %v4043_v58, %v4042_v55  ;;  %v4060_v49 = vld [vmem:[#allocation13 + $0xc0] sm:$0xff] }
 0x7eb   :  { %v3466_v35 = vpop.f32.mrb[56].mxu0  ;;  %v3541_v21 = vpop.f32.mrb[74].mxu1 }
 0x7ec   :  { %v3467_v56 = vpop.f32.mrb[57].mxu0  ;;  %v3542_v51 = vpop.f32.mrb[75].mxu1  ;;  %v4061_v35 = vld [vmem:[#allocation13 + $0xc8] sm:$0xff] }
 0x7ed   :  { %v4745_v21 = vpack.c.bf16 %v4061_v35, %v4060_v49  ;;  %v4044_v56 = vld [vmem:[#allocation13 + $0x40] sm:$0xff]  ;;  %v4045_v51 = vld [vmem:[#allocation13 + $0x48] sm:$0xff] }
 0x7ef   :  { %v3470_v18 = vpop.f32.mrb[2].mxu0  ;;  %v3545_v5 = vpop.f32.mrb[34].mxu1 }
 0x7f0   :  { %v4811_v61 = vadd.f32 %v3470_v18, %v5752_v40  ;;  %v3472_v60 = vpop.f32.mrb[3].mxu0  ;;  %v3547_v63 = vpop.f32.mrb[35].mxu1  ;;  %v4827_v52 = vadd.f32 %v3545_v5, %v5769_v39  ;;  %v4747_v18 = vpack.c.bf16 %v4045_v51, %v4044_v56  ;;  %v4062_v5 = vld [vmem:[#allocation13 + $0xd0] sm:$0xff] }
 0x7f1   :  { %v4812_v50 = vadd.f32 %v3472_v60, %v5749_v38  ;;  %v4828_v0 = vadd.f32 %v3547_v63, %v5772_v45  ;;  %v4046_v63 = vld [vmem:[#allocation13 + $0x50] sm:$0xff] }
 0x7f2   :  { %v4333_v37 = vmul.f32 -1.442695, %v4811_v61  ;;  %v4337_v1 = vmul.f32 -1.442695, %v4827_v52  ;;  %v4063_v61 = vld [vmem:[#allocation13 + $0xd8] sm:$0xff]  ;;  %v4065_v52 = vld [vmem:[#allocation13 + $0xe8] sm:$0xff] }
 0x7f3   :  { %v4335_v31 = vmul.f32 -1.442695, %v4812_v50  ;;  %v4749_v60 = vpack.c.bf16 %v4063_v61, %v4062_v5  ;;  %v4047_v50 = vld [vmem:[#allocation13 + $0x58] sm:$0xff] }
 0x7f4   :  { %5109 = vpow2.f32 %v4333_v37  ;;  %v4751_v37 = vpack.c.bf16 %v4047_v50, %v4046_v63 }
 0x7f5   :  { %5111 = vpow2.f32 %v4335_v31  ;;  %v4064_v31 = vld [vmem:[#allocation13 + $0xe0] sm:$0xff] }
 0x7f6   :  { %5113 = vtanh.f32 %v4828_v0  ;;  %v4753_v0 = vpack.c.bf16 %v4065_v52, %v4064_v31 }
 0x7f7   :  { %5115 = vpow2.f32 %v4337_v1  ;;  %v4048_v1 = vld [vmem:[#allocation13 + $0x60] sm:$0xff] }
 0x7fe   :  { %v5110_v7 = vpop.eup %5109 }
 0x7ff   :  { %v3573_v14 = vadd.f32 1.0, %v5110_v7  ;;  %v5112_v30 = vpop.eup %5111  ;;  %v4049_v7 = vld [vmem:[#allocation13 + $0x68] sm:$0xff] }
 0x800   :  { %v3585_v54 = vadd.f32 1.0, %v5112_v30  ;;  %v5114_v22 = vpop.eup %5113  ;;  %v4066_v30 = vld [vmem:[#allocation13 + $0xf0] sm:$0xff] }
 0x801   :  { %5117 = vrcp.f32 %v3573_v14  ;;  %v5116_v28 = vpop.eup %5115  ;;  %v4755_v14 = vpack.c.bf16 %v4049_v7, %v4048_v1 }
 0x802   :  { %5119 = vrcp.f32 %v3585_v54  ;;  %v3597_v57 = vadd.f32 1.0, %v5116_v28  ;;  %v4067_v54 = vld [vmem:[#allocation13 + $0xf8] sm:$0xff] }
 0x803   :  { %v4757_v28 = vpack.c.bf16 %v4067_v54, %v4066_v30 }
 0x804   :  { %5121 = vrcp.f32 %v3597_v57 }
 0x80b   :  { %v5118_v17 = vpop.eup %5117 }
 0x80c   :  { %v3607_v15 = vmul.f32 %v5118_v17, %v5114_v22  ;;  %v5120_v59 = vpop.eup %5119  ;;  %v4050_v22 = vld [vmem:[#allocation13 + $0x70] sm:$0xff]  ;;  %v4051_v17 = vld [vmem:[#allocation13 + $0x78] sm:$0xff] }
 0x80d   :  { %v3605_v44 = vmul.f32 %v5120_v59, %v6075_v2  ;;  %v4052_v2 = vld [vmem:[#allocation13 + $0x80] sm:$0xff] }
 0x80e   :  { %v5122_v62 = vpop.eup %5121  ;;  %v4729_v36 = vpack.c.bf16 %v4053_v33, %v4052_v2 }
 0x80f   :  { %v6126_v19 = vadd.f32 %v3607_v15, %v3605_v44  ;;  %v4759_v15 = vpack.c.bf16 %v4051_v17, %v4050_v22  ;;  %v4020_v17 = vld [vmem:[#allocation3] sm:$0xff] }
 0x810   :  { %4730 = vmatprep.subr.bf16.mxu0 %v4729_v36 }
 0x811   :  { %5123 = vtanh.f32 %v6126_v19 }
 0x81b   :  { %v5124_v29 = vpop.eup %5123 }
 0x81c   :  { %v3613_v24 = vmul.f32 %v5124_v29, %v5122_v62 }
 0x81e   :  { %3615 = vst.msk [vmem:[#allocation3 + $0x18] sm:$0xff] %vm819_vm1, %v3613_v24  ;;  %4339 = vmatmul.mubr.msk.f32.gmra.mrb[60].mxu0 %vm819_vm1, %v3613_v24  ;;  %4341 = vmatmul.mubr.msk.f32.gmra.mrb[76].mxu1 %vm819_vm1, %v3613_v24 }
 0x81f   :  { %3868 = vmatprep.mubr.f32.mxu0 %v6091_v26  ;;  %3943 = vmatprep.mubr.f32.mxu1 %v6091_v26 }
 0x822   :  { %4342 = vmatmul.mubr.msk.f32.vlgmr.msra.gmra.mrb[62].mxu0 %vm819_vm1, %v6106_v53  ;;  %4344 = vmatmul.mubr.msk.f32.vlgmr.msra.gmra.mrb[78].mxu1 %vm819_vm1, %v6106_v53  ;;  %v4739_v53 = vpack.c.bf16 %v4041_v3, %v4040_v41 }
 0x823   :  { %3872 = vmatprep.mubr.f32.mxu0 %v6091_v26  ;;  %3947 = vmatprep.mubr.f32.mxu1 %v6091_v26  ;;  %v4056_v26 = vld [vmem:[#allocation13 + $0xa0] sm:$0xff] }
 0x824   :  { %4732 = vmatpush3.bf16.msra.mxu0 %v4731_v25  ;;  %v4737_v20 = vpack.c.bf16 %v4057_v43, %v4056_v26 }
 0x825   :  { %4734 = vmatprep.subr.bf16.mxu0 %v4733_v47 }
 0x826   :  { %4343 = vmatmul.mubr.msk.f32.gmra.mrb[0].mxu0 %vm819_vm1, %v3613_v24  ;;  %4345 = vmatmul.mubr.msk.f32.gmra.mrb[32].mxu1 %vm819_vm1, %v3613_v24 }
 0x828   :  { %4736 = vmatpush3.bf16.msra.mxu0 %v4735_v27 }
 0x829   :  { %4738 = vmatprep.subr.bf16.mxu0 %v4737_v20 }
 0x82c   :  { %4740 = vmatpush3.bf16.msra.mxu0 %v4739_v53 }
 0x82d   :  { %4742 = vmatprep.subr.bf16.mxu0 %v4741_v12 }
 0x830   :  { %4744 = vmatpush3.bf16.msra.mxu0 %v4743_v23 }
 0x831   :  { %4746 = vmatprep.subr.bf16.mxu0 %v4745_v21 }
 0x834   :  { %4748 = vmatpush3.bf16.msra.mxu0 %v4747_v18 }
 0x835   :  { %4750 = vmatprep.subr.bf16.mxu0 %v4749_v60 }
 0x838   :  { %4752 = vmatpush3.bf16.msra.mxu0 %v4751_v37 }
 0x839   :  { %4754 = vmatprep.subr.bf16.mxu0 %v4753_v0 }
 0x83c   :  { %4756 = vmatpush3.bf16.msra.mxu0 %v4755_v14 }
 0x83d   :  { %4758 = vmatprep.subr.bf16.mxu0 %v4757_v28 }
 0x840   :  { %4760 = vmatpush3.bf16.msra.mxu0 %v4759_v15  ;;  %v4023_v15 = vld [vmem:[#allocation3 + $0x18] sm:$0xff] }
 0x8b5   :  { %v3720_v59 = vpop.f32.mrb[58].mxu0  ;;  %v3795_v57 = vpop.f32.mrb[30].mxu1 }
 0x8b6   :  { %v3958_v44 = vadd.f32 %v3720_v59, %v5742_v13  ;;  %v3722_v62 = vpop.f32.mrb[59].mxu0  ;;  %v3797_v29 = vpop.f32.mrb[31].mxu1  ;;  %v4807_v36 = vadd.f32 %v3795_v57, %v5759_v4  ;;  %v4022_v59 = vld [vmem:[#allocation3 + $0x10] sm:$0xff]  ;;  %v4025_v57 = vld [vmem:[#allocation3 + $0x28] sm:$0xff] }
 0x8b7   :  { %v3959_v24 = vadd.f32 %v3722_v62, %v5744_v16  ;;  %v4808_v32 = vadd.f32 %v3797_v29, %v5762_v9  ;;  %v4026_v62 = vld [vmem:[#allocation3 + $0x30] sm:$0xff]  ;;  %v4029_v29 = vld [vmem:[#allocation3 + $0x48] sm:$0xff] }
 0x8b8   :  { %v4346_v2 = vmul.f32 -1.442695, %v3958_v44  ;;  %v4350_v34 = vmul.f32 -1.442695, %v4807_v36  ;;  %v4024_v44 = vld [vmem:[#allocation3 + $0x20] sm:$0xff]  ;;  %v4033_v36 = vld [vmem:[#allocation3 + $0x68] sm:$0xff] }
 0x8b9   :  { %v4348_v33 = vmul.f32 -1.442695, %v3959_v24  ;;  %v4028_v24 = vld [vmem:[#allocation3 + $0x40] sm:$0xff] }
 0x8ba   :  { %5125 = vpow2.f32 %v4346_v2  ;;  %v4031_v2 = vld [vmem:[#allocation3 + $0x58] sm:$0xff] }
 0x8bb   :  { %5127 = vpow2.f32 %v4348_v33  ;;  %v4030_v33 = vld [vmem:[#allocation3 + $0x50] sm:$0xff] }
 0x8bc   :  { %5129 = vtanh.f32 %v4808_v32  ;;  %v4032_v32 = vld [vmem:[#allocation3 + $0x60] sm:$0xff] }
 0x8bd   :  { %5131 = vpow2.f32 %v4350_v34  ;;  %v4035_v34 = vld [vmem:[#allocation3 + $0x78] sm:$0xff] }
 0x8c4   :  { %v5126_v25 = vpop.eup %5125 }
 0x8c5   :  { %v3976_v8 = vadd.f32 1.0, %v5126_v25  ;;  %v5128_v11 = vpop.eup %5127 }
 0x8c6   :  { %v3988_v13 = vadd.f32 1.0, %v5128_v11  ;;  %v5130_v47 = vpop.eup %5129  ;;  %v4352_v11 = vld [vmem:[%s6179_s7] ss:$0 sm:$0xff]  ;;  %s5334_s7 = smov [#allocation15]  }
 0x8c7   :  { %5133 = vrcp.f32 %v3976_v8  ;;  %v5132_v10 = vpop.eup %5131  ;;  %s4193_s16 = sshll.u32 %s5334_s7, 4  ;;  %s4194_s16 = int_to_ptr.vmem [resolvable:$true] %s4193_s16 }
 0x8c8   :  { %5135 = vrcp.f32 %v3988_v13  ;;  %v4000_v26 = vadd.f32 1.0, %v5132_v10  ;;  %s5291_s19 = scalar_lea.vmem %s4194_s16, 1024  ;;  %p5296_p7 = scmp.lt.s32.totalorder %s4194_s16, %s4194_s16 }
 0x8c9   :  { %p5292_p6 = scmp.ne.s32.totalorder %s4194_s16, %s5291_s19  ;;  %p5297_p8 = scmp.lt.s32.totalorder %s5291_s19, %s5291_s19 }
 0x8ca   :  { %5137 = vrcp.f32 %v4000_v26 }
 0x8cb   :  { %p5298_p9 = por %p5297_p8, %p5296_p7 }
 0x8cd   :  { %p5299_p10 = pnand %p5298_p9, %p5292_p6 }
 0x8d1   :  { %v5134_v16 = vpop.eup %5133 }
 0x8d2   :  { %v4010_v42 = vmul.f32 %v5134_v16, %v5130_v47  ;;  %v5136_v27 = vpop.eup %5135 }
 0x8d3   :  { %v4008_v43 = vmul.f32 %v5136_v27, %v6103_v48 }
 0x8d4   :  { %v5138_v9 = vpop.eup %5137 }
 0x8d5   :  { %v4012_v4 = vadd.f32 %v4010_v42, %v4008_v43 }
 0x8d7   :  { %5139 = vtanh.f32 %v4012_v4 }
 0x8e1   :  { %v5140_v20 = vpop.eup %5139 }
 0x8e2   :  { %v4016_v41 = vmul.f32 %v5140_v20, %v5138_v9 }
 0x8e4   :  { %4018 = vst.msk [vmem:[#allocation3 + $0x70] sm:$0xff] %vm819_vm1, %v4016_v41 }
 0x8eb   :  { %v4034_v25 = vld [vmem:[#allocation3 + $0x70] sm:$0xff] }
 0x8f1   :  { %v3726_v3 = vpop.f32.mrb[60].mxu0  ;;  %v3801_v53 = vpop.f32.mrb[76].mxu1 }
 0x8f2   :  { %v3727_v46 = vpop.f32.mrb[61].mxu0  ;;  %v3802_v6 = vpop.f32.mrb[77].mxu1 }
 0x8f5   :  { %v3870_v12 = vpop.f32.mrb[62].mxu0  ;;  %v3945_v55 = vpop.f32.mrb[78].mxu1 }
 0x8f6   :  { %v3871_v58 = vpop.f32.mrb[63].mxu0  ;;  %v3946_v23 = vpop.f32.mrb[79].mxu1 }
 0x8f9   :  { %v3874_v49 = vpop.f32.mrb[0].mxu0  ;;  %v3949_v35 = vpop.f32.mrb[32].mxu1 }
 0x8fa   :  { %v4809_v48 = vadd.f32 %v3874_v49, %v5752_v40  ;;  %v3876_v21 = vpop.f32.mrb[1].mxu0  ;;  %v3951_v56 = vpop.f32.mrb[33].mxu1  ;;  %v4825_v61 = vadd.f32 %v3949_v35, %v5769_v39 }
 0x8fb   :  { %v4810_v51 = vadd.f32 %v3876_v21, %v5749_v38  ;;  %v4826_v60 = vadd.f32 %v3951_v56, %v5772_v45 }
 0x8fc   :  { %v4347_v18 = vmul.f32 -1.442695, %v4809_v48  ;;  %v4351_v63 = vmul.f32 -1.442695, %v4825_v61 }
 0x8fd   :  { %v4349_v5 = vmul.f32 -1.442695, %v4810_v51 }
 0x8fe   :  { %5141 = vpow2.f32 %v4347_v18 }
 0x8ff   :  { %5143 = vpow2.f32 %v4349_v5 }
 0x900   :  { %5145 = vtanh.f32 %v4826_v60 }
 0x901   :  { %5147 = vpow2.f32 %v4351_v63 }
 0x908   :  { %v5142_v50 = vpop.eup %5141 }
 0x909   :  { %v3977_v37 = vadd.f32 1.0, %v5142_v50  ;;  %v5144_v31 = vpop.eup %5143 }
 0x90a   :  { %v3989_v40 = vadd.f32 1.0, %v5144_v31  ;;  %v5146_v52 = vpop.eup %5145 }
 0x90b   :  { %5149 = vrcp.f32 %v3977_v37  ;;  %v5148_v0 = vpop.eup %5147 }
 0x90c   :  { %5151 = vrcp.f32 %v3989_v40  ;;  %v4001_v14 = vadd.f32 1.0, %v5148_v0 }
 0x90e   :  { %5153 = vrcp.f32 %v4001_v14 }
 0x915   :  { %v5150_v38 = vpop.eup %5149 }
 0x916   :  { %v4011_v1 = vmul.f32 %v5150_v38, %v5146_v52  ;;  %v5152_v7 = vpop.eup %5151 }
 0x917   :  { %v4009_v30 = vmul.f32 %v5152_v7, %v6126_v19  ;;  %v4027_v19 = vld [vmem:[#allocation3 + $0x38] sm:$0xff] }
 0x918   :  { %v5154_v45 = vpop.eup %5153 }
 0x919   :  { %v4013_v39 = vadd.f32 %v4011_v1, %v4009_v30 }
 0x91b   :  { %5155 = vtanh.f32 %v4013_v39 }
 0x925   :  { %v5156_v54 = vpop.eup %5155 }
 0x926   :  { %v4017_v22 = vmul.f32 %v5156_v54, %v5154_v45 }
 0x928   :  { %4019 = vst.msk [vmem:[#allocation3 + $0x8] sm:$0xff] %vm819_vm1, %v4017_v22 }
 0x92f   :  { %v4021_v28 = vld [vmem:[#allocation3 + $0x8] sm:$0xff] }
 0x930   :  { %4139 = vmatprep.mubr.f32.mxu0 %v4021_v28 }
 0x931   :  { %4140 = vmatmul.mubr.f32.vlgmr.msra.gmra.mrb[64].mxu0 %v4020_v17 }
 0x932   :  { %4144 = vmatprep.mubr.f32.mxu0 %v4023_v15 }
 0x935   :  { %4145 = vmatmul.mubr.f32.gmra.mrb[66].mxu0 %v4022_v59 }
 0x936   :  { %4149 = vmatprep.mubr.f32.mxu0 %v4025_v57 }
 0x939   :  { %4150 = vmatmul.mubr.f32.gmra.mrb[68].mxu0 %v4024_v44 }
 0x93a   :  { %4154 = vmatprep.mubr.f32.mxu0 %v4027_v19 }
 0x93d   :  { %4155 = vmatmul.mubr.f32.gmra.mrb[70].mxu0 %v4026_v62 }
 0x93e   :  { %4159 = vmatprep.mubr.f32.mxu0 %v4029_v29 }
 0x941   :  { %4160 = vmatmul.mubr.f32.gmra.mrb[72].mxu0 %v4028_v24 }
 0x942   :  { %4164 = vmatprep.mubr.f32.mxu0 %v4031_v2 }
 0x945   :  { %4165 = vmatmul.mubr.f32.gmra.mrb[74].mxu0 %v4030_v33 }
 0x946   :  { %4169 = vmatprep.mubr.f32.mxu0 %v4033_v36 }
 0x949   :  { %4170 = vmatmul.mubr.f32.gmra.mrb[76].mxu0 %v4032_v32 }
 0x94a   :  { %4174 = vmatprep.mubr.f32.mxu0 %v4035_v34 }
 0x94d   :  { %4175 = vmatmul.mubr.f32.gmra.mrb[78].mxu0 %v4034_v25 }
 0xa04   :  { %v4385_v8 = vpop.f32.mrb[64].mxu0 }
 0xa05   :  { %v4386_v13 = vpop.f32.mrb[65].mxu0 }
 0xa06   :  { %v4387_v47 = vadd.f32 %v4386_v13, %v4385_v8 }
 0xa08   :  { %v4142_v10 = vadd.f32 %v4387_v47, %v4352_v11  ;;  %v4388_v16 = vpop.f32.mrb[66].mxu0 }
 0xa09   :  { %v4389_v42 = vpop.f32.mrb[67].mxu0 }
 0xa0a   :  { %4180 = vst [vmem:[#allocation15] sm:$0xff] %v4142_v10  ;;  %v4390_v27 = vadd.f32 %v4389_v42, %v4388_v16 }
 0xa0c   :  { %v4147_v26 = vadd.f32 %v4390_v27, %v4352_v11  ;;  %v4391_v43 = vpop.f32.mrb[68].mxu0 }
 0xa0d   :  { %v4392_v4 = vpop.f32.mrb[69].mxu0 }
 0xa0e   :  { %4181 = vst [vmem:[#allocation15 + $0x8] sm:$0xff] %v4147_v26  ;;  %v4393_v9 = vadd.f32 %v4392_v4, %v4391_v43 }
 0xa10   :  { %v4152_v20 = vadd.f32 %v4393_v9, %v4352_v11  ;;  %v4394_v41 = vpop.f32.mrb[70].mxu0 }
 0xa11   :  { %v4395_v3 = vpop.f32.mrb[71].mxu0 }
 0xa12   :  { %4182 = vst [vmem:[#allocation15 + $0x10] sm:$0xff] %v4152_v20  ;;  %v4396_v53 = vadd.f32 %v4395_v3, %v4394_v41 }
 0xa14   :  { %v4157_v46 = vadd.f32 %v4396_v53, %v4352_v11  ;;  %v4397_v6 = vpop.f32.mrb[72].mxu0 }
 0xa15   :  { %v4398_v12 = vpop.f32.mrb[73].mxu0 }
 0xa16   :  { %4183 = vst [vmem:[#allocation15 + $0x18] sm:$0xff] %v4157_v46  ;;  %v4399_v55 = vadd.f32 %v4398_v12, %v4397_v6 }
 0xa18   :  { %v4162_v58 = vadd.f32 %v4399_v55, %v4352_v11  ;;  %v4400_v23 = vpop.f32.mrb[74].mxu0 }
 0xa19   :  { %v4401_v49 = vpop.f32.mrb[75].mxu0 }
 0xa1a   :  { %4184 = vst [vmem:[#allocation15 + $0x20] sm:$0xff] %v4162_v58  ;;  %v4402_v35 = vadd.f32 %v4401_v49, %v4400_v23 }
 0xa1c   :  { %v4167_v48 = vadd.f32 %v4402_v35, %v4352_v11  ;;  %v4403_v21 = vpop.f32.mrb[76].mxu0 }
 0xa1d   :  { %v4404_v56 = vpop.f32.mrb[77].mxu0 }
 0xa1e   :  { %4185 = vst [vmem:[#allocation15 + $0x28] sm:$0xff] %v4167_v48  ;;  %v4405_v51 = vadd.f32 %v4404_v56, %v4403_v21 }
 0xa20   :  { %v4172_v18 = vadd.f32 %v4405_v51, %v4352_v11  ;;  %v4406_v5 = vpop.f32.mrb[78].mxu0 }
 0xa21   :  { %v4407_v61 = vpop.f32.mrb[79].mxu0 }
 0xa22   :  { %4186 = vst [vmem:[#allocation15 + $0x30] sm:$0xff] %v4172_v18  ;;  %v4408_v60 = vadd.f32 %v4407_v61, %v4406_v5 }
 0xa24   :  { %v4177_v63 = vadd.f32 %v4408_v60, %v4352_v11 }
 0xa26   :  { %4187 = vst [vmem:[#allocation15 + $0x38] sm:$0xff] %v4177_v63 }
 0xa27   :  { %5302 = shalt.err (!%p5299_p10)
}
 0xa28   :  { %s5303_s22 = scalar_lea.hbm %s6180_s8, 1024 }
 0xa29   :  { %p5304_p11 = scmp.ne.s32.totalorder %s6180_s8, %s5303_s22  ;;  %p5307_p12 = scmp.lt.u32.totalorder %s5303_s22, %s6180_s8 }
 0xa2b   :  { %p5309_p13 = pnand %p5307_p12, %p5304_p11 }
 0xa2d   :  { %5312 = shalt.err (!%p5309_p13)
}
 0xa2e   :  { %4199 = dma.vmem_to_hbm [thread:$0]  %s4194_s16, 1024, %s6180_s8, [#allocation6], %s5325_s17, %s5325_s17, %s5326_s18  }
 0xa2f   :  { %5321 = dma.done.wait [#allocation6], 1024  }
 0xa30   :  { %5322 = vsyncadd [#allocation6], 4294966272 }
 0xa31   :  { %4203 = vsyncpa [#allocation5], 1 }
 0xa32   :  { %4204 = vsyncpa [#allocation8], 1 }
 0xa33   :  { %4205 = vsyncpa [#allocation11], 1 }
 0xa34   :  { %4206 = vsyncpa [#allocation14], 1 }
 0xa35   :  { %4207 = vsyncpa [#allocation6], 1 }

</bundles_post_ra>
